<compile_context>
chip_gen: v6e
topology: v6e:2x2x1
jax: 0.10.0
libtpu: 0.0.40
codegen_flags: <defaults>
</compile_context>

<pallas_src>
import jax
import jax.numpy as jnp
import numpy as np
from jax import lax
from jax.experimental import pallas as pl
from jax.experimental.pallas import tpu as pltpu

B = 2            # batch
H = 2            # EEG electrode rows (conv "H" dim)
T = 750          # time samples
K1 = 51          # firstconv temporal kernel size
K3 = 15          # separableConv temporal kernel size
C1 = 16          # channels after firstconv
C2 = 32          # channels after depthwiseConv
T2 = T // 4      # 187 after AvgPool(1, 4)
T3 = T2 // 8     # 23  after AvgPool(1, 8)
FEAT = C2 * T3   # 736 -> Linear(736, 2)

# --- kernel-side, lane-padded sizes ---
TP = 768              # padded conv output width (6 * 128)
SG = 8                # stagger depth (one sublane group)
NSH = 7               # ceil(K1 / SG) wide im2col slices
KP = NSH * SG         # 56 zero-padded temporal taps
XW = 896              # lane width of staggered input rows (7 * 128)
T_VALID = T2 * 4      # 748 samples consumed by AvgPool(1,4) (floor semantics)
T2P = 208             # pooled width incl. 7-column left zero pad
T2C = 192             # separableConv output width (187 valid, lane padded)
PAD3 = (K3 - 1) // 2  # 7


def _elu(v):
    # nn.ELU(alpha=1.0); exp only evaluated on the clamped (<=0) branch.
    return jnp.where(v > 0, v, jnp.exp(jnp.minimum(v, 0.0)) - 1.0)


def eegnet_kernel(xstag_ref, wdw_ref, beta2_ref, w3s_ref, b3_ref,
                  wbig_ref, bfc_ref, out_ref):
    # ---- firstconv + depthwiseConv (+ folded BN1/BN2 scales): one MXU matmul ----
    xs = xstag_ref[0]                                          # (16, 896) f32
    x2col = jnp.concatenate(
        [xs[:, SG * a: SG * a + TP] for a in range(NSH)], axis=0)   # (112, 768)
    y2 = jnp.dot(wdw_ref[...], x2col.astype(jnp.bfloat16),
                 preferred_element_type=jnp.float32)           # (32, 768) f32
    y2 = _elu(y2 + beta2_ref[...])                             # folded biases + ELU

    # ---- AvgPool(1, 4): matmul against an iota-generated (768, 208) matrix ----
    t_i = lax.broadcasted_iota(jnp.int32, (TP, T2P), 0)
    u_i = lax.broadcasted_iota(jnp.int32, (TP, T2P), 1)
    hit = ((t_i >> 2) == (u_i - PAD3)) & (t_i < T_VALID)
    pool4 = jnp.where(hit, 0.25, 0.0).astype(jnp.bfloat16)
    z2p = jnp.dot(y2.astype(jnp.bfloat16), pool4,
                  preferred_element_type=jnp.float32)          # (32, 208), 7-col zero lead

    # ---- separableConv (+ folded BN3 scale): one K-stacked matmul (K = 480) ----
    zstack = jnp.concatenate(
        [z2p[:, k: k + T2C] for k in range(K3)], axis=0)       # (480, 192)
    y3 = jnp.dot(w3s_ref[...], zstack.astype(jnp.bfloat16),
                 preferred_element_type=jnp.float32)           # (32, 192)
    y3 = _elu(y3 + b3_ref[...])

    # ---- AvgPool(1, 8) + flatten + Linear(736, 2), folded into wbig ----
    p0 = jnp.sum(y3 * wbig_ref[0], axis=1, keepdims=True)      # (32, 1)
    p1 = jnp.sum(y3 * wbig_ref[1], axis=1, keepdims=True)      # (32, 1)
    logits = jnp.sum(jnp.concatenate([p0, p1], axis=1),
                     axis=0, keepdims=True) + bfc_ref[...]     # (1, 2)
    out_ref[...] = jnp.zeros_like(out_ref)
    out_ref[0, 0:1, 0:2] = logits
    # TODO(synk): train-mode BatchNorm (batch statistics) and Dropout masking are
    # not implemented; this kernel reproduces eval-mode forward semantics.


@jax.jit
def eegnet_forward(x, params):
    """x: (B, 1, H, T) float32 NCHW, exactly as the PyTorch module receives it."""
    s1, t1 = params['s1'], params['b1']        # folded BN scale / shift
    s2, t2 = params['s2'], params['b2']
    s3, t3 = params['s3'], params['b3']
    w1k = params['w1'][:, 0, 0, :]             # (16, 51)
    w2k = params['w2'][:, 0, :, 0]             # (32, 2)   [oc, h]
    w3k = params['w3'][:, :, 0, :]             # (32, 32, 15) [oc, ic, k]

    # Staggered input rows: xstag[b, h*8 + s, t] = xpad[b, h, t + s].
    xpad = jnp.pad(x[:, 0], ((0, 0), (0, 0), (25, XW + SG - 25 - T)))    # (B, 2, 904)
    xstag = jnp.stack([xpad[:, :, s: s + XW] for s in range(SG)], axis=2)
    xstag = xstag.reshape(B, H * SG, XW).astype(jnp.float32)             # (B, 16, 896)

    # Fuse firstconv + depthwiseConv + BN1/BN2 scales into one (32, 112) weight.
    w1s = jnp.pad(w1k * s1[:, None], ((0, 0), (0, KP - K1)))             # (16, 56)
    w1r = jnp.repeat(w1s, 2, axis=0)                                     # row oc -> ic = oc//2
    wh = [((s2 * w2k[:, h])[:, None] * w1r).reshape(C2, NSH, SG)
          for h in range(H)]
    wdw = jnp.stack(wh, axis=2).reshape(C2, H * KP).astype(jnp.bfloat16)  # (32, 112)
    beta2 = (s2 * (w2k[:, 0] + w2k[:, 1]) * jnp.repeat(t1, 2) + t2).reshape(C2, 1)

    # separableConv weight, K-stacked, BN3 scale folded in.
    w3s = (s3[:, None, None] * w3k).transpose(0, 2, 1).reshape(C2, K3 * C2)
    w3s = w3s.astype(jnp.bfloat16)                                        # (32, 480)
    b3v = t3.reshape(C2, 1)

    # AvgPool(1, 8) + flatten + Linear folded into one (2, 32, 192) weight.
    wfc3 = params['wfc'].reshape(C2, T3, 2)        # torch .view flatten order
    wbig = jnp.repeat(wfc3, 8, axis=1) / 8.0                              # (32, 184, 2)
    wbig = jnp.pad(wbig, ((0, 0), (0, T2C - T3 * 8), (0, 0)))
    wbig = wbig.transpose(2, 0, 1).astype(jnp.float32)                    # (2, 32, 192)
    bfc = params['bfc'].reshape(1, 2)

    out = pl.pallas_call(
        eegnet_kernel,
        out_shape=jax.ShapeDtypeStruct((B, 8, 128), jnp.float32),
        grid=(B,),
        in_specs=[
            pl.BlockSpec((1, H * SG, XW), lambda b: (b, 0, 0)),   # staggered input
            pl.BlockSpec((C2, H * KP), lambda b: (0, 0)),         # fused conv1+dw weight
            pl.BlockSpec((C2, 1), lambda b: (0, 0)),              # folded bias (BN1+BN2)
            pl.BlockSpec((C2, K3 * C2), lambda b: (0, 0)),        # K-stacked sep-conv weight
            pl.BlockSpec((C2, 1), lambda b: (0, 0)),              # BN3 shift
            pl.BlockSpec((2, C2, T2C), lambda b: (0, 0, 0)),      # pool8+FC weight
            pl.BlockSpec((1, 2), lambda b: (0, 0)),               # FC bias
        ],
        out_specs=pl.BlockSpec((1, 8, 128), lambda b: (b, 0, 0)),
        compiler_params=pltpu.CompilerParams(
            dimension_semantics=("parallel",)),
    )(xstag, wdw, beta2, w3s, b3v, wbig, bfc)
    return out[:, 0, :2]


def ref_forward(x, p):
    """Pure-JAX (XLA) reference mirroring the PyTorch module (eval mode)."""
    dn = ('NCHW', 'OIHW', 'NCHW')
    prec = lax.Precision.HIGHEST
    y = lax.conv_general_dilated(x, p['w1'], (1, 1), [(0, 0), (25, 25)],
                                 dimension_numbers=dn, precision=prec)
    y = y * p['s1'].reshape(1, C1, 1, 1) + p['b1'].reshape(1, C1, 1, 1)
    y = lax.conv_general_dilated(y, p['w2'], (1, 1), [(0, 0), (0, 0)],
                                 dimension_numbers=dn, feature_group_count=16,
                                 precision=prec)
    y = y * p['s2'].reshape(1, C2, 1, 1) + p['b2'].reshape(1, C2, 1, 1)
    y = _elu(y)
    y = y[..., :T2 * 4].reshape(B, C2, 1, T2, 4).mean(-1)
    y = lax.conv_general_dilated(y, p['w3'], (1, 1), [(0, 0), (7, 7)],
                                 dimension_numbers=dn, precision=prec)
    y = y * p['s3'].reshape(1, C2, 1, 1) + p['b3'].reshape(1, C2, 1, 1)
    y = _elu(y)
    y = y[..., :T3 * 8].reshape(B, C2, 1, T3, 8).mean(-1)
    feat = y.reshape(B, -1)                                      # (B, 736)
    return feat @ p['wfc'] + p['bfc']


if __name__ == "__main__":
    key = jax.random.PRNGKey(0)
    k = jax.random.split(key, 20)

    def bn_fold(kg, kb, km, kv, c):
        gamma = 1.0 + 0.1 * jax.random.normal(kg, (c,), jnp.float32)
        beta = 0.1 * jax.random.normal(kb, (c,), jnp.float32)
        mean = 0.1 * jax.random.normal(km, (c,), jnp.float32)
        var = jax.random.uniform(kv, (c,), jnp.float32, minval=0.5, maxval=1.5)
        scale = gamma / jnp.sqrt(var + 1e-5)
        return scale, beta - mean * scale

    s1, b1 = bn_fold(k[0], k[1], k[2], k[3], C1)
    s2, b2 = bn_fold(k[4], k[5], k[6], k[7], C2)
    s3, b3 = bn_fold(k[8], k[9], k[10], k[11], C2)
    params = dict(
        w1=0.1 * jax.random.normal(k[12], (C1, 1, 1, K1), jnp.float32),
        w2=0.2 * jax.random.normal(k[13], (C2, 1, 2, 1), jnp.float32),
        w3=0.05 * jax.random.normal(k[14], (C2, C2, 1, K3), jnp.float32),
        wfc=0.05 * jax.random.normal(k[15], (FEAT, 2), jnp.float32),
        bfc=0.01 * jax.random.normal(k[16], (2,), jnp.float32),
        s1=s1, b1=b1, s2=s2, b2=b2, s3=s3, b3=b3,
    )
    x = jax.random.normal(k[17], (B, 1, H, T), jnp.float32)

    out = eegnet_forward(x, params)
    out = jax.block_until_ready(out)

    ref = ref_forward(x, params)
    np.testing.assert_allclose(np.asarray(out), np.asarray(ref),
                               rtol=1e-2, atol=1e-2)
    print("KERNEL_OK")
</pallas_src>

<mosaic_0001>
module attributes {stable_mosaic.version = 11 : i64} {
  func.func @eegnet_kernel(%arg0: i32, %arg1: memref<1x16x896xf32, #tpu.memory_space<vmem>>, %arg2: memref<32x112xbf16, #tpu.memory_space<vmem>>, %arg3: memref<32x1xf32, #tpu.memory_space<vmem>>, %arg4: memref<32x480xbf16, #tpu.memory_space<vmem>>, %arg5: memref<32x1xf32, #tpu.memory_space<vmem>>, %arg6: memref<2x32x192xf32, #tpu.memory_space<vmem>>, %arg7: memref<1x2xf32, #tpu.memory_space<vmem>>, %arg8: memref<1x8x128xf32, #tpu.memory_space<vmem>>) attributes {dimension_semantics = [#tpu.dimension_semantics<parallel>], iteration_bounds = array<i64: 2>, scalar_prefetch = 0 : i64, scratch_operands = 0 : i64, tpu.core_type = #tpu.core_type<tc>, window_params = [{transform_indices = @transform_0, window_bounds = array<i64: 1, 16, 896>}, {pipeline_mode = #tpu.pipeline_mode<synchronous>, transform_indices = @transform_1, window_bounds = array<i64: 32, 112>}, {pipeline_mode = #tpu.pipeline_mode<synchronous>, transform_indices = @transform_2, window_bounds = array<i64: 32, 1>}, {pipeline_mode = #tpu.pipeline_mode<synchronous>, transform_indices = @transform_3, window_bounds = array<i64: 32, 480>}, {pipeline_mode = #tpu.pipeline_mode<synchronous>, transform_indices = @transform_4, window_bounds = array<i64: 32, 1>}, {pipeline_mode = #tpu.pipeline_mode<synchronous>, transform_indices = @transform_5, window_bounds = array<i64: 2, 32, 192>}, {pipeline_mode = #tpu.pipeline_mode<synchronous>, transform_indices = @transform_6, window_bounds = array<i64: 1, 2>}, {transform_indices = @transform_7, window_bounds = array<i64: 1, 8, 128>}]} {
    %c0 = arith.constant 0 : index
    %c0_0 = arith.constant 0 : index
    %c0_1 = arith.constant 0 : index
    %0 = vector.load %arg1[%c0, %c0_0, %c0_1] : memref<1x16x896xf32, #tpu.memory_space<vmem>>, vector<1x16x896xf32>
    %1 = vector.shape_cast %0 : vector<1x16x896xf32> to vector<16x896xf32>
    %2 = vector.extract_strided_slice %1 {offsets = [0, 0], sizes = [16, 768], strides = [1, 1]} : vector<16x896xf32> to vector<16x768xf32>
    %3 = vector.extract_strided_slice %1 {offsets = [0, 8], sizes = [16, 768], strides = [1, 1]} : vector<16x896xf32> to vector<16x768xf32>
    %4 = vector.extract_strided_slice %1 {offsets = [0, 16], sizes = [16, 768], strides = [1, 1]} : vector<16x896xf32> to vector<16x768xf32>
    %5 = vector.extract_strided_slice %1 {offsets = [0, 24], sizes = [16, 768], strides = [1, 1]} : vector<16x896xf32> to vector<16x768xf32>
    %6 = vector.extract_strided_slice %1 {offsets = [0, 32], sizes = [16, 768], strides = [1, 1]} : vector<16x896xf32> to vector<16x768xf32>
    %7 = vector.extract_strided_slice %1 {offsets = [0, 40], sizes = [16, 768], strides = [1, 1]} : vector<16x896xf32> to vector<16x768xf32>
    %8 = vector.extract_strided_slice %1 {offsets = [0, 48], sizes = [16, 768], strides = [1, 1]} : vector<16x896xf32> to vector<16x768xf32>
    %9 = tpu.concatenate %2, %3, %4, %5, %6, %7, %8 in 0 : vector<16x768xf32>, vector<16x768xf32>, vector<16x768xf32>, vector<16x768xf32>, vector<16x768xf32>, vector<16x768xf32>, vector<16x768xf32> -> vector<112x768xf32>
    %c0_2 = arith.constant 0 : index
    %c0_3 = arith.constant 0 : index
    %10 = vector.load %arg2[%c0_2, %c0_3] : memref<32x112xbf16, #tpu.memory_space<vmem>>, vector<32x112xbf16>
    %11 = arith.truncf %9 : vector<112x768xf32> to vector<112x768xbf16>
    %cst = arith.constant dense<0.000000e+00> : vector<32x768xf32>
    %12 = tpu.matmul %10, %11, %cst {dimension_numbers = #tpu.dot_dimension_numbers<[1], [0], [0], [1], [0, 0, 1, 1], [], []>} : vector<32x112xbf16>, vector<112x768xbf16>, vector<32x768xf32> -> vector<32x768xf32>
    %c0_4 = arith.constant 0 : index
    %c0_5 = arith.constant 0 : index
    %13 = vector.load %arg3[%c0_4, %c0_5] : memref<32x1xf32, #tpu.memory_space<vmem>>, vector<32x1xf32>
    %14 = vector.broadcast %13 : vector<32x1xf32> to vector<32x768xf32>
    %15 = arith.addf %12, %14 : vector<32x768xf32>
    %cst_6 = arith.constant 0.000000e+00 : f32
    %16 = vector.broadcast %cst_6 : f32 to vector<32x768xf32>
    %17 = arith.cmpf ogt, %15, %16 : vector<32x768xf32>
    %cst_7 = arith.constant 0.000000e+00 : f32
    %18 = vector.broadcast %cst_7 : f32 to vector<32x768xf32>
    %19 = arith.minimumf %15, %18 : vector<32x768xf32>
    %20 = math.exp %19 : vector<32x768xf32>
    %cst_8 = arith.constant 1.000000e+00 : f32
    %21 = vector.broadcast %cst_8 : f32 to vector<32x768xf32>
    %22 = arith.subf %20, %21 : vector<32x768xf32>
    %23 = arith.select %17, %15, %22 : vector<32x768xi1>, vector<32x768xf32>
    %24 = tpu.iota {dimensions = array<i32: 0>} : vector<768x208xi32>
    %25 = tpu.iota {dimensions = array<i32: 1>} : vector<768x208xi32>
    %c2_i32 = arith.constant 2 : i32
    %26 = vector.broadcast %c2_i32 : i32 to vector<768x208xi32>
    %27 = arith.shrsi %24, %26 : vector<768x208xi32>
    %c7_i32 = arith.constant 7 : i32
    %28 = vector.broadcast %c7_i32 : i32 to vector<768x208xi32>
    %29 = arith.subi %25, %28 : vector<768x208xi32>
    %30 = arith.cmpi eq, %27, %29 : vector<768x208xi32>
    %c748_i32 = arith.constant 748 : i32
    %31 = vector.broadcast %c748_i32 : i32 to vector<768x208xi32>
    %32 = arith.cmpi slt, %24, %31 : vector<768x208xi32>
    %33 = arith.andi %30, %32 : vector<768x208xi1>
    %cst_9 = arith.constant 2.500000e-01 : f32
    %cst_10 = arith.constant 0.000000e+00 : f32
    %34 = vector.broadcast %cst_9 : f32 to vector<768x208xf32>
    %35 = vector.broadcast %cst_10 : f32 to vector<768x208xf32>
    %36 = arith.select %33, %34, %35 : vector<768x208xi1>, vector<768x208xf32>
    %37 = arith.truncf %36 : vector<768x208xf32> to vector<768x208xbf16>
    %38 = arith.truncf %23 : vector<32x768xf32> to vector<32x768xbf16>
    %cst_11 = arith.constant dense<0.000000e+00> : vector<32x208xf32>
    %39 = tpu.matmul %38, %37, %cst_11 {dimension_numbers = #tpu.dot_dimension_numbers<[1], [0], [0], [1], [0, 0, 1, 1], [], []>} : vector<32x768xbf16>, vector<768x208xbf16>, vector<32x208xf32> -> vector<32x208xf32>
    %40 = vector.extract_strided_slice %39 {offsets = [0, 0], sizes = [32, 192], strides = [1, 1]} : vector<32x208xf32> to vector<32x192xf32>
    %41 = vector.extract_strided_slice %39 {offsets = [0, 1], sizes = [32, 192], strides = [1, 1]} : vector<32x208xf32> to vector<32x192xf32>
    %42 = vector.extract_strided_slice %39 {offsets = [0, 2], sizes = [32, 192], strides = [1, 1]} : vector<32x208xf32> to vector<32x192xf32>
    %43 = vector.extract_strided_slice %39 {offsets = [0, 3], sizes = [32, 192], strides = [1, 1]} : vector<32x208xf32> to vector<32x192xf32>
    %44 = vector.extract_strided_slice %39 {offsets = [0, 4], sizes = [32, 192], strides = [1, 1]} : vector<32x208xf32> to vector<32x192xf32>
    %45 = vector.extract_strided_slice %39 {offsets = [0, 5], sizes = [32, 192], strides = [1, 1]} : vector<32x208xf32> to vector<32x192xf32>
    %46 = vector.extract_strided_slice %39 {offsets = [0, 6], sizes = [32, 192], strides = [1, 1]} : vector<32x208xf32> to vector<32x192xf32>
    %47 = vector.extract_strided_slice %39 {offsets = [0, 7], sizes = [32, 192], strides = [1, 1]} : vector<32x208xf32> to vector<32x192xf32>
    %48 = vector.extract_strided_slice %39 {offsets = [0, 8], sizes = [32, 192], strides = [1, 1]} : vector<32x208xf32> to vector<32x192xf32>
    %49 = vector.extract_strided_slice %39 {offsets = [0, 9], sizes = [32, 192], strides = [1, 1]} : vector<32x208xf32> to vector<32x192xf32>
    %50 = vector.extract_strided_slice %39 {offsets = [0, 10], sizes = [32, 192], strides = [1, 1]} : vector<32x208xf32> to vector<32x192xf32>
    %51 = vector.extract_strided_slice %39 {offsets = [0, 11], sizes = [32, 192], strides = [1, 1]} : vector<32x208xf32> to vector<32x192xf32>
    %52 = vector.extract_strided_slice %39 {offsets = [0, 12], sizes = [32, 192], strides = [1, 1]} : vector<32x208xf32> to vector<32x192xf32>
    %53 = vector.extract_strided_slice %39 {offsets = [0, 13], sizes = [32, 192], strides = [1, 1]} : vector<32x208xf32> to vector<32x192xf32>
    %54 = vector.extract_strided_slice %39 {offsets = [0, 14], sizes = [32, 192], strides = [1, 1]} : vector<32x208xf32> to vector<32x192xf32>
    %55 = tpu.concatenate %40, %41, %42, %43, %44, %45, %46, %47, %48, %49, %50, %51, %52, %53, %54 in 0 : vector<32x192xf32>, vector<32x192xf32>, vector<32x192xf32>, vector<32x192xf32>, vector<32x192xf32>, vector<32x192xf32>, vector<32x192xf32>, vector<32x192xf32>, vector<32x192xf32>, vector<32x192xf32>, vector<32x192xf32>, vector<32x192xf32>, vector<32x192xf32>, vector<32x192xf32>, vector<32x192xf32> -> vector<480x192xf32>
    %c0_12 = arith.constant 0 : index
    %c0_13 = arith.constant 0 : index
    %56 = vector.load %arg4[%c0_12, %c0_13] : memref<32x480xbf16, #tpu.memory_space<vmem>>, vector<32x480xbf16>
    %57 = arith.truncf %55 : vector<480x192xf32> to vector<480x192xbf16>
    %cst_14 = arith.constant dense<0.000000e+00> : vector<32x192xf32>
    %58 = tpu.matmul %56, %57, %cst_14 {dimension_numbers = #tpu.dot_dimension_numbers<[1], [0], [0], [1], [0, 0, 1, 1], [], []>} : vector<32x480xbf16>, vector<480x192xbf16>, vector<32x192xf32> -> vector<32x192xf32>
    %c0_15 = arith.constant 0 : index
    %c0_16 = arith.constant 0 : index
    %59 = vector.load %arg5[%c0_15, %c0_16] : memref<32x1xf32, #tpu.memory_space<vmem>>, vector<32x1xf32>
    %60 = vector.broadcast %59 : vector<32x1xf32> to vector<32x192xf32>
    %61 = arith.addf %58, %60 : vector<32x192xf32>
    %cst_17 = arith.constant 0.000000e+00 : f32
    %62 = vector.broadcast %cst_17 : f32 to vector<32x192xf32>
    %63 = arith.cmpf ogt, %61, %62 : vector<32x192xf32>
    %cst_18 = arith.constant 0.000000e+00 : f32
    %64 = vector.broadcast %cst_18 : f32 to vector<32x192xf32>
    %65 = arith.minimumf %61, %64 : vector<32x192xf32>
    %66 = math.exp %65 : vector<32x192xf32>
    %cst_19 = arith.constant 1.000000e+00 : f32
    %67 = vector.broadcast %cst_19 : f32 to vector<32x192xf32>
    %68 = arith.subf %66, %67 : vector<32x192xf32>
    %69 = arith.select %63, %61, %68 : vector<32x192xi1>, vector<32x192xf32>
    %c0_20 = arith.constant 0 : index
    %c0_21 = arith.constant 0 : index
    %c0_22 = arith.constant 0 : index
    %70 = vector.load %arg6[%c0_20, %c0_21, %c0_22] : memref<2x32x192xf32, #tpu.memory_space<vmem>>, vector<1x32x192xf32>
    %71 = vector.shape_cast %70 : vector<1x32x192xf32> to vector<32x192xf32>
    %72 = arith.mulf %69, %71 : vector<32x192xf32>
    %cst_23 = arith.constant dense<0.000000e+00> : vector<32xf32>
    %73 = vector.multi_reduction <add>, %72, %cst_23 [1] : vector<32x192xf32> to vector<32xf32>
    %74 = vector.shape_cast %73 : vector<32xf32> to vector<32x1xf32>
    %c1 = arith.constant 1 : index
    %c0_24 = arith.constant 0 : index
    %c0_25 = arith.constant 0 : index
    %75 = vector.load %arg6[%c1, %c0_24, %c0_25] : memref<2x32x192xf32, #tpu.memory_space<vmem>>, vector<1x32x192xf32>
    %76 = vector.shape_cast %75 : vector<1x32x192xf32> to vector<32x192xf32>
    %77 = arith.mulf %69, %76 : vector<32x192xf32>
    %cst_26 = arith.constant dense<0.000000e+00> : vector<32xf32>
    %78 = vector.multi_reduction <add>, %77, %cst_26 [1] : vector<32x192xf32> to vector<32xf32>
    %79 = vector.shape_cast %78 : vector<32xf32> to vector<32x1xf32>
    %80 = tpu.concatenate %74, %79 in 1 : vector<32x1xf32>, vector<32x1xf32> -> vector<32x2xf32>
    %cst_27 = arith.constant dense<0.000000e+00> : vector<2xf32>
    %81 = vector.multi_reduction <add>, %80, %cst_27 [0] : vector<32x2xf32> to vector<2xf32>
    %82 = vector.shape_cast %81 : vector<2xf32> to vector<1x2xf32>
    %c0_28 = arith.constant 0 : index
    %c0_29 = arith.constant 0 : index
    %83 = vector.load %arg7[%c0_28, %c0_29] : memref<1x2xf32, #tpu.memory_space<vmem>>, vector<1x2xf32>
    %84 = arith.addf %82, %83 : vector<1x2xf32>
    %cst_30 = arith.constant 0.000000e+00 : f32
    %85 = vector.broadcast %cst_30 : f32 to vector<1x8x128xf32>
    %c0_31 = arith.constant 0 : index
    %c0_32 = arith.constant 0 : index
    %c0_33 = arith.constant 0 : index
    %86 = vector.load %arg8[%c0_31, %c0_32, %c0_33] : memref<1x8x128xf32, #tpu.memory_space<vmem>>, vector<1x8x128xf32>
    tpu.vector_store %arg8[%c0_31, %c0_32, %c0_33], %85 {strides = array<i32>} : memref<1x8x128xf32, #tpu.memory_space<vmem>>, vector<1x8x128xf32>,
    %c0_34 = arith.constant 0 : index
    %c0_35 = arith.constant 0 : index
    %c0_36 = arith.constant 0 : index
    %87 = vector.load %arg8[%c0_34, %c0_35, %c0_36] : memref<1x8x128xf32, #tpu.memory_space<vmem>>, vector<1x1x2xf32>
    %88 = vector.shape_cast %87 : vector<1x1x2xf32> to vector<1x2xf32>
    %89 = vector.shape_cast %84 : vector<1x2xf32> to vector<1x1x2xf32>
    tpu.vector_store %arg8[%c0_34, %c0_35, %c0_36], %89 {strides = array<i32>} : memref<1x8x128xf32, #tpu.memory_space<vmem>>, vector<1x1x2xf32>,
    return
  }
  func.func @transform_0(%arg0: i32) -> (i32, i32, i32) {
    %c0_i32 = arith.constant 0 : i32
    %c0_i32_0 = arith.constant 0 : i32
    %c0_i32_1 = arith.constant 0 : i32
    return %arg0, %c0_i32, %c0_i32_0 : i32, i32, i32
  }
  func.func @transform_1(%arg0: i32) -> (i32, i32) {
    %c0_i32 = arith.constant 0 : i32
    %c0_i32_0 = arith.constant 0 : i32
    %c0_i32_1 = arith.constant 0 : i32
    return %c0_i32, %c0_i32_0 : i32, i32
  }
  func.func @transform_2(%arg0: i32) -> (i32, i32) {
    %c0_i32 = arith.constant 0 : i32
    %c0_i32_0 = arith.constant 0 : i32
    %c0_i32_1 = arith.constant 0 : i32
    return %c0_i32, %c0_i32_0 : i32, i32
  }
  func.func @transform_3(%arg0: i32) -> (i32, i32) {
    %c0_i32 = arith.constant 0 : i32
    %c0_i32_0 = arith.constant 0 : i32
    %c0_i32_1 = arith.constant 0 : i32
    return %c0_i32, %c0_i32_0 : i32, i32
  }
  func.func @transform_4(%arg0: i32) -> (i32, i32) {
    %c0_i32 = arith.constant 0 : i32
    %c0_i32_0 = arith.constant 0 : i32
    %c0_i32_1 = arith.constant 0 : i32
    return %c0_i32, %c0_i32_0 : i32, i32
  }
  func.func @transform_5(%arg0: i32) -> (i32, i32, i32) {
    %c0_i32 = arith.constant 0 : i32
    %c0_i32_0 = arith.constant 0 : i32
    %c0_i32_1 = arith.constant 0 : i32
    %c0_i32_2 = arith.constant 0 : i32
    return %c0_i32, %c0_i32_0, %c0_i32_1 : i32, i32, i32
  }
  func.func @transform_6(%arg0: i32) -> (i32, i32) {
    %c0_i32 = arith.constant 0 : i32
    %c0_i32_0 = arith.constant 0 : i32
    %c0_i32_1 = arith.constant 0 : i32
    return %c0_i32, %c0_i32_0 : i32, i32
  }
  func.func @transform_7(%arg0: i32) -> (i32, i32, i32) {
    %c0_i32 = arith.constant 0 : i32
    %c0_i32_0 = arith.constant 0 : i32
    %c0_i32_1 = arith.constant 0 : i32
    return %arg0, %c0_i32, %c0_i32_0 : i32, i32, i32
  }
}

</mosaic_0001>

<bundles_post_ra>
// kernel: eegnet_forward.1
= control target key start
LH: loop header
LB: loop body
LE: loop exit
PB: predicated region body
PF: predicated region fallthrough
CT: control target
= control target key end

     0   :  { %s3924_s24 = smov 0   ;;  %s6269_s0 = inlined_call_operand.vmem [shape: f32[2,16,896], index: 0, kind: input, shape index: {}]   ;;  %s6270_s1 = inlined_call_operand.vmem [shape: bf16[32,112], index: 1, kind: input, shape index: {}]   ;;  %s6271_s2 = inlined_call_operand.vmem [shape: f32[32,1], index: 2, kind: input, shape index: {}]   ;;  %s6272_s3 = inlined_call_operand.vmem [shape: bf16[32,480], index: 3, kind: input, shape index: {}]   ;;  %s6273_s4 = inlined_call_operand.vmem [shape: f32[32,1], index: 4, kind: input, shape index: {}]   ;;  %s6274_s5 = inlined_call_operand.vmem [shape: f32[2,32,192], index: 5, kind: input, shape index: {}]   ;;  %s6275_s6 = inlined_call_operand.vmem [shape: f32[1,2], index: 6, kind: input, shape index: {}]   ;;  %s6276_s7 = inlined_call_operand.vmem [shape: f32[2,8,128], index: 7, kind: output, shape index: {}]  }
   0x1 LB: > { %s2996_s25 = sadd.s32 4294967295, %s3860_s24   ;;  %p3000_p0 = scmp.ge.s32.totalorder %s3860_s24, 1  ;;  %s3860_s24 = sphi %s3924_s24, %s17_s24  }
   0x2   : > { %p237_p1 = scmp.lt.s32.totalorder %s3860_s24, 3 }
   0x4   : > { %p238_p2 = pnand %p3000_p0, %p237_p1 }
   0x5   : > { %p268_p3 = scmp.lt.s32.totalorder (!%p238_p2), %s2996_s25, 1  ;;  %s3862_s30 = smov (!%p238_p2), 80  }
   0x6   : > { %241 = sbr.rel (%p238_p2) target bundleno = 1289 (0x509), region = 48  ;;  %s3863_s8 = smov (!%p238_p2), 88  }
   0x7   : > { %s3864_s9 = smov (!%p238_p2), 96   ;;  %s3865_s10 = smov (!%p238_p2), 104  }
   0x8   : > { %s3866_s11 = smov (!%p238_p2), 112   ;;  %s3867_s12 = smov (!%p238_p2), 120  }
   0x9   : > { %s3870_s27 = smov (!%p238_p2), 125   ;;  %s3871_s28 = smov (!%p238_p2), 126  }
   0xa   : > { %s3878_s13 = smov (!%p238_p2), 114   ;;  %s3879_s14 = smov (!%p238_p2), 123  }
   0xb   : > { %s6622_s25 = smov (!%p268_p3, %s2996_s25), 1  ;;  %v3868_v16 = vmov 0   ;;  %v670_v24 = vld [vmem:[%s6271_s2] sm:$0xff]  ;;  %v671_v25 = vld [vmem:[%s6271_s2 + $0x8] sm:$0xff]  ;;  %v673_v26 = vld [vmem:[%s6271_s2 + $0x18] sm:$0xff]  ;;  %vm599_vm0 = vcmask 654336  }
   0xc   : > { %s3253_s26 = smul.u32 112, %s6622_s25  ;;  %742 = vmatprep.mubr.bf16.mxu0 %v3868_v16  ;;  %795 = vmatprep.mubr.bf16.mxu1 %v3868_v16  ;;  %v672_v27 = vld [vmem:[%s6271_s2 + $0x10] sm:$0xff]  ;;  %vm546_vm1 = vcmask 719872   ;;  %vm6278_vm2 = vcmask 785408   ;;  %vm440_vm3 = vcmask 850944   ;;  %vm387_vm4 = vcmask 916480  }
   0xd   : > { %3494 = vset.pattern.permute.xlu0 %v3868_v16  ;;  %3495 = vset.pattern.permute.xlu1 %v3868_v16  ;;  %vm6277_vm5 = vcmask 982016   ;;  %s3880_s15 = smov 115   ;;  %s3881_s16 = smov 124  }
   0xe   : > { %s3938_s29 = scalar_lea.vmem %s6269_s0, %s3253_s26  ;;  %s3882_s17 = smov 116  }
   0xf   : > { %v3941_v0 = vld [vmem:[%s3938_s29 + $0x8] sm:$0xff]  ;;  %v3944_v1 = vld [vmem:[%s3938_s29 + $0x10] sm:$0xff]  ;;  %v3947_v2 = vld [vmem:[%s3938_s29] sm:$0xff] }
  0x10   : > { %v3284_v3 = vpack.i.bf16 %v3944_v1, %v3941_v0  ;;  %v3952_v4 = vld [vmem:[%s3938_s29 + $0x38] sm:$0xff]  ;;  %v3955_v5 = vld [vmem:[%s3938_s29 + $0x40] sm:$0xff]  ;;  %v3958_v6 = vld [vmem:[%s3938_s29 + $0x48] sm:$0xff] }
  0x11   : > { %v3294_v7 = vpack.i.bf16 %v3952_v4, %v3947_v2  ;;  %v3289_v8 = vpack.i.bf16 %v3958_v6, %v3955_v5  ;;  %v629_v9 = vpack.c.bf16 %v3955_v5, %v3941_v0  ;;  %v628_v10 = vpack.c.bf16 %v3952_v4, %v3947_v2  ;;  %v3985_v11 = vld [vmem:[%s3938_s29 + $0x18] sm:$0xff]  ;;  %v3988_v12 = vld [vmem:[%s3938_s29 + $0x20] sm:$0xff]  ;;  %v3991_v13 = vld [vmem:[%s3938_s29 + $0x50] sm:$0xff] }
  0x12   : > { %3285 = vrot.lane.b32.xlu0 %v3284_v3, %s3862_s30  ;;  %v3994_v14 = vld [vmem:[%s3938_s29 + $0x58] sm:$0xff]  ;;  %v3374_v15 = vpack.i.bf16 %v3988_v12, %v3985_v11  ;;  %v4004_v18 = vld [vmem:[%s3938_s29 + $0x28] sm:$0xff]  ;;  %v284_v19 = vld [vmem:[%s3938_s29 + $0x30] sm:$0xff] }
  0x13   : > { %3295 = vrot.lane.b32.xlu1 %v3294_v7, %s3862_s30  ;;  %v3379_v17 = vpack.i.bf16 %v3994_v14, %v3991_v13  ;;  %v4009_v20 = vld [vmem:[%s3938_s29 + $0x60] sm:$0xff]  ;;  %v291_v21 = vld [vmem:[%s3938_s29 + $0x68] sm:$0xff]  ;;  %v3384_v22 = vpack.i.bf16 %v284_v19, %v4004_v18  ;;  %s3872_s29 = smov 117  }
  0x14   : > { %v3389_v23 = vpack.i.bf16 %v291_v21, %v4009_v20 }
  0x16   : > { %3290 = vrot.lane.b32.xlu0 %v3289_v8, %s3862_s30 }
  0x17   : > { %3300 = vrot.lane.b32.xlu1 %v3284_v3, %s3863_s8 }
  0x1a   : > { %3305 = vrot.lane.b32.xlu0 %v3289_v8, %s3863_s8 }
  0x1b   : > { %3310 = vrot.lane.b32.xlu1 %v3294_v7, %s3863_s8 }
  0x1e   : > { %3315 = vrot.lane.b32.xlu0 %v3284_v3, %s3864_s9 }
  0x1f   : > { %3320 = vrot.lane.b32.xlu1 %v3289_v8, %s3864_s9 }
  0x22   : > { %3325 = vrot.lane.b32.xlu0 %v3294_v7, %s3864_s9 }
  0x23   : > { %3330 = vrot.lane.b32.xlu1 %v3284_v3, %s3865_s10 }
  0x26   : > { %3335 = vrot.lane.b32.xlu0 %v3289_v8, %s3865_s10 }
  0x27   : > { %3340 = vrot.lane.b32.xlu1 %v3294_v7, %s3865_s10 }
  0x2a   : > { %3345 = vrot.lane.b32.xlu0 %v3284_v3, %s3866_s11 }
  0x2b   : > { %3350 = vrot.lane.b32.xlu1 %v3289_v8, %s3866_s11 }
  0x2e   : > { %3355 = vrot.lane.b32.xlu0 %v3294_v7, %s3866_s11 }
  0x2f   : > { %3360 = vrot.lane.b32.xlu1 %v3284_v3, %s3867_s12 }
  0x32   : > { %3365 = vrot.lane.b32.xlu0 %v3289_v8, %s3867_s12 }
  0x33   : > { %3370 = vrot.lane.b32.xlu1 %v3294_v7, %s3867_s12 }
  0x36   : > { %3375 = vrot.lane.b32.xlu0 %v3374_v15, %s3862_s30 }
  0x37   : > { %3380 = vrot.lane.b32.xlu1 %v3379_v17, %s3862_s30 }
  0x3a   : > { %3385 = vrot.lane.b32.xlu0 %v3384_v22, %s3862_s30 }
  0x3b   : > { %3390 = vrot.lane.b32.xlu1 %v3389_v23, %s3862_s30  ;;  %s3873_s30 = smov 127  }
  0x3e   : > { %3395 = vrot.lane.b32.xlu0 %v3374_v15, %s3863_s8 }
  0x3f   : > { %3400 = vrot.lane.b32.xlu1 %v3379_v17, %s3863_s8 }
  0x42   : > { %3405 = vrot.lane.b32.xlu0 %v3384_v22, %s3863_s8 }
  0x43   : > { %3410 = vrot.lane.b32.xlu1 %v3389_v23, %s3863_s8  ;;  %s3874_s8 = smov 118  }
  0x46   : > { %3415 = vrot.lane.b32.xlu0 %v3374_v15, %s3864_s9 }
  0x47   : > { %3420 = vrot.lane.b32.xlu1 %v3379_v17, %s3864_s9 }
  0x4a   : > { %3425 = vrot.lane.b32.xlu0 %v3384_v22, %s3864_s9 }
  0x4b   : > { %3430 = vrot.lane.b32.xlu1 %v3389_v23, %s3864_s9  ;;  %s3875_s9 = smov 119  }
  0x4e   : > { %3435 = vrot.lane.b32.xlu0 %v3374_v15, %s3865_s10 }
  0x4f   : > { %3440 = vrot.lane.b32.xlu1 %v3379_v17, %s3865_s10 }
  0x52   : > { %3445 = vrot.lane.b32.xlu0 %v3384_v22, %s3865_s10 }
  0x53   : > { %3450 = vrot.lane.b32.xlu1 %v3389_v23, %s3865_s10  ;;  %s3876_s10 = smov 121  }
  0x56   : > { %3455 = vrot.lane.b32.xlu0 %v3374_v15, %s3866_s11 }
  0x57   : > { %3460 = vrot.lane.b32.xlu1 %v3379_v17, %s3866_s11 }
  0x5a   : > { %3465 = vrot.lane.b32.xlu0 %v3384_v22, %s3866_s11 }
  0x5b   : > { %3470 = vrot.lane.b32.xlu1 %v3389_v23, %s3866_s11  ;;  %s3877_s11 = smov 122  }
  0x5e   : > { %3475 = vrot.lane.b32.xlu0 %v3374_v15, %s3867_s12 }
  0x5f   : > { %3480 = vrot.lane.b32.xlu1 %v3379_v17, %s3867_s12 }
  0x62   : > { %3485 = vrot.lane.b32.xlu0 %v3384_v22, %s3867_s12 }
  0x63   : > { %3490 = vrot.lane.b32.xlu1 %v3389_v23, %s3867_s12 }
  0x66   : > { %676 = vperm.xlu0 %3494, %v670_v24  }
  0x67   : > { %681 = vperm.xlu1 %3495, %v671_v25  }
  0x6a   : > { %691 = vperm.xlu0 %3494, %v673_v26  }
  0x6b   : > { %686 = vperm.xlu1 %3495, %v672_v27  }
  0x84   : > { %v4052_v28 = vpop.permute.xlu0 %3285 }
  0x85   : > { %v3296_v29 = vpop.permute.xlu1 %3295  ;;  %v3288_v30 = vunpack.i.h.bf16 %v4052_v28  ;;  %v3287_v31 = vunpack.i.l.bf16 %v4052_v28 }
  0x86   : > { %v3297_v32 = vunpack.i.l.bf16 %v3296_v29  ;;  %v3298_v34 = vunpack.i.h.bf16 %v3296_v29 }
  0x87   : > { %v601_v38 = vsel %vm599_vm0, %v3287_v31, %v3288_v30 }
  0x88   : > { %v4056_v33 = vpop.permute.xlu0 %3290  ;;  %v600_v39 = vsel %vm599_vm0, %v3297_v32, %v3287_v31 }
  0x89   : > { %v3293_v35 = vunpack.i.h.bf16 %v4056_v33  ;;  %v3292_v36 = vunpack.i.l.bf16 %v4056_v33  ;;  %v4060_v37 = vpop.permute.xlu1 %3300 }
  0x8a   : > { %v3303_v40 = vunpack.i.h.bf16 %v4060_v37  ;;  %v3302_v41 = vunpack.i.l.bf16 %v4060_v37 }
  0x8b   : > { %v607_v42 = vsel %vm599_vm0, %v3292_v36, %v3293_v35  ;;  %v606_v43 = vsel %vm599_vm0, %v3298_v34, %v3292_v36 }
  0x8c   : > { %v4072_v44 = vpop.permute.xlu0 %3305  ;;  %v665_v45 = vpack.c.bf16 %v607_v42, %v601_v38  ;;  %v664_v46 = vpack.c.bf16 %v606_v43, %v600_v39  ;;  %v548_v52 = vsel %vm546_vm1, %v3302_v41, %v3303_v40 }
  0x8d   : > { %v3308_v47 = vunpack.i.h.bf16 %v4072_v44  ;;  %v3307_v48 = vunpack.i.l.bf16 %v4072_v44  ;;  %v3311_v49 = vpop.permute.xlu1 %3310 }
  0x8e   : > { %v3313_v50 = vunpack.i.h.bf16 %v3311_v49  ;;  %v3312_v51 = vunpack.i.l.bf16 %v3311_v49  ;;  %712 = vmatprep.subr.bf16.mxu0 %v665_v45 }
  0x8f   : > { %713 = vmatpush1.bf16.msra.mxu0 %v664_v46  ;;  %v554_v53 = vsel %vm546_vm1, %v3307_v48, %v3308_v47 }
  0x90   : > { %v4082_v54 = vpop.permute.xlu0 %3315  ;;  %v659_v55 = vpack.c.bf16 %v554_v53, %v548_v52  ;;  %v547_v56 = vsel %vm546_vm1, %v3312_v51, %v3302_v41  ;;  %v553_v57 = vsel %vm546_vm1, %v3313_v50, %v3307_v48 }
  0x91   : > { %v3318_v58 = vunpack.i.h.bf16 %v4082_v54  ;;  %v3317_v59 = vunpack.i.l.bf16 %v4082_v54  ;;  %v4088_v60 = vpop.permute.xlu1 %3320  ;;  %v658_v61 = vpack.c.bf16 %v553_v57, %v547_v56 }
  0x92   : > { %v3323_v62 = vunpack.i.h.bf16 %v4088_v60  ;;  %v3322_v63 = vunpack.i.l.bf16 %v4088_v60  ;;  %714 = vmatprep.subr.bf16.mxu0 %v659_v55 }
  0x93   : > { %715 = vmatpush1.bf16.msra.mxu0 %v658_v61  ;;  %v495_v3 = vsel %vm6278_vm2, %v3317_v59, %v3318_v58 }
  0x94   : > { %v3326_v7 = vpop.permute.xlu0 %3325  ;;  %v501_v8 = vsel %vm6278_vm2, %v3322_v63, %v3323_v62 }
  0x95   : > { %v3328_v15 = vunpack.i.h.bf16 %v3326_v7  ;;  %v3327_v17 = vunpack.i.l.bf16 %v3326_v7  ;;  %v4098_v19 = vpop.permute.xlu1 %3330  ;;  %v653_v21 = vpack.c.bf16 %v501_v8, %v495_v3 }
  0x96   : > { %v3333_v22 = vunpack.i.h.bf16 %v4098_v19  ;;  %v3332_v23 = vunpack.i.l.bf16 %v4098_v19 }
  0x97   : > { %716 = vmatprep.subr.bf16.mxu0 %v653_v21  ;;  %v494_v24 = vsel %vm6278_vm2, %v3327_v17, %v3317_v59  ;;  %v500_v25 = vsel %vm6278_vm2, %v3328_v15, %v3322_v63 }
  0x98   : > { %v4104_v26 = vpop.permute.xlu0 %3335  ;;  %v652_v27 = vpack.c.bf16 %v500_v25, %v494_v24  ;;  %v442_v38 = vsel %vm440_vm3, %v3332_v23, %v3333_v22 }
  0x99   : > { %v3338_v29 = vunpack.i.h.bf16 %v4104_v26  ;;  %v3337_v31 = vunpack.i.l.bf16 %v4104_v26  ;;  %v3341_v32 = vpop.permute.xlu1 %3340 }
  0x9a   : > { %v3343_v34 = vunpack.i.h.bf16 %v3341_v32  ;;  %v3342_v36 = vunpack.i.l.bf16 %v3341_v32  ;;  %717 = vmatpush1.bf16.msra.mxu0 %v652_v27 }
  0x9b   : > { %v448_v39 = vsel %vm440_vm3, %v3337_v31, %v3338_v29 }
  0x9c   : > { %v4114_v41 = vpop.permute.xlu0 %3345  ;;  %v647_v42 = vpack.c.bf16 %v448_v39, %v442_v38  ;;  %v441_v43 = vsel %vm440_vm3, %v3342_v36, %v3332_v23  ;;  %v447_v45 = vsel %vm440_vm3, %v3343_v34, %v3337_v31 }
  0x9d   : > { %v3348_v46 = vunpack.i.h.bf16 %v4114_v41  ;;  %v3347_v48 = vunpack.i.l.bf16 %v4114_v41  ;;  %v4120_v49 = vpop.permute.xlu1 %3350  ;;  %v646_v50 = vpack.c.bf16 %v447_v45, %v441_v43 }
  0x9e   : > { %v3353_v51 = vunpack.i.h.bf16 %v4120_v49  ;;  %v3352_v52 = vunpack.i.l.bf16 %v4120_v49  ;;  %718 = vmatprep.subr.bf16.mxu0 %v647_v42 }
  0x9f   : > { %719 = vmatpush1.bf16.msra.mxu0 %v646_v50  ;;  %v389_v53 = vsel %vm387_vm4, %v3347_v48, %v3348_v46 }
  0xa0   : > { %v3356_v55 = vpop.permute.xlu0 %3355  ;;  %v395_v56 = vsel %vm387_vm4, %v3352_v52, %v3353_v51 }
  0xa1   : > { %v3358_v57 = vunpack.i.h.bf16 %v3356_v55  ;;  %v3357_v59 = vunpack.i.l.bf16 %v3356_v55  ;;  %v4130_v61 = vpop.permute.xlu1 %3360  ;;  %v641_v63 = vpack.c.bf16 %v395_v56, %v389_v53 }
  0xa2   : > { %v3363_v3 = vunpack.i.h.bf16 %v4130_v61  ;;  %v3362_v7 = vunpack.i.l.bf16 %v4130_v61 }
  0xa3   : > { %720 = vmatprep.subr.bf16.mxu0 %v641_v63  ;;  %v388_v8 = vsel %vm387_vm4, %v3357_v59, %v3347_v48  ;;  %v394_v15 = vsel %vm387_vm4, %v3358_v57, %v3352_v52 }
  0xa4   : > { %v4136_v17 = vpop.permute.xlu0 %3365  ;;  %v640_v21 = vpack.c.bf16 %v394_v15, %v388_v8  ;;  %v336_v32 = vsel %vm6277_vm5, %v3362_v7, %v3363_v3 }
  0xa5   : > { %v3368_v23 = vunpack.i.h.bf16 %v4136_v17  ;;  %v3367_v24 = vunpack.i.l.bf16 %v4136_v17  ;;  %v3371_v25 = vpop.permute.xlu1 %3370 }
  0xa6   : > { %v3373_v27 = vunpack.i.h.bf16 %v3371_v25  ;;  %v3372_v31 = vunpack.i.l.bf16 %v3371_v25  ;;  %721 = vmatpush1.bf16.msra.mxu0 %v640_v21 }
  0xa7   : > { %v342_v34 = vsel %vm6277_vm5, %v3367_v24, %v3368_v23 }
  0xa8   : > { %v3376_v36 = vpop.permute.xlu0 %3375  ;;  %v635_v38 = vpack.c.bf16 %v342_v34, %v336_v32  ;;  %v335_v39 = vsel %vm6277_vm5, %v3372_v31, %v3362_v7  ;;  %v341_v42 = vsel %vm6277_vm5, %v3373_v27, %v3367_v24 }
  0xa9   : > { %v3378_v43 = vunpack.i.h.bf16 %v3376_v36  ;;  %v3377_v45 = vunpack.i.l.bf16 %v3376_v36  ;;  %v3381_v48 = vpop.permute.xlu1 %3380  ;;  %v634_v50 = vpack.c.bf16 %v341_v42, %v335_v39 }
  0xaa   : > { %v3383_v52 = vunpack.i.h.bf16 %v3381_v48  ;;  %v3382_v53 = vunpack.i.l.bf16 %v3381_v48  ;;  %722 = vmatprep.subr.bf16.mxu0 %v635_v38 }
  0xab   : > { %723 = vmatpush1.bf16.msra.mxu0 %v634_v50  ;;  %v603_v55 = vsel %vm599_vm0, %v3377_v45, %v3378_v43  ;;  %v602_v56 = vsel %vm599_vm0, %v3288_v30, %v3377_v45  ;;  %v4162_v30 = vld [vmem:[%s6270_s1] sm:$0xff]  }
  0xac   : > { %v3386_v57 = vpop.permute.xlu0 %3385  ;;  %724 = vmatprep.subr.bf16.mxu0 %v629_v9  ;;  %v609_v59 = vsel %vm599_vm0, %v3382_v53, %v3383_v52  ;;  %v608_v63 = vsel %vm599_vm0, %v3293_v35, %v3382_v53 }
  0xad   : > { %v3388_v7 = vunpack.i.h.bf16 %v3386_v57  ;;  %v3387_v8 = vunpack.i.l.bf16 %v3386_v57  ;;  %v3391_v15 = vpop.permute.xlu1 %3390  ;;  %v667_v21 = vpack.c.bf16 %v609_v59, %v603_v55  ;;  %v666_v24 = vpack.c.bf16 %v608_v63, %v602_v56 }
  0xae   : > { %v3393_v25 = vunpack.i.h.bf16 %v3391_v15  ;;  %v3392_v28 = vunpack.i.l.bf16 %v3391_v15 }
  0xaf   : > { %v604_v0 = vsel %vm599_vm0, %v3378_v43, %v3387_v8  ;;  %765 = vmatprep.subr.bf16.mxu1 %v667_v21  ;;  %725 = vmatpush1.bf16.msra.mxu0 %v628_v10  ;;  %v605_v5 = vsel %vm599_vm0, %v3387_v8, %v3388_v7 }
  0xb0   : > { %v610_v9 = vsel %vm599_vm0, %v3383_v52, %v3392_v28  ;;  %766 = vmatpush1.bf16.msra.mxu1 %v666_v24  ;;  %v3396_v33 = vpop.permute.xlu0 %3395  ;;  %v611_v35 = vsel %vm599_vm0, %v3392_v28, %v3393_v25 }
  0xb1   : > { %v668_v27 = vpack.c.bf16 %v610_v9, %v604_v0  ;;  %v3398_v31 = vunpack.i.h.bf16 %v3396_v33  ;;  %v3397_v32 = vunpack.i.l.bf16 %v3396_v33  ;;  %v3401_v34 = vpop.permute.xlu1 %3400  ;;  %v669_v36 = vpack.c.bf16 %v611_v35, %v605_v5 }
  0xb2   : > { %v3403_v38 = vunpack.i.h.bf16 %v3401_v34  ;;  %v3402_v39 = vunpack.i.l.bf16 %v3401_v34  ;;  %3005 = vmatmul.mubr.msk.bf16.vlgmr.msra.gmra.mxu0 %vm387_vm4, %v4162_v30 }
  0xb3   : > { %v550_v2 = vsel %vm546_vm1, %v3397_v32, %v3398_v31  ;;  %v549_v4 = vsel %vm546_vm1, %v3303_v40, %v3397_v32  ;;  %818 = vmatprep.subr.bf16.mxu0 %v669_v36  ;;  %752 = vmatprep.mubr.bf16.mxu0 %v3868_v16  ;;  %v4185_v40 = vld [vmem:[%s6270_s1 + $0x8] sm:$0xff]  }
  0xb4   : > { %v3406_v10 = vpop.permute.xlu0 %3405  ;;  %v556_v42 = vsel %vm546_vm1, %v3402_v39, %v3403_v38  ;;  %v555_v43 = vsel %vm546_vm1, %v3308_v47, %v3402_v39  ;;  %819 = vmatpush1.bf16.msra.mxu0 %v668_v27 }
  0xb5   : > { %v3408_v45 = vunpack.i.h.bf16 %v3406_v10  ;;  %v3407_v48 = vunpack.i.l.bf16 %v3406_v10  ;;  %v3411_v50 = vpop.permute.xlu1 %3410  ;;  %v661_v52 = vpack.c.bf16 %v556_v42, %v550_v2  ;;  %v660_v53 = vpack.c.bf16 %v555_v43, %v549_v4 }
  0xb6   : > { %v3413_v55 = vunpack.i.h.bf16 %v3411_v50  ;;  %v3412_v37 = vunpack.i.l.bf16 %v3411_v50 }
  0xb7   : > { %v551_v56 = vsel %vm546_vm1, %v3398_v31, %v3407_v48  ;;  %767 = vmatprep.subr.bf16.mxu1 %v661_v52  ;;  %v552_v44 = vsel %vm546_vm1, %v3407_v48, %v3408_v45 }
  0xb8   : > { %v557_v47 = vsel %vm546_vm1, %v3403_v38, %v3412_v37  ;;  %768 = vmatpush1.bf16.msra.mxu1 %v660_v53  ;;  %v3416_v57 = vpop.permute.xlu0 %3415  ;;  %v558_v59 = vsel %vm546_vm1, %v3412_v37, %v3413_v55 }
  0xb9   : > { %v662_v63 = vpack.c.bf16 %v557_v47, %v551_v56  ;;  %v3418_v7 = vunpack.i.h.bf16 %v3416_v57  ;;  %v3417_v8 = vunpack.i.l.bf16 %v3416_v57  ;;  %v3421_v15 = vpop.permute.xlu1 %3420  ;;  %v663_v21 = vpack.c.bf16 %v558_v59, %v552_v44 }
  0xba   : > { %v3423_v24 = vunpack.i.h.bf16 %v3421_v15  ;;  %v3422_v25 = vunpack.i.l.bf16 %v3421_v15  ;;  %3006 = vmatmul.mubr.msk.bf16.gmra.mxu0 %vm387_vm4, %v4185_v40 }
  0xbb   : > { %v497_v28 = vsel %vm6278_vm2, %v3417_v8, %v3418_v7  ;;  %v496_v0 = vsel %vm6278_vm2, %v3318_v58, %v3417_v8  ;;  %820 = vmatprep.subr.bf16.mxu0 %v663_v21  ;;  %848 = vmatprep.mubr.bf16.mxu0 %v3868_v16  ;;  %v1013_v8 = vlaneseq }
  0xbc   : > { %v3426_v5 = vpop.permute.xlu0 %3425  ;;  %v503_v9 = vsel %vm6278_vm2, %v3422_v25, %v3423_v24  ;;  %v502_v33 = vsel %vm6278_vm2, %v3323_v62, %v3422_v25  ;;  %821 = vmatpush1.bf16.msra.mxu0 %v662_v63 }
  0xbd   : > { %v3428_v35 = vunpack.i.h.bf16 %v3426_v5  ;;  %v3427_v27 = vunpack.i.l.bf16 %v3426_v5  ;;  %v3431_v31 = vpop.permute.xlu1 %3430  ;;  %v655_v32 = vpack.c.bf16 %v503_v9, %v497_v28  ;;  %v654_v34 = vpack.c.bf16 %v502_v33, %v496_v0 }
  0xbe   : > { %v3433_v36 = vunpack.i.h.bf16 %v3431_v31  ;;  %v3432_v54 = vunpack.i.l.bf16 %v3431_v31  ;;  %v4218_v33 = vshrl.u32 %v1013_v8, 7  ;;  %v1111_v31 = vand.u32 127, %v1013_v8 }
  0xbf   : > { %v498_v58 = vsel %vm6278_vm2, %v3418_v7, %v3427_v27  ;;  %769 = vmatprep.subr.bf16.mxu1 %v655_v32  ;;  %v499_v38 = vsel %vm6278_vm2, %v3427_v27, %v3428_v35 }
  0xc0   : > { %v504_v39 = vsel %vm6278_vm2, %v3423_v24, %v3432_v54  ;;  %770 = vmatpush1.bf16.msra.mxu1 %v654_v34  ;;  %v3436_v2 = vpop.permute.xlu0 %3435  ;;  %v505_v60 = vsel %vm6278_vm2, %v3432_v54, %v3433_v36  ;;  %v1028_v41 = vadd.s32 112, %v4218_v33  ;;  %v1112_v49 = vadd.s32 128, %v1111_v31 }
  0xc1   : > { %v656_v62 = vpack.c.bf16 %v504_v39, %v498_v58  ;;  %v3438_v4 = vunpack.i.h.bf16 %v3436_v2  ;;  %v3437_v10 = vunpack.i.l.bf16 %v3436_v2  ;;  %v3441_v42 = vpop.permute.xlu1 %3440  ;;  %v657_v43 = vpack.c.bf16 %v505_v60, %v499_v38 }
  0xc2   : > { %v3443_v45 = vunpack.i.h.bf16 %v3441_v42  ;;  %v3442_v48 = vunpack.i.l.bf16 %v3441_v42  ;;  %v1026_v8 = vadd.s32 96, %v4218_v33 }
  0xc3   : > { %v444_v50 = vsel %vm440_vm3, %v3437_v10, %v3438_v4  ;;  %v443_v52 = vsel %vm440_vm3, %v3333_v22, %v3437_v10  ;;  %822 = vmatprep.subr.bf16.mxu0 %v657_v43  ;;  %v1029_v10 = vadd.s32 120, %v4218_v33 }
  0xc4   : > { %v3446_v53 = vpop.permute.xlu0 %3445  ;;  %v450_v55 = vsel %vm440_vm3, %v3442_v48, %v3443_v45  ;;  %v449_v37 = vsel %vm440_vm3, %v3338_v29, %v3442_v48  ;;  %823 = vmatpush1.bf16.msra.mxu0 %v656_v62  ;;  %v630_v48 = vpack.c.bf16 %v3958_v6, %v3944_v1 }
  0xc5   : > { %v3448_v56 = vunpack.i.h.bf16 %v3446_v53  ;;  %v3447_v44 = vunpack.i.l.bf16 %v3446_v53  ;;  %v3451_v47 = vpop.permute.xlu1 %3450  ;;  %v649_v57 = vpack.c.bf16 %v450_v55, %v444_v50  ;;  %v648_v59 = vpack.c.bf16 %v449_v37, %v443_v52 }
  0xc6   : > { %v3453_v63 = vunpack.i.h.bf16 %v3451_v47  ;;  %v3452_v7 = vunpack.i.l.bf16 %v3451_v47  ;;  %v1127_v47 = vshra.s32 %v1028_v41, 2  ;;  %v1061_v41 = vadd.s32 376, %v4218_v33 }
  0xc7   : > { %v445_v19 = vsel %vm440_vm3, %v3438_v4, %v3447_v44  ;;  %771 = vmatprep.subr.bf16.mxu1 %v649_v57  ;;  %v446_v22 = vsel %vm440_vm3, %v3447_v44, %v3448_v56  ;;  %v4238_v57 = vadd.s32 4294967289, %v1111_v31 }
  0xc8   : > { %v451_v15 = vsel %vm440_vm3, %v3443_v45, %v3452_v7  ;;  %772 = vmatpush1.bf16.msra.mxu1 %v648_v59  ;;  %v3456_v26 = vpop.permute.xlu0 %3455  ;;  %v452_v29 = vsel %vm440_vm3, %v3452_v7, %v3453_v63  ;;  %v631_v45 = vpack.c.bf16 %v3991_v13, %v3985_v11  ;;  %v1128_v13 = vshra.s32 %v1029_v10, 2 }
  0xc9   : > { %v650_v21 = vpack.c.bf16 %v451_v15, %v445_v19  ;;  %v3458_v24 = vunpack.i.h.bf16 %v3456_v26  ;;  %v3457_v25 = vunpack.i.l.bf16 %v3456_v26  ;;  %v3461_v28 = vpop.permute.xlu1 %3460  ;;  %v651_v0 = vpack.c.bf16 %v452_v29, %v446_v22 }
  0xca   : > { %v3463_v5 = vunpack.i.h.bf16 %v3461_v28  ;;  %v3462_v9 = vunpack.i.l.bf16 %v3461_v28  ;;  %v4244_v63 = vadd.s32 4294967289, %v1112_v49  ;;  %v1027_v19 = vadd.s32 104, %v4218_v33 }
  0xcb   : > { %v391_v35 = vsel %vm387_vm4, %v3457_v25, %v3458_v24  ;;  %v390_v27 = vsel %vm387_vm4, %v3348_v46, %v3457_v25  ;;  %824 = vmatprep.subr.bf16.mxu0 %v651_v0  ;;  %v1025_v25 = vadd.s32 88, %v4218_v33  ;;  %vm4277_vm9 = vcmp.eq.s32.totalorder %v1127_v47, %v4238_v57 }
  0xcc   : > { %v3466_v32 = vpop.permute.xlu0 %3465  ;;  %v397_v34 = vsel %vm387_vm4, %v3462_v9, %v3463_v5  ;;  %v396_v36 = vsel %vm387_vm4, %v3353_v51, %v3462_v9  ;;  %825 = vmatpush1.bf16.msra.mxu0 %v650_v21  ;;  %vm4257_vm6 = vcmp.eq.s32.totalorder %v1127_v47, %v4244_v63  ;;  %vm4262_vm7 = vcmp.eq.s32.totalorder %v1128_v13, %v4244_v63 }
  0xcd   : > { %v3468_v54 = vunpack.i.h.bf16 %v3466_v32  ;;  %v3467_v58 = vunpack.i.l.bf16 %v3466_v32  ;;  %v3471_v38 = vpop.permute.xlu1 %3470  ;;  %v643_v39 = vpack.c.bf16 %v397_v34, %v391_v35  ;;  %v642_v2 = vpack.c.bf16 %v396_v36, %v390_v27  ;;  %vm3037_vm8 = vmpackc.low %vm4262_vm7, %vm4257_vm6 }
  0xce   : > { %v3473_v60 = vunpack.i.h.bf16 %v3471_v38  ;;  %v3472_v62 = vunpack.i.l.bf16 %v3471_v38  ;;  %v1125_v35 = vshra.s32 %v1026_v8, 2  ;;  %v1126_v27 = vshra.s32 %v1027_v19, 2 }
  0xcf   : > { %v392_v46 = vsel %vm387_vm4, %v3458_v24, %v3467_v58  ;;  %773 = vmatprep.subr.bf16.mxu1 %v643_v39  ;;  %v393_v4 = vsel %vm387_vm4, %v3467_v58, %v3468_v54  ;;  %v1024_v24 = vadd.s32 80, %v4218_v33  ;;  %v633_v34 = vpack.c.bf16 %v4009_v20, %v4004_v18 }
  0xd0   : > { %v398_v51 = vsel %vm387_vm4, %v3463_v5, %v3472_v62  ;;  %774 = vmatpush1.bf16.msra.mxu1 %v642_v2  ;;  %v3476_v42 = vpop.permute.xlu0 %3475  ;;  %v399_v43 = vsel %vm387_vm4, %v3472_v62, %v3473_v60  ;;  %v632_v36 = vpack.c.bf16 %v3994_v14, %v3988_v12  ;;  %vm4282_vm10 = vcmp.eq.s32.totalorder %v1128_v13, %v4238_v57 }
  0xd1   : > { %v644_v50 = vpack.c.bf16 %v398_v51, %v392_v46  ;;  %v3478_v52 = vunpack.i.h.bf16 %v3476_v42  ;;  %v3477_v53 = vunpack.i.l.bf16 %v3476_v42  ;;  %v3481_v55 = vpop.permute.xlu1 %3480  ;;  %v645_v37 = vpack.c.bf16 %v399_v43, %v393_v4  ;;  %vm3039_vm13 = vmpackc.low %vm4282_vm10, %vm4277_vm9 }
  0xd2   : > { %v3483_v56 = vunpack.i.h.bf16 %v3481_v55  ;;  %v3482_v44 = vunpack.i.l.bf16 %v3481_v55  ;;  %v1123_v18 = vshra.s32 %v1024_v24, 2  ;;  %v1124_v20 = vshra.s32 %v1025_v25, 2 }
  0xd3   : > { %v338_v59 = vsel %vm6277_vm5, %v3477_v53, %v3478_v52  ;;  %826 = vmatprep.subr.bf16.mxu0 %v645_v37  ;;  %v337_v11 = vsel %vm6277_vm5, %v3363_v3, %v3477_v53  ;;  %vm4287_vm11 = vcmp.eq.s32.totalorder %v1125_v35, %v4244_v63  ;;  %vm4292_vm12 = vcmp.eq.s32.totalorder %v1126_v27, %v4244_v63 }
  0xd4   : > { %v3486_v1 = vpop.permute.xlu0 %3485  ;;  %v344_v6 = vsel %vm6277_vm5, %v3482_v44, %v3483_v56  ;;  %v343_v7 = vsel %vm6277_vm5, %v3368_v23, %v3482_v44  ;;  %827 = vmatpush1.bf16.msra.mxu0 %v644_v50  ;;  %v1022_v38 = vadd.s32 64, %v4218_v33  ;;  %v1023_v39 = vadd.s32 72, %v4218_v33  ;;  %vm3041_vm14 = vmpackc.low %vm4292_vm12, %vm4287_vm11 }
  0xd5   : > { %v3488_v22 = vunpack.i.h.bf16 %v3486_v1  ;;  %v3487_v15 = vunpack.i.l.bf16 %v3486_v1  ;;  %v3491_v61 = vpop.permute.xlu1 %3490  ;;  %v637_v26 = vpack.c.bf16 %v344_v6, %v338_v59  ;;  %v636_v3 = vpack.c.bf16 %v343_v7, %v337_v11 }
  0xd6   : > { %v3493_v29 = vunpack.i.h.bf16 %v3491_v61  ;;  %v3492_v21 = vunpack.i.l.bf16 %v3491_v61  ;;  %v3869_v2 = vmov 0.25|0.25   ;;  %vm4310_vm15 = vcmp.eq.s32.totalorder %v1125_v35, %v4238_v57 }
  0xd7   : > { %v339_v17 = vsel %vm6277_vm5, %v3478_v52, %v3487_v15  ;;  %775 = vmatprep.subr.bf16.mxu1 %v637_v26  ;;  %v340_v23 = vsel %vm6277_vm5, %v3487_v15, %v3488_v22  ;;  %vm4315_vm0 = vcmp.eq.s32.totalorder %v1126_v27, %v4238_v57  ;;  %vm4320_vm1 = vcmp.eq.s32.totalorder %v1123_v18, %v4244_v63 }
  0xd8   : > { %v345_v5 = vsel %vm6277_vm5, %v3483_v56, %v3492_v21  ;;  %776 = vmatpush1.bf16.msra.mxu1 %v636_v3  ;;  %v346_v9 = vsel %vm6277_vm5, %v3492_v21, %v3493_v29  ;;  %vm4325_vm3 = vcmp.eq.s32.totalorder %v1124_v20, %v4244_v63  ;;  %v1121_v4 = vshra.s32 %v1022_v38, 2  ;;  %vm3043_vm6 = vmpackc.low %vm4315_vm0, %vm4310_vm15 }
  0xd9   : > { %v638_v31 = vpack.c.bf16 %v345_v5, %v339_v17  ;;  %777 = vmatprep.subr.bf16.mxu1 %v631_v45  ;;  %v639_v32 = vpack.c.bf16 %v346_v9, %v340_v23  ;;  %v1122_v10 = vshra.s32 %v1023_v39, 2  ;;  %v1020_v49 = vadd.s32 48, %v4218_v33  ;;  %vm3045_vm7 = vmpackc.low %vm4325_vm3, %vm4320_vm1 }
  0xda   : > { %v1021_v51 = vadd.s32 56, %v4218_v33  ;;  %vm4350_vm9 = vcmp.eq.s32.totalorder %v1124_v20, %v4238_v57  ;;  %v1018_v45 = vadd.s32 32, %v4218_v33  ;;  %vm4358_vm10 = vcmp.eq.s32.totalorder %v1121_v4, %v4244_v63 }
  0xdb   : > { %828 = vmatprep.subr.bf16.mxu0 %v639_v32  ;;  %vm4363_vm11 = vcmp.eq.s32.totalorder %v1122_v10, %v4244_v63  ;;  %v1119_v52 = vshra.s32 %v1020_v49, 2  ;;  %vm4385_vm15 = vcmp.eq.s32.totalorder %v1122_v10, %v4238_v57  ;;  %v1016_v37 = vadd.s32 16, %v4218_v33 }
  0xdc   : > { %778 = vmatpush1.bf16.msra.mxu1 %v630_v48  ;;  %829 = vmatpush1.bf16.msra.mxu0 %v638_v31  ;;  %v1019_v48 = vadd.s32 40, %v4218_v33  ;;  %v1120_v53 = vshra.s32 %v1021_v51, 2  ;;  %v1017_v56 = vadd.s32 24, %v4218_v33  ;;  %v1117_v59 = vshra.s32 %v1018_v45, 2 }
  0xdd   : > { %830 = vmatprep.subr.bf16.mxu0 %v633_v34  ;;  %3038 = vmatprep.subr.msk.bf16.mxu1 %vm3037_vm8, %v3869_v2  ;;  %vm4345_vm8 = vcmp.eq.s32.totalorder %v1123_v18, %v4238_v57  ;;  %vm4392_vm0 = vcmp.eq.s32.totalorder %v1119_v52, %v4244_v63  ;;  %v1115_v6 = vshra.s32 %v1016_v37, 2  ;;  %v1015_v19 = vadd.s32 8, %v4218_v33 }
  0xde   : > { %vm3047_vm12 = vmpackc.low %vm4350_vm9, %vm4345_vm8  ;;  %vm4397_vm1 = vcmp.eq.s32.totalorder %v1120_v53, %v4244_v63  ;;  %v1118_v11 = vshra.s32 %v1019_v48, 2  ;;  %vm4419_vm8 = vcmp.eq.s32.totalorder %v1120_v53, %v4238_v57  ;;  %vm4424_vm9 = vcmp.eq.s32.totalorder %v1117_v59, %v4244_v63 }
  0xdf   : > { %3007 = vmatmul.mubr.msk.bf16.vlgmr.msra.gmra.mxu1 %vm387_vm4, %v4162_v30  ;;  %v1116_v8 = vshra.s32 %v1017_v56, 2  ;;  %v1113_v26 = vshra.s32 %v4218_v33, 2  ;;  %v1114_v29 = vshra.s32 %v1015_v19, 2  ;;  %v1044_v21 = vadd.s32 240, %v4218_v33 }
  0xe0   : > { %831 = vmatpush1.bf16.msra.mxu0 %v632_v36  ;;  %805 = vmatprep.mubr.bf16.mxu1 %v3868_v16  ;;  %v1045_v24 = vadd.s32 248, %v4218_v33  ;;  %v1042_v23 = vadd.s32 224, %v4218_v33  ;;  %v1043_v28 = vadd.s32 232, %v4218_v33  ;;  %v1040_v27 = vadd.s32 208, %v4218_v33 }
  0xe1   : > { %3040 = vmatpush1.bf16.msk.msra.mxu1 %vm3039_vm13, %v3869_v2  ;;  %vm3049_vm13 = vmpackc.low %vm4363_vm11, %vm4358_vm10  ;;  %v1143_v9 = vshra.s32 %v1044_v21, 2  ;;  %v1041_v31 = vadd.s32 216, %v4218_v33  ;;  %v1038_v14 = vadd.s32 192, %v4218_v33  ;;  %v1039_v38 = vadd.s32 200, %v4218_v33 }
  0xe2   : > { %3042 = vmatprep.subr.msk.bf16.mxu1 %vm3041_vm14, %v3869_v2  ;;  %vm4380_vm14 = vcmp.eq.s32.totalorder %v1121_v4, %v4238_v57  ;;  %v1144_v35 = vshra.s32 %v1045_v24, 2  ;;  %v1141_v36 = vshra.s32 %v1042_v23, 2  ;;  %v1142_v54 = vshra.s32 %v1043_v28, 2 }
  0xe3   : > { %3009 = vmatmul.mubr.msk.bf16.vlgmr.msra.gmra.mxu0 %vm387_vm4, %v4162_v30  ;;  %vm3051_vm3 = vmpackc.low %vm4385_vm15, %vm4380_vm14  ;;  %vm4455_vm14 = vcmp.eq.s32.totalorder %v1115_v6, %v4244_v63  ;;  %vm4461_vm15 = vcmp.eq.s32.totalorder %v1116_v8, %v4244_v63  ;;  %v1139_v39 = vshra.s32 %v1040_v27, 2  ;;  %v1140_v60 = vshra.s32 %v1041_v31, 2 }
  0xe4   : > { %858 = vmatprep.mubr.bf16.mxu0 %v3868_v16  ;;  %v1060_v62 = vadd.s32 368, %v4218_v33  ;;  %v6371_v10 = vmov 0  ;;  %v6373_v49 = vmov 0  ;;  %v1160_v42 = vshra.s32 %v1061_v41, 2 }
  0xe5   : > { %3044 = vmatpush1.bf16.msk.msra.mxu1 %vm3043_vm6, %v3869_v2  ;;  %vm3053_vm6 = vmpackc.low %vm4397_vm1, %vm4392_vm0  ;;  %v1137_v43 = vshra.s32 %v1038_v14, 2  ;;  %v1138_v45 = vshra.s32 %v1039_v38, 2  ;;  %v1036_v48 = vadd.s32 176, %v4218_v33  ;;  %v1037_v30 = vadd.s32 184, %v4218_v33 }
  0xe6   : > { %3046 = vmatprep.subr.msk.bf16.mxu1 %vm3045_vm7, %v3869_v2  ;;  %vm4414_vm7 = vcmp.eq.s32.totalorder %v1119_v52, %v4238_v57  ;;  %vm3061_vm1 = vmpackc.low %vm4461_vm15, %vm4455_vm14  ;;  %vm4533_vm14 = vcmp.eq.s32.totalorder %v1143_v9, %v4238_v57  ;;  %vm4538_vm15 = vcmp.eq.s32.totalorder %v1144_v35, %v4238_v57  ;;  %v1159_v51 = vshra.s32 %v1060_v62, 2 }
  0xe7   : > { %3008 = vmatmul.mubr.msk.bf16.gmra.mxu1 %vm387_vm4, %v4185_v40  ;;  %vm3055_vm10 = vmpackc.low %vm4419_vm8, %vm4414_vm7  ;;  %vm4490_vm7 = vcmp.eq.s32.totalorder %v1113_v26, %v4244_v63  ;;  %vm4495_vm8 = vcmp.eq.s32.totalorder %v1114_v29, %v4244_v63  ;;  %vm4613_vm5 = vcmp.eq.s32.totalorder %v1160_v42, %v4238_v57  ;;  %v1135_v37 = vshra.s32 %v1036_v48, 2 }
  0xe8   : > { %v1136_v56 = vshra.s32 %v1037_v30, 2  ;;  %vm4618_vm2 = vcmp.eq.s32.totalorder %v1139_v39, %v4238_v57  ;;  %v6385_v44 = vmov 0  ;;  %v6387_v47 = vmov 0 }
  0xe9   : > { %3048 = vmatpush1.bf16.msk.msra.mxu1 %vm3047_vm12, %v3869_v2  ;;  %vm4445_vm12 = vcmp.eq.s32.totalorder %v1117_v59, %v4238_v57  ;;  %v6386_v44 = vsel %vm4618_vm2, 4294967295, %v6385_v44  ;;  %v1058_v59 = vadd.s32 352, %v4218_v33  ;;  %v6389_v13 = vmov 0 }
  0xea   : > { %3050 = vmatprep.subr.msk.bf16.mxu1 %vm3049_vm13, %v3869_v2  ;;  %vm4450_vm13 = vcmp.eq.s32.totalorder %v1118_v11, %v4238_v57  ;;  %v6391_v1 = vmov 0  ;;  %v1035_v7 = vadd.s32 168, %v4218_v33  ;;  %v6398_v15 = vmov 0 }
  0xeb   : > { %3010 = vmatmul.mubr.msk.bf16.gmra.mxu0 %vm387_vm4, %v4185_v40  ;;  %vm4429_vm4 = vcmp.eq.s32.totalorder %v1118_v11, %v4244_v63  ;;  %vm3059_vm0 = vmpackc.low %vm4450_vm13, %vm4445_vm12  ;;  %vm4522_vm12 = vcmp.eq.s32.totalorder %v1143_v9, %v4244_v63  ;;  %vm4527_vm13 = vcmp.eq.s32.totalorder %v1144_v35, %v4244_v63  ;;  %v1059_v11 = vadd.s32 360, %v4218_v33 }
  0xec   : > { %vm3057_vm11 = vmpackc.low %vm4429_vm4, %vm4424_vm9  ;;  %v1157_v19 = vshra.s32 %v1058_v59, 2  ;;  %v1057_v3 = vadd.s32 344, %v4218_v33  ;;  %v1134_v25 = vshra.s32 %v1035_v7, 2  ;;  %v1032_v5 = vadd.s32 144, %v4218_v33 }
  0xed   : > { %3052 = vmatpush1.bf16.msk.msra.mxu1 %vm3051_vm3, %v3869_v2  ;;  %vm4478_vm3 = vcmp.eq.s32.totalorder %v1115_v6, %v4238_v57  ;;  %vm3065_vm4 = vmpackc.low %vm4495_vm8, %vm4490_vm7  ;;  %vm4566_vm7 = vcmp.eq.s32.totalorder %v1141_v36, %v4238_v57  ;;  %vm4571_vm8 = vcmp.eq.s32.totalorder %v1142_v54, %v4238_v57  ;;  %v1034_v6 = vadd.s32 160, %v4218_v33 }
  0xee   : > { %3054 = vmatprep.subr.msk.bf16.mxu1 %vm3053_vm6, %v3869_v2  ;;  %vm4483_vm6 = vcmp.eq.s32.totalorder %v1116_v8, %v4238_v57  ;;  %v6372_v10 = vsel %vm4566_vm7, 4294967295, %v6371_v10  ;;  %v6374_v49 = vsel %vm4571_vm8, 4294967295, %v6373_v49  ;;  %vm4638_vm7 = vcmp.eq.s32.totalorder %v1137_v43, %v4244_v63 }
  0xef   : > { %vm3063_vm9 = vmpackc.low %vm4483_vm6, %vm4478_vm3  ;;  %vm4556_vm3 = vcmp.eq.s32.totalorder %v1141_v36, %v4244_v63  ;;  %vm4561_vm6 = vcmp.eq.s32.totalorder %v1142_v54, %v4244_v63  ;;  %v6390_v13 = vsel %vm4638_vm7, 4294967295, %v6389_v13  ;;  %vm4643_vm8 = vcmp.eq.s32.totalorder %v1138_v45, %v4244_v63 }
  0xf0   : > { %v6392_v1 = vsel %vm4643_vm8, 4294967295, %v6391_v1  ;;  %v1158_v22 = vshra.s32 %v1059_v11, 2  ;;  %vm6407_vm2 = vnez %v6372_v10  ;;  %v1133_v24 = vshra.s32 %v1034_v6, 2 }
  0xf1   : > { %3056 = vmatpush1.bf16.msk.msra.mxu1 %vm3055_vm10, %v3869_v2  ;;  %vm4512_vm10 = vcmp.eq.s32.totalorder %v1113_v26, %v4238_v57  ;;  %v1056_v26 = vadd.s32 336, %v4218_v33  ;;  %v1156_v23 = vshra.s32 %v1057_v3, 2  ;;  %v1033_v9 = vadd.s32 152, %v4218_v33 }
  0xf2   : > { %3058 = vmatprep.subr.msk.bf16.mxu1 %vm3057_vm11, %v3869_v2  ;;  %vm4517_vm11 = vcmp.eq.s32.totalorder %v1114_v29, %v4238_v57  ;;  %v1131_v34 = vshra.s32 %v1032_v5, 2  ;;  %v1054_v54 = vadd.s32 320, %v4218_v33  ;;  %v1055_v58 = vadd.s32 328, %v4218_v33 }
  0xf3   : > { %v1155_v17 = vshra.s32 %v1056_v26, 2  ;;  %v1132_v36 = vshra.s32 %v1033_v9, 2  ;;  %v6425_v18 = vmov 0  ;;  %v6427_v20 = vmov 0 }
  0xf4   : > { %v4788_v12 = vadd.s32 128, %v4218_v33  ;;  %v4791_v14 = vadd.s32 136, %v4218_v33  ;;  %v6432_v38 = vmov 0  ;;  %v1153_v62 = vshra.s32 %v1054_v54, 2 }
  0xf5   : > { %3060 = vmatpush1.bf16.msk.msra.mxu1 %vm3059_vm0, %v3869_v2  ;;  %vm3067_vm0 = vmpackc.low %vm4517_vm11, %vm4512_vm10  ;;  %vm4588_vm10 = vcmp.eq.s32.totalorder %v1139_v39, %v4244_v63  ;;  %vm4593_vm11 = vcmp.eq.s32.totalorder %v1140_v60, %v4244_v63  ;;  %v6434_v39 = vmov 0  ;;  %v6438_v41 = vmov 0 }
  0xf6   : > { %3062 = vmatprep.subr.msk.bf16.mxu1 %vm3061_vm1, %v3869_v2  ;;  %vm3069_vm1 = vmpackc.low %vm4527_vm13, %vm4522_vm12  ;;  %vm4598_vm12 = vcmp.eq.s32.totalorder %v1159_v51, %v4244_v63  ;;  %vm1306_vm13 = vcmp.eq.s32.totalorder %v1160_v42, %v4244_v63  ;;  %v1154_v46 = vshra.s32 %v1055_v58, 2  ;;  %v1129_v4 = vshra.s32 %v4788_v12, 2 }
  0xf7   : > { %vm6409_vm8 = vmpackc.low %vm4593_vm11, %vm4588_vm10  ;;  %vm4742_vm10 = vcmp.eq.s32.totalorder %v1155_v17, %v4244_v63  ;;  %vm4752_vm11 = vcmp.eq.s32.totalorder %v1155_v17, %v4238_v57  ;;  %v1130_v10 = vshra.s32 %v4791_v14, 2  ;;  %v1052_v42 = vadd.s32 304, %v4218_v33 }
  0xf8   : > { %v6451_v30 = vmov 0  ;;  %v6453_v50 = vmov 0  ;;  %v1092_v16 = vadd.s32 624, %v4218_v33  ;;  %v1093_v55 = vadd.s32 632, %v4218_v33 }
  0xf9   : > { %3064 = vmatpush1.bf16.msk.msra.mxu1 %vm3063_vm9, %v3869_v2  ;;  %vm3071_vm9 = vmpackc.low %vm4538_vm15, %vm4533_vm14  ;;  %vm6406_vm15 = vnez %v6374_v49  ;;  %v1151_v52 = vshra.s32 %v1052_v42, 2  ;;  %v1048_v61 = vadd.s32 272, %v4218_v33  ;;  %v1049_v26 = vadd.s32 280, %v4218_v33 }
  0xfa   : > { %3066 = vmatprep.subr.msk.bf16.mxu1 %vm3065_vm4, %v3869_v2  ;;  %vm4623_vm4 = vcmp.eq.s32.totalorder %v1140_v60, %v4238_v57  ;;  %vm6393_vm14 = vmpackc.low %vm4561_vm6, %vm4556_vm3  ;;  %vm4680_vm6 = vcmp.eq.s32.totalorder %v1135_v37, %v4244_v63  ;;  %vm4703_vm3 = vcmp.eq.s32.totalorder %v1158_v22, %v4238_v57  ;;  %v6436_v60 = vmov 0 }
  0xfb   : > { %v6388_v47 = vsel %vm4623_vm4, 4294967295, %v6387_v47  ;;  %v6399_v15 = vsel %vm4680_vm6, 4294967295, %v6398_v15  ;;  %vm4720_vm4 = vcmp.eq.s32.totalorder %v1135_v37, %v4238_v57  ;;  %vm4800_vm6 = vcmp.eq.s32.totalorder %v1133_v24, %v4238_v57 }
  0xfc   : > { %v6433_v38 = vsel %vm4800_vm6, 4294967295, %v6432_v38  ;;  %vm4878_vm6 = vcmp.eq.s32.totalorder %v1129_v4, %v4244_v63  ;;  %v1050_v37 = vadd.s32 288, %v4218_v33  ;;  %v1192_v59 = vshra.s32 %v1093_v55, 2 }
  0xfd   : > { %3068 = vmatpush1.bf16.msk.msra.mxu1 %vm3067_vm0, %v3869_v2  ;;  %vm3101_vm0 = vmpackc.low %vm1306_vm13, %vm4598_vm12  ;;  %vm4685_vm13 = vcmp.eq.s32.totalorder %v1136_v56, %v4244_v63  ;;  %v6452_v30 = vsel %vm4878_vm6, 4294967295, %v6451_v30  ;;  %v1147_v21 = vshra.s32 %v1048_v61, 2  ;;  %v1047_v17 = vadd.s32 264, %v4218_v33 }
  0xfe   : > { %3070 = vmatprep.subr.msk.bf16.mxu1 %vm3069_vm1, %v3869_v2  ;;  %vm4608_vm1 = vcmp.eq.s32.totalorder %v1159_v51, %v4238_v57  ;;  %3102 = vmatprep.subr.msk.bf16.mxu0 %vm3101_vm0, %v3869_v2  ;;  %vm6408_vm0 = vmpackc.low %vm6406_vm15, %vm6407_vm2  ;;  %vm4725_vm2 = vcmp.eq.s32.totalorder %v1136_v56, %v4238_v57  ;;  %v1051_v56 = vadd.s32 296, %v4218_v33  ;;  %v1149_v11 = vshra.s32 %v1050_v37, 2  ;;  %v5124_v37 = vpop.permute.xlu1 %681 }
  0xff   : > { %vm3103_vm12 = vmpackc.low %vm4613_vm5, %vm4608_vm1  ;;  %vm4670_vm5 = vcmp.eq.s32.totalorder %v1138_v45, %v4238_v57  ;;  %vm1300_vm1 = vcmp.eq.s32.totalorder %v1157_v19, %v4244_v63  ;;  %v1146_v28 = vshra.s32 %v1047_v17, 2  ;;  %v1076_v0 = vadd.s32 496, %v4218_v33 }
 0x100   : > { %3104 = vmatpush1.bf16.msk.msra.mxu0 %vm3103_vm12, %v3869_v2  ;;  %vm1302_vm12 = vcmp.eq.s32.totalorder %v1158_v22, %v4244_v63  ;;  %v1077_v5 = vadd.s32 504, %v4218_v33  ;;  %v1074_v27 = vadd.s32 480, %v4218_v33  ;;  %v1075_v31 = vadd.s32 488, %v4218_v33 }
 0x101   : > { %3072 = vmatpush2.bf16.msk.msra.mxu1 %vm3071_vm9, %v3869_v2  ;;  %vm4665_vm9 = vcmp.eq.s32.totalorder %v1137_v43, %v4238_v57  ;;  %vm3105_vm7 = vmpackc.low %vm1302_vm12, %vm1300_vm1  ;;  %vm6422_vm1 = vnez %v6388_v47  ;;  %vm6423_vm12 = vnez %v6386_v44  ;;  %v1053_v43 = vadd.s32 312, %v4218_v33 }
 0x102   : > { %3074 = vmatprep.subr.msk.bf16.mxu1 %vm6393_vm14, %v3869_v2  ;;  %vm4698_vm14 = vcmp.eq.s32.totalorder %v1157_v19, %v4238_v57  ;;  %3106 = vmatprep.subr.msk.bf16.mxu0 %vm3105_vm7, %v3869_v2  ;;  %vm4747_vm7 = vcmp.eq.s32.totalorder %v1156_v23, %v4244_v63  ;;  %v1191_v47 = vshra.s32 %v1092_v16, 2  ;;  %v1175_v9 = vshra.s32 %v1076_v0, 2  ;;  %v5132_v22 = vpop.permute.xlu1 %686 }
 0x103   : > { %vm3107_vm15 = vmpackc.low %vm4703_vm3, %vm4698_vm14  ;;  %vm4757_vm3 = vcmp.eq.s32.totalorder %v1156_v23, %v4238_v57  ;;  %v1152_v53 = vshra.s32 %v1053_v43, 2  ;;  %v1176_v35 = vshra.s32 %v1077_v5, 2  ;;  %v1173_v32 = vshra.s32 %v1074_v27, 2 }
 0x104   : > { %3108 = vmatpush1.bf16.msk.msra.mxu0 %vm3107_vm15, %v3869_v2  ;;  %vm6424_vm14 = vmpackc.low %vm6422_vm1, %vm6423_vm12  ;;  %vm4774_vm15 = vcmp.eq.s32.totalorder %v1133_v24, %v4244_v63  ;;  %vm6429_vm1 = vnez %v6392_v1  ;;  %vm6430_vm12 = vnez %v6390_v13  ;;  %v1150_v13 = vshra.s32 %v1051_v56, 2 }
 0x105   : > { %3076 = vmatpush2.bf16.msk.msra.mxu1 %vm6408_vm0, %v3869_v2  ;;  %v6426_v18 = vsel %vm4774_vm15, 4294967295, %v6425_v18  ;;  %vm4779_vm0 = vcmp.eq.s32.totalorder %v1134_v25, %v4244_v63  ;;  %vm4863_vm15 = vcmp.eq.s32.totalorder %v1132_v36, %v4238_v57  ;;  %vm4990_vm6 = vcmp.eq.s32.totalorder %v1191_v47, %v4244_v63 }
 0x106   : > { %3078 = vmatprep.subr.msk.bf16.mxu1 %vm6409_vm8, %v3869_v2  ;;  %v6428_v20 = vsel %vm4779_vm0, 4294967295, %v6427_v20  ;;  %vm3109_vm8 = vmpackc.low %vm4747_vm7, %vm4742_vm10  ;;  %vm4805_vm10 = vcmp.eq.s32.totalorder %v1134_v25, %v4238_v57  ;;  %vm1294_vm0 = vcmp.eq.s32.totalorder %v1154_v46, %v4244_v63  ;;  %v1148_v24 = vshra.s32 %v1049_v26, 2 }
 0x107   : > { %v6435_v39 = vsel %vm4805_vm10, 4294967295, %v6434_v39  ;;  %3110 = vmatprep.subr.msk.bf16.mxu0 %vm3109_vm8, %v3869_v2  ;;  %vm3111_vm7 = vmpackc.low %vm4757_vm3, %vm4752_vm11  ;;  %vm4825_vm8 = vcmp.eq.s32.totalorder %v1132_v36, %v4244_v63  ;;  %vm4836_vm3 = vcmp.eq.s32.totalorder %v1153_v62, %v4244_v63  ;;  %vm4883_vm10 = vcmp.eq.s32.totalorder %v1130_v10, %v4244_v63 }
 0x108   : > { %3112 = vmatpush1.bf16.msk.msra.mxu0 %vm3111_vm7, %v3869_v2  ;;  %v6439_v41 = vsel %vm4825_vm8, 4294967295, %v6438_v41  ;;  %vm6444_vm7 = vmpackc.low %vm4670_vm5, %vm4665_vm9  ;;  %vm1293_vm9 = vcmp.eq.s32.totalorder %v1154_v46, %v4238_v57  ;;  %vm6449_vm5 = vnez %v6399_v15  ;;  %v6454_v50 = vsel %vm4883_vm10, 4294967295, %v6453_v50 }
 0x109   : > { %3080 = vmatpush2.bf16.msk.msra.mxu1 %vm6424_vm14, %v3869_v2  ;;  %vm6431_vm14 = vmpackc.low %vm6429_vm1, %vm6430_vm12  ;;  %vm4815_vm1 = vcmp.eq.s32.totalorder %v1131_v34, %v4244_v63  ;;  %vm4858_vm12 = vcmp.eq.s32.totalorder %v1131_v34, %v4238_v57  ;;  %vm4995_vm10 = vcmp.eq.s32.totalorder %v1192_v59, %v4244_v63  ;;  %v1046_v25 = vadd.s32 256, %v4218_v33 }
 0x10a   : > { %3082 = vmatprep.subr.msk.bf16.mxu1 %vm6431_vm14, %v3869_v2  ;;  %v6437_v60 = vsel %vm4815_vm1, 4294967295, %v6436_v60  ;;  %vm4841_vm14 = vcmp.eq.s32.totalorder %v1153_v62, %v4238_v57  ;;  %vm3113_vm11 = vmpackc.low %vm1294_vm0, %vm4836_vm3  ;;  %vm1290_vm3 = vcmp.eq.s32.totalorder %v1152_v53, %v4244_v63  ;;  %vm6459_vm0 = vnez %v6426_v18 }
 0x10b   : > { %3114 = vmatprep.subr.msk.bf16.mxu0 %vm3113_vm11, %v3869_v2  ;;  %vm1288_vm11 = vcmp.eq.s32.totalorder %v1151_v52, %v4244_v63  ;;  %v1145_v23 = vshra.s32 %v1046_v25, 2  ;;  %v1174_v34 = vshra.s32 %v1075_v31, 2  ;;  %v1072_v36 = vadd.s32 464, %v4218_v33 }
 0x10c   : > { %vm3117_vm8 = vmpackc.low %vm1290_vm3, %vm1288_vm11  ;;  %vm4952_vm11 = vcmp.eq.s32.totalorder %v1149_v11, %v4238_v57  ;;  %vm4957_vm3 = vcmp.eq.s32.totalorder %v1150_v13, %v4238_v57  ;;  %v1073_v54 = vadd.s32 472, %v4218_v33  ;;  %v1071_v12 = vadd.s32 456, %v4218_v33 }
 0x10d   : > { %3084 = vmatpush2.bf16.msk.msra.mxu1 %vm6444_vm7, %v3869_v2  ;;  %vm6450_vm7 = vmpackc.low %vm4685_vm13, %vm6449_vm5  ;;  %v1171_v58 = vshra.s32 %v1072_v36, 2  ;;  %v1066_v46 = vadd.s32 416, %v4218_v33  ;;  %v1064_v51 = vadd.s32 400, %v4218_v33  ;;  %v1065_v42 = vadd.s32 408, %v4218_v33 }
 0x10e   : > { %3086 = vmatprep.subr.msk.bf16.mxu1 %vm6450_vm7, %v3869_v2  ;;  %vm3115_vm13 = vmpackc.low %vm1293_vm9, %vm4841_vm14  ;;  %vm4902_vm14 = vcmp.eq.s32.totalorder %v1151_v52, %v4238_v57  ;;  %vm1289_vm9 = vcmp.eq.s32.totalorder %v1152_v53, %v4238_v57  ;;  %v1172_v18 = vshra.s32 %v1073_v54, 2  ;;  %v1062_v48 = vadd.s32 384, %v4218_v33  ;;  %v5119_v53 = vpop.permute.xlu0 %676 }
 0x10f   : > { %3116 = vmatpush1.bf16.msk.msra.mxu0 %vm3115_vm13, %v3869_v2  ;;  %vm6457_vm5 = vmpackc.low %vm4725_vm2, %vm4720_vm4  ;;  %vm6458_vm13 = vnez %v6428_v20  ;;  %vm4927_vm2 = vcmp.eq.s32.totalorder %v1149_v11, %v4244_v63  ;;  %v1070_v20 = vadd.s32 448, %v4218_v33  ;;  %v1163_v43 = vshra.s32 %v1064_v51, 2 }
 0x110   : > { %vm6460_vm1 = vmpackc.low %vm6458_vm13, %vm6459_vm0  ;;  %3118 = vmatprep.subr.msk.bf16.mxu0 %vm3117_vm8, %v3869_v2  ;;  %vm4942_vm8 = vcmp.eq.s32.totalorder %v1191_v47, %v4238_v57  ;;  %vm4947_vm0 = vcmp.eq.s32.totalorder %v1192_v59, %v4238_v57  ;;  %v1164_v45 = vshra.s32 %v1065_v42, 2  ;;  %v1090_v54 = vadd.s32 608, %v4218_v33 }
 0x111   : > { %3088 = vmatpush2.bf16.msk.msra.mxu1 %vm6457_vm5, %v3869_v2  ;;  %vm3119_vm4 = vmpackc.low %vm1289_vm9, %vm4902_vm14  ;;  %vm4932_vm5 = vcmp.eq.s32.totalorder %v1150_v13, %v4244_v63  ;;  %vm6473_vm14 = vnez %v6435_v39  ;;  %vm6474_vm9 = vnez %v6433_v38  ;;  %v1169_v14 = vshra.s32 %v1070_v20, 2 }
 0x112   : > { %3090 = vmatprep.subr.msk.bf16.mxu1 %vm6460_vm1, %v3869_v2  ;;  %vm6475_vm13 = vmpackc.low %vm6473_vm14, %vm6474_vm9  ;;  %vm4973_vm1 = vcmp.eq.s32.totalorder %v1130_v10, %v4238_v57  ;;  %vm6480_vm14 = vnez %v6439_v41  ;;  %vm6481_vm9 = vnez %v6437_v60  ;;  %v1170_v38 = vshra.s32 %v1071_v12, 2  ;;  %v5142_v17 = vpop.permute.xlu0 %691 }
 0x113   : > { %3120 = vmatpush1.bf16.msk.msra.mxu0 %vm3119_vm4, %v3869_v2  ;;  %vm4968_vm4 = vcmp.eq.s32.totalorder %v1129_v4, %v4238_v57  ;;  %vm3121_vm7 = vmpackc.low %vm4932_vm5, %vm4927_vm2  ;;  %vm6488_vm2 = vnez %v6454_v50  ;;  %v1068_v39 = vadd.s32 432, %v4218_v33  ;;  %v1069_v60 = vadd.s32 440, %v4218_v33 }
 0x114   : > { %3122 = vmatprep.subr.msk.bf16.mxu0 %vm3121_vm7, %v3869_v2  ;;  %vm3123_vm5 = vmpackc.low %vm4957_vm3, %vm4952_vm11  ;;  %vm1280_vm3 = vcmp.eq.s32.totalorder %v1147_v21, %v4244_v63  ;;  %v1067_v4 = vadd.s32 424, %v4218_v33  ;;  %v1165_v10 = vshra.s32 %v1066_v46, 2  ;;  %v1161_v50 = vshra.s32 %v1062_v48, 2 }
 0x115   : > { %3092 = vmatpush2.bf16.msk.msra.mxu1 %vm6475_vm13, %v3869_v2  ;;  %vm6482_vm13 = vmpackc.low %vm6480_vm14, %vm6481_vm9  ;;  %vm1282_vm9 = vcmp.eq.s32.totalorder %v1148_v24, %v4244_v63  ;;  %vm6489_vm14 = vnez %v6452_v30  ;;  %v1167_v62 = vshra.s32 %v1068_v39, 2  ;;  %v1168_v41 = vshra.s32 %v1069_v60, 2 }
 0x116   : > { %3094 = vmatprep.subr.msk.bf16.mxu1 %vm6482_vm13, %v3869_v2  ;;  %vm6487_vm7 = vmpackc.low %vm4863_vm15, %vm4858_vm12  ;;  %vm1279_vm13 = vcmp.eq.s32.totalorder %v1147_v21, %v4238_v57  ;;  %v1166_v49 = vshra.s32 %v1067_v4, 2  ;;  %v1063_v30 = vadd.s32 392, %v4218_v33  ;;  %v1088_v60 = vadd.s32 592, %v4218_v33 }
 0x117   : > { %3124 = vmatpush1.bf16.msk.msra.mxu0 %vm3123_vm5, %v3869_v2  ;;  %vm3165_vm11 = vmpackc.low %vm4995_vm10, %vm4990_vm6  ;;  %vm1281_vm5 = vcmp.eq.s32.totalorder %v1148_v24, %v4238_v57  ;;  %vm1338_vm6 = vcmp.eq.s32.totalorder %v1176_v35, %v4244_v63  ;;  %vm1335_vm10 = vcmp.eq.s32.totalorder %v1175_v9, %v4238_v57  ;;  %v5158_v4 = vadd.s32 576, %v4218_v33 }
 0x118   : > { %vm6490_vm15 = vmpackc.low %vm6488_vm2, %vm6489_vm14  ;;  %vm1276_vm14 = vcmp.eq.s32.totalorder %v1145_v23, %v4244_v63  ;;  %v1162_v52 = vshra.s32 %v1063_v30, 2  ;;  %v5166_v42 = vadd.s32 584, %v4218_v33  ;;  %v1187_v48 = vshra.s32 %v1088_v60, 2 }
 0x119   : > { %3096 = vmatpush2.bf16.msk.msra.mxu1 %vm6487_vm7, %v3869_v2  ;;  %vm3125_vm12 = vmpackc.low %vm1282_vm9, %vm1280_vm3  ;;  %vm1278_vm3 = vcmp.eq.s32.totalorder %v1146_v28, %v4244_v63  ;;  %vm1275_vm9 = vcmp.eq.s32.totalorder %v1145_v23, %v4238_v57  ;;  %v1079_v60 = vadd.s32 520, %v4218_v33 }
 0x11a   : > { %3098 = vmatprep.subr.msk.bf16.mxu1 %vm6490_vm15, %v3869_v2  ;;  %3126 = vmatprep.subr.msk.bf16.mxu0 %vm3125_vm12, %v3869_v2  ;;  %vm3127_vm7 = vmpackc.low %vm1281_vm5, %vm1279_vm13  ;;  %vm1277_vm13 = vcmp.eq.s32.totalorder %v1146_v28, %v4238_v57 }
 0x11b   : > { %3128 = vmatpush1.bf16.msk.msra.mxu0 %vm3127_vm7, %v3869_v2  ;;  %vm6491_vm2 = vmpackc.low %vm4973_vm1, %vm4968_vm4  ;;  %vm1336_vm4 = vcmp.eq.s32.totalorder %v1175_v9, %v4244_v63  ;;  %vm1332_vm7 = vcmp.eq.s32.totalorder %v1173_v32, %v4244_v63 }
 0x11c   : > { %vm3129_vm5 = vmpackc.low %vm1278_vm3, %vm1276_vm14  ;;  %vm1331_vm14 = vcmp.eq.s32.totalorder %v1173_v32, %v4238_v57  ;;  %vm1333_vm3 = vcmp.eq.s32.totalorder %v1174_v34, %v4238_v57 }
 0x11d   : > { %3100 = vmatpush2.bf16.msk.msra.mxu1 %vm6491_vm2, %v3869_v2  ;;  %3130 = vmatprep.subr.msk.bf16.mxu0 %vm3129_vm5, %v3869_v2  ;;  %vm3131_vm1 = vmpackc.low %vm1277_vm13, %vm1275_vm9  ;;  %vm1334_vm2 = vcmp.eq.s32.totalorder %v1174_v34, %v4244_v63  ;;  %vm1328_vm5 = vcmp.eq.s32.totalorder %v1171_v58, %v4244_v63 }
 0x11e   : > { %3166 = vmatprep.subr.msk.bf16.mxu1 %vm3165_vm11, %v3869_v2  ;;  %vm1337_vm11 = vcmp.eq.s32.totalorder %v1176_v35, %v4238_v57  ;;  %vm3133_vm15 = vmpackc.low %vm1338_vm6, %vm1336_vm4  ;;  %vm1327_vm4 = vcmp.eq.s32.totalorder %v1171_v58, %v4238_v57  ;;  %vm1329_vm6 = vcmp.eq.s32.totalorder %v1172_v18, %v4238_v57 }
 0x11f   : > { %3132 = vmatpush1.bf16.msk.msra.mxu0 %vm3131_vm1, %v3869_v2  ;;  %vm3135_vm12 = vmpackc.low %vm1337_vm11, %vm1335_vm10  ;;  %vm1330_vm1 = vcmp.eq.s32.totalorder %v1172_v18, %v4244_v63  ;;  %v1091_v18 = vadd.s32 616, %v4218_v33 }
 0x120   : > { %3134 = vmatprep.subr.msk.bf16.mxu0 %vm3133_vm15, %v3869_v2  ;;  %vm3137_vm9 = vmpackc.low %vm1334_vm2, %vm1332_vm7  ;;  %vm1324_vm15 = vcmp.eq.s32.totalorder %v1169_v14, %v4244_v63  ;;  %vm1323_vm2 = vcmp.eq.s32.totalorder %v1169_v14, %v4238_v57  ;;  %v1189_v14 = vshra.s32 %v1090_v54, 2 }
 0x121   : > { %vm3139_vm13 = vmpackc.low %vm1333_vm3, %vm1331_vm14  ;;  %vm1325_vm14 = vcmp.eq.s32.totalorder %v1170_v38, %v4238_v57  ;;  %v1190_v39 = vshra.s32 %v1091_v18, 2  ;;  %v1080_v18 = vadd.s32 528, %v4218_v33 }
 0x122   : > { %vm3141_vm10 = vmpackc.low %vm1330_vm1, %vm1328_vm5  ;;  %vm1319_vm1 = vcmp.eq.s32.totalorder %v1167_v62, %v4238_v57 }
 0x123   : > { %3136 = vmatpush2.bf16.msk.msra.mxu0 %vm3135_vm12, %v3869_v2  ;;  %vm3143_vm11 = vmpackc.low %vm1329_vm6, %vm1327_vm4  ;;  %vm1326_vm12 = vcmp.eq.s32.totalorder %v1170_v38, %v4244_v63  ;;  %vm1321_vm4 = vcmp.eq.s32.totalorder %v1168_v41, %v4238_v57 }
 0x124   : > { %3138 = vmatprep.subr.msk.bf16.mxu0 %vm3137_vm9, %v3869_v2  ;;  %vm3145_vm7 = vmpackc.low %vm1326_vm12, %vm1324_vm15  ;;  %vm1320_vm9 = vcmp.eq.s32.totalorder %v1167_v62, %v4244_v63  ;;  %vm1315_vm15 = vcmp.eq.s32.totalorder %v1165_v10, %v4238_v57  ;;  %vm1317_vm12 = vcmp.eq.s32.totalorder %v1166_v49, %v4238_v57 }
 0x125   : > { %vm3147_vm3 = vmpackc.low %vm1325_vm14, %vm1323_vm2  ;;  %vm1312_vm14 = vcmp.eq.s32.totalorder %v1163_v43, %v4244_v63 }
 0x126   : > { %vm3151_vm6 = vmpackc.low %vm1321_vm4, %vm1319_vm1  ;;  %vm1308_vm4 = vcmp.eq.s32.totalorder %v1161_v50, %v4244_v63 }
 0x127   : > { %3140 = vmatpush2.bf16.msk.msra.mxu0 %vm3139_vm13, %v3869_v2  ;;  %vm1322_vm13 = vcmp.eq.s32.totalorder %v1168_v41, %v4244_v63  ;;  %vm3155_vm2 = vmpackc.low %vm1317_vm12, %vm1315_vm15  ;;  %v1089_v41 = vadd.s32 600, %v4218_v33 }
 0x128   : > { %3142 = vmatprep.subr.msk.bf16.mxu0 %vm3141_vm10, %v3869_v2  ;;  %vm3149_vm5 = vmpackc.low %vm1322_vm13, %vm1320_vm9  ;;  %vm1316_vm10 = vcmp.eq.s32.totalorder %v1165_v10, %v4244_v63  ;;  %vm1311_vm9 = vcmp.eq.s32.totalorder %v1163_v43, %v4238_v57  ;;  %vm1313_vm13 = vcmp.eq.s32.totalorder %v1164_v45, %v4238_v57 }
 0x129   : > { %vm3159_vm1 = vmpackc.low %vm1313_vm13, %vm1311_vm9 }
 0x12b   : > { %3144 = vmatpush2.bf16.msk.msra.mxu0 %vm3143_vm11, %v3869_v2  ;;  %vm1318_vm11 = vcmp.eq.s32.totalorder %v1166_v49, %v4244_v63 }
 0x12c   : > { %3146 = vmatprep.subr.msk.bf16.mxu0 %vm3145_vm7, %v3869_v2  ;;  %vm3153_vm7 = vmpackc.low %vm1318_vm11, %vm1316_vm10  ;;  %vm1310_vm10 = vcmp.eq.s32.totalorder %v1162_v52, %v4244_v63  ;;  %vm1309_vm11 = vcmp.eq.s32.totalorder %v1162_v52, %v4238_v57 }
 0x12d   : > { %vm3161_vm15 = vmpackc.low %vm1310_vm10, %vm1308_vm4  ;;  %vm5191_vm4 = vcmp.eq.s32.totalorder %v1190_v39, %v4238_v57 }
 0x12f   : > { %3148 = vmatpush2.bf16.msk.msra.mxu0 %vm3147_vm3, %v3869_v2  ;;  %vm1314_vm3 = vcmp.eq.s32.totalorder %v1164_v45, %v4244_v63 }
 0x130   : > { %3150 = vmatprep.subr.msk.bf16.mxu0 %vm3149_vm5, %v3869_v2  ;;  %vm3157_vm5 = vmpackc.low %vm1314_vm3, %vm1312_vm14  ;;  %vm5169_vm14 = vcmp.eq.s32.totalorder %v1190_v39, %v4244_v63 }
 0x133   : > { %3152 = vmatpush2.bf16.msk.msra.mxu0 %vm3151_vm6, %v3869_v2  ;;  %vm1307_vm6 = vcmp.eq.s32.totalorder %v1161_v50, %v4238_v57  ;;  %v1188_v50 = vshra.s32 %v1089_v41, 2 }
 0x134   : > { %3154 = vmatprep.subr.msk.bf16.mxu0 %vm3153_vm7, %v3869_v2  ;;  %vm3163_vm12 = vmpackc.low %vm1309_vm11, %vm1307_vm6  ;;  %vm5161_vm7 = vcmp.eq.s32.totalorder %v1189_v14, %v4244_v63  ;;  %vm5196_vm6 = vcmp.eq.s32.totalorder %v1187_v48, %v4244_v63  ;;  %vm5206_vm11 = vcmp.eq.s32.totalorder %v1187_v48, %v4238_v57 }
 0x135   : > { %vm5201_vm10 = vcmp.eq.s32.totalorder %v1188_v50, %v4244_v63 }
 0x137   : > { %3156 = vmatpush2.bf16.msk.msra.mxu0 %vm3155_vm2, %v3869_v2 }
 0x138   : > { %3158 = vmatprep.subr.msk.bf16.mxu0 %vm3157_vm5, %v3869_v2  ;;  %vm3169_vm5 = vmpackc.low %vm5169_vm14, %vm5161_vm7 }
 0x13b   : > { %3160 = vmatpush2.bf16.msk.msra.mxu0 %vm3159_vm1, %v3869_v2  ;;  %vm5186_vm1 = vcmp.eq.s32.totalorder %v1189_v14, %v4238_v57  ;;  %v1081_v14 = vadd.s32 536, %v4218_v33 }
 0x13c   : > { %3162 = vmatprep.subr.msk.bf16.mxu0 %vm3161_vm15, %v3869_v2  ;;  %vm5211_vm15 = vcmp.eq.s32.totalorder %v1188_v50, %v4238_v57  ;;  %v1178_v50 = vshra.s32 %v1079_v60, 2 }
 0x13d   : > { %vm3175_vm14 = vmpackc.low %vm5211_vm15, %vm5206_vm11 }
 0x13f   : > { %3164 = vmatpush2.bf16.msk.msra.mxu0 %vm3163_vm12, %v3869_v2  ;;  %vm6508_vm12 = vmpackc.low %vm4947_vm0, %vm4942_vm8 }
 0x140   : > { %vm3171_vm8 = vmpackc.low %vm5191_vm4, %vm5186_vm1 }
 0x172   : > { %v744_v16 = vpop.f32.mrf.mxu0 }
 0x173   : > { %v5122_v55 = vadd.f32 %v744_v16, %v5119_v53 }
 0x174   : > { %v746_v56 = vpop.f32.mrf.mxu0 }
 0x175   : > { %v893_v44 = vmin.f32 %v5122_v55, 0.0  ;;  %v5128_v47 = vadd.f32 %v746_v56, %v5119_v53  ;;  %vm869_vm13 = vcmp.gt.f32.partialorder %v5122_v55, 0.0 }
 0x176   : > { %v748_v59 = vpop.f32.mrf.mxu0 }
 0x177   : > { %v917_v11 = vmul.f32 1.442695, %v893_v44  ;;  %v894_v13 = vmin.f32 %v5128_v47, 0.0  ;;  %v749_v1 = vadd.f32 %v748_v59, %v5124_v37  ;;  %vm870_vm3 = vcmp.gt.f32.partialorder %v5128_v47, 0.0 }
 0x178   : > { %v750_v6 = vpop.f32.mrf.mxu0  ;;  %v1185_v44 = vshra.s32 %v5158_v4, 2  ;;  %v1180_v4 = vshra.s32 %v1081_v14, 2 }
 0x179   : > { %v919_v8 = vmul.f32 1.442695, %v894_v13  ;;  %v899_v19 = vmin.f32 %v749_v1, 0.0  ;;  %v751_v15 = vadd.f32 %v750_v6, %v5124_v37  ;;  %3790 = vpow2.f32 %v917_v11 }
 0x17a   : > { %v754_v61 = vpop.f32.mrf.mxu0  ;;  %vm875_vm2 = vcmp.gt.f32.partialorder %v749_v1, 0.0  ;;  %v1186_v6 = vshra.s32 %v5166_v42, 2 }
 0x17b   : > { %v929_v26 = vmul.f32 1.442695, %v899_v19  ;;  %v5136_v3 = vadd.f32 %v754_v61, %v5132_v22  ;;  %3792 = vpow2.f32 %v919_v8  ;;  %v900_v29 = vmin.f32 %v751_v15, 0.0 }
 0x17c   : > { %v756_v21 = vpop.f32.mrf.mxu0  ;;  %vm876_vm9 = vcmp.gt.f32.partialorder %v751_v15, 0.0  ;;  %v1084_v8 = vadd.s32 560, %v4218_v33  ;;  %v1085_v61 = vadd.s32 568, %v4218_v33  ;;  %vm5274_vm4 = vcmp.eq.s32.totalorder %v1186_v6, %v4238_v57 }
 0x17d   : > { %3794 = vpow2.f32 %v929_v26  ;;  %v905_v24 = vmin.f32 %v5136_v3, 0.0  ;;  %v5140_v25 = vadd.f32 %v756_v21, %v5132_v22  ;;  %v931_v23 = vmul.f32 1.442695, %v900_v29 }
 0x17e   : > { %v758_v28 = vpop.f32.mrf.mxu0  ;;  %v1184_v40 = vshra.s32 %v1085_v61, 2  ;;  %vm881_vm7 = vcmp.gt.f32.partialorder %v5136_v3, 0.0  ;;  %v1105_v21 = vadd.s32 728, %v4218_v33 }
 0x17f   : > { %v941_v0 = vmul.f32 1.442695, %v905_v24  ;;  %v906_v5 = vmin.f32 %v5140_v25, 0.0  ;;  %v5146_v9 = vadd.f32 %v758_v28, %v5142_v17  ;;  %3796 = vpow2.f32 %v931_v23 }
 0x180   : > { %v760_v35 = vpop.f32.mrf.mxu0  ;;  %vm882_vm0 = vcmp.gt.f32.partialorder %v5140_v25, 0.0  ;;  %v5392_v23 = vadd.s32 704, %v4218_v33 }
 0x181   : > { %v943_v27 = vmul.f32 1.442695, %v906_v5  ;;  %v911_v31 = vmin.f32 %v5146_v9, 0.0  ;;  %v5150_v32 = vadd.f32 %v760_v35, %v5142_v17  ;;  %3798 = vpow2.f32 %v941_v0 }
 0x182   : > { %v5399_v35 = vadd.s32 712, %v4218_v33 }
 0x183   : > { %v953_v34 = vmul.f32 1.442695, %v911_v31  ;;  %3800 = vpow2.f32 %v943_v27  ;;  %v912_v36 = vmin.f32 %v5150_v32, 0.0  ;;  %v1183_v27 = vshra.s32 %v1084_v8, 2 }
 0x184   : > { %v1082_v31 = vadd.s32 544, %v4218_v33 }
 0x185   : > { %3802 = vpow2.f32 %v953_v34  ;;  %v955_v58 = vmul.f32 1.442695, %v912_v36  ;;  %v1083_v36 = vadd.s32 552, %v4218_v33  ;;  %vm5297_vm15 = vcmp.eq.s32.totalorder %v1183_v27, %v4238_v57 }
 0x186   : > { %v3791_v20 = vpop.eup %3790 }
 0x187   : > { %3804 = vpow2.f32 %v955_v58  ;;  %v3011_v49 = vadd.f32 -1.0, %v3791_v20  ;;  %v1182_v39 = vshra.s32 %v1083_v36, 2 }
 0x188   : > { %v3793_v12 = vpop.eup %3792 }
 0x189   : > { %v3012_v46 = vadd.f32 -1.0, %v3793_v12  ;;  %v989_v11 = vsel %vm869_vm13, %v5122_v55, %v3011_v49  ;;  %vm888_vm13 = vcmp.gt.f32.partialorder %v5150_v32, 0.0  ;;  %v5475_v49 = vadd.s32 696, %v4218_v33 }
 0x18a   : > { %v3795_v38 = vpop.eup %3794 }
 0x18b   : > { %v3017_v62 = vadd.f32 -1.0, %v3795_v38  ;;  %v990_v16 = vsel %vm870_vm3, %v5128_v47, %v3012_v46  ;;  %vm5227_vm3 = vcmp.eq.s32.totalorder %v1186_v6, %v4244_v63  ;;  %v1181_v38 = vshra.s32 %v1082_v31, 2 }
 0x18c   : > { %v3797_v10 = vpop.eup %3796  ;;  %v1179_v46 = vshra.s32 %v1080_v18, 2  ;;  %v6547_v31 = vmov 0 }
 0x18d   : > { %v3018_v43 = vadd.f32 -1.0, %v3797_v10  ;;  %v995_v30 = vsel %vm875_vm2, %v749_v1, %v3017_v62  ;;  %vm5222_vm2 = vcmp.eq.s32.totalorder %v1185_v44, %v4244_v63  ;;  %v1106_v10 = vadd.s32 736, %v4218_v33 }
 0x18e   : > { %v3799_v52 = vpop.eup %3798  ;;  %v1979_v1 = vpack.c.bf16 %v995_v30, %v989_v11  ;;  %vm3177_vm1 = vmpackc.low %vm5227_vm3, %vm5222_vm2  ;;  %vm5302_vm2 = vcmp.eq.s32.totalorder %v1184_v40, %v4238_v57  ;;  %v1202_v62 = vshra.s32 %v5399_v35, 2 }
 0x18f   : > { %v996_v56 = vsel %vm876_vm9, %v751_v15, %v3018_v43  ;;  %v3023_v0 = vadd.f32 -1.0, %v3799_v52  ;;  %vm887_vm9 = vcmp.gt.f32.partialorder %v5146_v9, 0.0  ;;  %v5307_v43 = vadd.s32 744, %v4218_v33 }
 0x190   : > { %v3801_v59 = vpop.eup %3800  ;;  %v1980_v13 = vpack.c.bf16 %v996_v56, %v990_v16  ;;  %v5324_v52 = vadd.s32 720, %v4218_v33 }
 0x191   : > { %v3024_v29 = vadd.f32 -1.0, %v3801_v59  ;;  %v1001_v12 = vsel %vm881_vm7, %v5136_v3, %v3023_v0  ;;  %vm5346_vm7 = vcmp.eq.s32.totalorder %v1180_v4, %v4244_v63  ;;  %v1206_v55 = vshra.s32 %v5307_v43, 2 }
 0x192   : > { %v3803_v19 = vpop.eup %3802  ;;  %2023 = vmatprep.mubr.bf16.mxu1 %v1980_v13  ;;  %v1203_v24 = vshra.s32 %v5324_v52, 2  ;;  %v1201_v3 = vshra.s32 %v5392_v23, 2 }
 0x193   : > { %v3029_v26 = vadd.f32 -1.0, %v3803_v19  ;;  %2024 = vmatmul.mubr.bf16.vlgmr.msra.gmra.mxu1 %v1979_v1  ;;  %v1002_v54 = vsel %vm882_vm0, %v5140_v25, %v3024_v29  ;;  %vm5330_vm0 = vcmp.eq.s32.totalorder %v1181_v38, %v4238_v57  ;;  %v1205_v19 = vshra.s32 %v1106_v10, 2 }
 0x194   : > { %v3805_v28 = vpop.eup %3804  ;;  %3168 = vmatpush1.bf16.msk.msra.mxu1 %vm6508_vm12, %v3869_v2  ;;  %vm3173_vm12 = vmpackc.low %vm5201_vm10, %vm5196_vm6  ;;  %vm5280_vm6 = vcmp.eq.s32.totalorder %v1183_v27, %v4244_v63  ;;  %vm5285_vm10 = vcmp.eq.s32.totalorder %v1184_v40, %v4244_v63  ;;  %v5472_v10 = vadd.s32 688, %v4218_v33 }
 0x195   : > { %3170 = vmatprep.subr.msk.bf16.mxu1 %vm3169_vm5, %v3869_v2  ;;  %v3030_v7 = vadd.f32 -1.0, %v3805_v28  ;;  %v1007_v34 = vsel %vm887_vm9, %v5146_v9, %v3029_v26  ;;  %vm5264_vm5 = vcmp.eq.s32.totalorder %v1185_v44, %v4238_v57  ;;  %vm3181_vm3 = vmpackc.low %vm5285_vm10, %vm5280_vm6  ;;  %vm5314_vm9 = vcmp.eq.s32.totalorder %v1181_v38, %v4244_v63 }
 0x196   : > { %v1985_v9 = vpack.c.bf16 %v1007_v34, %v1001_v12  ;;  %vm3179_vm11 = vmpackc.low %vm5274_vm4, %vm5264_vm5  ;;  %vm5356_vm5 = vcmp.eq.s32.totalorder %v1180_v4, %v4238_v57  ;;  %vm5385_vm10 = vcmp.eq.s32.totalorder %v1178_v50, %v4244_v63  ;;  %v6561_v44 = vmov 0 }
 0x197   : > { %v1008_v58 = vsel %vm888_vm13, %v5150_v32, %v3030_v7  ;;  %v1078_v32 = vadd.s32 512, %v4218_v33  ;;  %vm5335_vm13 = vcmp.eq.s32.totalorder %v1182_v39, %v4238_v57  ;;  %v1199_v23 = vshra.s32 %v5472_v10, 2 }
 0x198   : > { %3172 = vmatpush1.bf16.msk.msra.mxu1 %vm3171_vm8, %v3869_v2  ;;  %v1986_v20 = vpack.c.bf16 %v1008_v58, %v1002_v54  ;;  %vm5319_vm8 = vcmp.eq.s32.totalorder %v1182_v39, %v4244_v63 }
 0x199   : > { %3174 = vmatprep.subr.msk.bf16.mxu1 %vm3173_vm12, %v3869_v2  ;;  %v1177_v42 = vshra.s32 %v1078_v32, 2  ;;  %vm5340_vm12 = vcmp.eq.s32.totalorder %v1179_v46, %v4244_v63  ;;  %vm3185_vm6 = vmpackc.low %vm5319_vm8, %vm5314_vm9  ;;  %vm5450_vm8 = vcmp.eq.s32.totalorder %v1205_v19, %v4238_v57  ;;  %v1204_v32 = vshra.s32 %v1105_v21, 2 }
 0x19a   : > { %2033 = vmatprep.mubr.bf16.mxu1 %v1986_v20  ;;  %vm3189_vm9 = vmpackc.low %vm5346_vm7, %vm5340_vm12  ;;  %vm5505_vm12 = vcmp.eq.s32.totalorder %v1203_v24, %v4238_v57 }
 0x19b   : > { %2034 = vmatmul.mubr.bf16.gmra.mxu1 %v1985_v9  ;;  %vm5375_vm4 = vcmp.eq.s32.totalorder %v1177_v42, %v4244_v63  ;;  %v6562_v44 = vsel %vm5505_vm12, 4294967295, %v6561_v44  ;;  %vm5510_vm7 = vcmp.eq.s32.totalorder %v1204_v32, %v4238_v57  ;;  %vm5547_vm12 = vcmp.eq.s32.totalorder %v1202_v62, %v4244_v63 }
 0x19c   : > { %3176 = vmatpush1.bf16.msk.msra.mxu1 %vm3175_vm14, %v3869_v2  ;;  %vm5351_vm14 = vcmp.eq.s32.totalorder %v1179_v46, %v4238_v57 }
 0x19d   : > { %3178 = vmatprep.subr.msk.bf16.mxu1 %vm3177_vm1, %v3869_v2  ;;  %vm3183_vm1 = vmpackc.low %vm5302_vm2, %vm5297_vm15  ;;  %vm5408_vm15 = vcmp.eq.s32.totalorder %v1178_v50, %v4238_v57  ;;  %vm5413_vm2 = vcmp.eq.s32.totalorder %v1205_v19, %v4244_v63 }
 0x19e   : > { %v6548_v31 = vsel %vm5408_vm15, 4294967295, %v6547_v31  ;;  %vm5430_vm15 = vcmp.eq.s32.totalorder %v1206_v55, %v4238_v57 }
 0x19f   : > { %v797_v45 = vpop.f32.mrf.mxu1 }
 0x1a0   : > { %v5327_v16 = vadd.f32 %v797_v45, %v5119_v53  ;;  %3180 = vmatpush1.bf16.msk.msra.mxu1 %vm3179_vm11, %v3869_v2  ;;  %vm5403_vm11 = vcmp.eq.s32.totalorder %v1177_v42, %v4238_v57 }
 0x1a1   : > { %v799_v11 = vpop.f32.mrf.mxu1  ;;  %3182 = vmatprep.subr.msk.bf16.mxu1 %vm3181_vm3, %v3869_v2  ;;  %vm5435_vm3 = vcmp.eq.s32.totalorder %v1206_v55, %v4244_v63 }
 0x1a2   : > { %v895_v1 = vmin.f32 %v5327_v16, 0.0  ;;  %v5362_v61 = vadd.f32 %v799_v11, %v5119_v53 }
 0x1a3   : > { %v801_v15 = vpop.f32.mrf.mxu1  ;;  %v850_v26 = vpop.f32.mrf.mxu0 }
 0x1a4   : > { %v921_v28 = vmul.f32 1.442695, %v895_v1  ;;  %v896_v0 = vmin.f32 %v5362_v61, 0.0  ;;  %v5396_v5 = vadd.f32 %v801_v15, %v5124_v37  ;;  %3184 = vmatpush1.bf16.msk.msra.mxu1 %vm3183_vm1, %v3869_v2  ;;  %vm3187_vm1 = vmpackc.low %vm5335_vm13, %vm5330_vm0  ;;  %v5493_v48 = vadd.f32 %v850_v26, %v5119_v53 }
 0x1a5   : > { %v803_v27 = vpop.f32.mrf.mxu1  ;;  %v852_v7 = vpop.f32.mrf.mxu0  ;;  %3186 = vmatprep.subr.msk.bf16.mxu1 %vm3185_vm6, %v3869_v2  ;;  %vm5459_vm6 = vcmp.eq.s32.totalorder %v1203_v24, %v4244_v63  ;;  %vm3191_vm0 = vmpackc.low %vm5356_vm5, %vm5351_vm14  ;;  %vm6574_vm5 = vcmp.lt.s32.totalorder %v5307_v43, 748 }
 0x1a6   : > { %v923_v36 = vmul.f32 1.442695, %v896_v0  ;;  %v901_v54 = vmin.f32 %v5396_v5, 0.0  ;;  %v5440_v20 = vadd.f32 %v803_v27, %v5124_v37  ;;  %v5443_v12 = vadd.f32 %v852_v7, %v5119_v53  ;;  %vm6573_vm14 = vmpackc.low %vm5385_vm10, %vm5375_vm4 }
 0x1a7   : > { %v807_v14 = vpop.f32.mrf.mxu1  ;;  %v854_v9 = vpop.f32.mrf.mxu0  ;;  %3806 = vpow2.f32 %v921_v28  ;;  %v6563_v53 = vmov 0  ;;  %v1200_v28 = vshra.s32 %v5475_v49, 2  ;;  %vm5576_vm10 = vcmp.eq.s32.totalorder %v1201_v3, %v4238_v57 }
 0x1a8   : > { %v933_v38 = vmul.f32 1.442695, %v901_v54  ;;  %v5456_v39 = vadd.f32 %v807_v14, %v5132_v22  ;;  %3808 = vpow2.f32 %v923_v36  ;;  %v902_v41 = vmin.f32 %v5440_v20, 0.0  ;;  %3188 = vmatpush1.bf16.msk.msra.mxu1 %vm3187_vm1, %v3869_v2 }
 0x1a9   : > { %v809_v46 = vpop.f32.mrf.mxu1  ;;  %v856_v4 = vpop.f32.mrf.mxu0  ;;  %v898_v51 = vmin.f32 %v5443_v12, 0.0  ;;  %v5480_v45 = vadd.f32 %v854_v9, %v5124_v37  ;;  %3190 = vmatprep.subr.msk.bf16.mxu1 %vm3189_vm9, %v3869_v2  ;;  %vm5500_vm1 = vcmp.eq.s32.totalorder %v1204_v32, %v4244_v63  ;;  %v6564_v53 = vsel %vm5510_vm7, 4294967295, %v6563_v53 }
 0x1aa   : > { %3810 = vpow2.f32 %v933_v38  ;;  %v907_v42 = vmin.f32 %v5456_v39, 0.0  ;;  %v935_v30 = vmul.f32 1.442695, %v902_v41  ;;  %v5515_v13 = vadd.f32 %v809_v46, %v5132_v22 }
 0x1ab   : > { %v811_v50 = vpop.f32.mrf.mxu1  ;;  %v860_v52 = vpop.f32.mrf.mxu0  ;;  %v927_v59 = vmul.f32 1.442695, %v898_v51  ;;  %v5518_v19 = vadd.f32 %v856_v4, %v5124_v37  ;;  %vm6565_vm9 = vcmp.lt.s32.totalorder %v5307_v43, 748  ;;  %vm6568_vm7 = vnez %v6548_v31 }
 0x1ac   : > { %v945_v11 = vmul.f32 1.442695, %v907_v42  ;;  %vm5524_vm13 = vmand %vm5435_vm3, %vm6565_vm9  ;;  %3812 = vpow2.f32 %v935_v30  ;;  %v5529_v55 = vadd.f32 %v811_v50, %v5142_v17  ;;  %3192 = vmatpush1.bf16.msk.msra.mxu1 %vm3191_vm0, %v3869_v2  ;;  %vm5542_vm9 = vcmp.eq.s32.totalorder %v1201_v3, %v4244_v63 }
 0x1ad   : > { %v862_v37 = vpop.f32.mrf.mxu0  ;;  %vm3195_vm3 = vmpackc.low %vm6568_vm7, %vm5403_vm11  ;;  %v903_v6 = vmin.f32 %v5480_v45, 0.0  ;;  %v908_v8 = vmin.f32 %v5515_v13, 0.0  ;;  %v813_v21 = vpop.f32.mrf.mxu1  ;;  %3194 = vmatprep.subr.msk.bf16.mxu1 %vm6573_vm14, %v3869_v2  ;;  %3814 = vpow2.f32 %v927_v59  ;;  %v904_v0 = vmin.f32 %v5518_v19, 0.0 }
 0x1ae   : > { %vm5563_vm0 = vmand %vm5430_vm15, %vm6574_vm5  ;;  %v913_v29 = vmin.f32 %v5529_v55, 0.0  ;;  %vm5581_vm15 = vcmp.eq.s32.totalorder %v1202_v62, %v4238_v57  ;;  %v5586_v27 = vadd.s32 672, %v4218_v33  ;;  %v897_v7 = vmin.f32 %v5493_v48, 0.0 }
 0x1af   : > { %v864_v47 = vpop.f32.mrf.mxu0  ;;  %vm3197_vm4 = vmpackc.low %vm5524_vm13, %vm5413_vm2  ;;  %3816 = vpow2.f32 %v945_v11  ;;  %v947_v36 = vmul.f32 1.442695, %v908_v8  ;;  %v5590_v54 = vadd.s32 680, %v4218_v33  ;;  %v939_v58 = vmul.f32 1.442695, %v904_v0 }
 0x1b0   : > { %v957_v18 = vmul.f32 1.442695, %v913_v29  ;;  %v5593_v14 = vadd.f32 %v813_v21, %v5142_v17  ;;  %v5596_v9 = vadd.f32 %v862_v37, %v5132_v22  ;;  %3196 = vmatpush1.bf16.msk.msra.mxu1 %vm3195_vm3, %v3869_v2  ;;  %v937_v3 = vmul.f32 1.442695, %v903_v6  ;;  %vm3199_vm14 = vmpackc.low %vm5563_vm0, %vm5450_vm8 }
 0x1b1   : > { %v866_v32 = vpop.f32.mrf.mxu0  ;;  %3818 = vpow2.f32 %v947_v36  ;;  %3198 = vmatprep.subr.msk.bf16.mxu1 %vm3197_vm4, %v3869_v2  ;;  %vm5618_vm11 = vcmp.eq.s32.totalorder %v1199_v23, %v4244_v63  ;;  %v5624_v62 = vadd.f32 %v864_v47, %v5142_v17  ;;  %vm3201_vm2 = vmpackc.low %vm5500_vm1, %vm5459_vm6  ;;  %vm5631_vm13 = vcmp.eq.s32.totalorder %v1199_v23, %v4238_v57 }
 0x1b2   : > { %v5605_v38 = vadd.f32 %v866_v32, %v5142_v17  ;;  %3820 = vpow2.f32 %v939_v58  ;;  %v914_v31 = vmin.f32 %v5593_v14, 0.0  ;;  %v925_v25 = vmul.f32 1.442695, %v897_v7  ;;  %vm3205_vm5 = vmpackc.low %vm5547_vm12, %vm5542_vm9 }
 0x1b3   : > { %3822 = vpow2.f32 %v957_v18  ;;  %v910_v41 = vmin.f32 %v5596_v9, 0.0  ;;  %v1197_v46 = vshra.s32 %v5586_v27, 2  ;;  %v5638_v17 = vadd.f32 %v860_v52, %v5132_v22  ;;  %vm3207_vm9 = vmpackc.low %vm5581_vm15, %vm5576_vm10 }
 0x1b4   : > { %v3807_v4 = vpop.eup %3806  ;;  %v959_v10 = vmul.f32 1.442695, %v914_v31  ;;  %3200 = vmatpush2.bf16.msk.msra.mxu1 %vm3199_vm14, %v3869_v2  ;;  %v1198_v49 = vshra.s32 %v5590_v54, 2  ;;  %v5643_v51 = vadd.s32 656, %v4218_v33  ;;  %3824 = vpow2.f32 %v937_v3 }
 0x1b5   : > { %v3809_v42 = vpop.eup %3808  ;;  %v951_v30 = vmul.f32 1.442695, %v910_v41  ;;  %v916_v50 = vmin.f32 %v5605_v38, 0.0  ;;  %3202 = vmatprep.subr.msk.bf16.mxu1 %vm3201_vm2, %v3869_v2  ;;  %vm6585_vm8 = vnez %v6562_v44  ;;  %vm6586_vm7 = vnez %v6564_v53 }
 0x1b6   : > { %vm3203_vm3 = vmpackc.low %vm6586_vm7, %vm6585_vm8  ;;  %v5657_v22 = vadd.s32 664, %v4218_v33  ;;  %3826 = vpow2.f32 %v959_v10  ;;  %v915_v59 = vmin.f32 %v5624_v62, 0.0  ;;  %vm5665_vm6 = vcmp.eq.s32.totalorder %v1200_v28, %v4244_v63 }
 0x1b7   : > { %v3811_v52 = vpop.eup %3810  ;;  %vm5670_vm1 = vcmp.eq.s32.totalorder %v1200_v28, %v4238_v57  ;;  %3828 = vpow2.f32 %v925_v25  ;;  %v963_v53 = vmul.f32 1.442695, %v916_v50  ;;  %vm5675_vm0 = vcmp.eq.s32.totalorder %v1197_v46, %v4244_v63  ;;  %vm3209_vm14 = vmpackc.low %vm5665_vm6, %vm5618_vm11 }
 0x1b8   : > { %v3019_v44 = vadd.f32 -1.0, %v3811_v52  ;;  %v909_v1 = vmin.f32 %v5638_v17, 0.0  ;;  %3830 = vpow2.f32 %v951_v30  ;;  %3204 = vmatpush2.bf16.msk.msra.mxu1 %vm3203_vm3, %v3869_v2  ;;  %v3014_v37 = vadd.f32 -1.0, %v3809_v42  ;;  %vm3211_vm11 = vmpackc.low %vm5670_vm1, %vm5631_vm13 }
 0x1b9   : > { %vm5682_vm12 = vcmp.eq.s32.totalorder %v1198_v49, %v4244_v63  ;;  %v3813_v26 = vpop.eup %3812  ;;  %v3013_v6 = vadd.f32 -1.0, %v3807_v4  ;;  %3832 = vpow2.f32 %v963_v53  ;;  %3206 = vmatprep.subr.msk.bf16.mxu1 %vm3205_vm5, %v3869_v2  ;;  %v1195_v8 = vshra.s32 %v5643_v51, 2 }
 0x1ba   : > { %v1196_v21 = vshra.s32 %v5657_v22, 2  ;;  %vm877_vm4 = vcmp.gt.f32.partialorder %v5396_v5, 0.0  ;;  %v961_v24 = vmul.f32 1.442695, %v915_v59  ;;  %v3020_v23 = vadd.f32 -1.0, %v3813_v26  ;;  %v3815_v0 = vpop.eup %3814  ;;  %vm3213_vm10 = vmpackc.low %vm5682_vm12, %vm5675_vm0 }
 0x1bb   : > { %v1094_v28 = vadd.s32 640, %v4218_v33  ;;  %vm872_vm2 = vcmp.gt.f32.partialorder %v5362_v61, 0.0  ;;  %v997_v29 = vsel %vm877_vm4, %v5396_v5, %v3019_v44  ;;  %vm878_vm8 = vcmp.gt.f32.partialorder %v5440_v20, 0.0 }
 0x1bc   : > { %v1095_v47 = vadd.s32 648, %v4218_v33  ;;  %v3817_v27 = vpop.eup %3816  ;;  %vm871_vm7 = vcmp.gt.f32.partialorder %v5327_v16, 0.0  ;;  %v949_v7 = vmul.f32 1.442695, %v909_v1  ;;  %3208 = vmatpush2.bf16.msk.msra.mxu1 %vm3207_vm9, %v3869_v2  ;;  %v992_v36 = vsel %vm872_vm2, %v5362_v61, %v3014_v37 }
 0x1bd   : > { %v998_v54 = vsel %vm878_vm8, %v5440_v20, %v3020_v23  ;;  %v991_v5 = vsel %vm871_vm7, %v5327_v16, %v3013_v6  ;;  %3210 = vmatprep.subr.msk.bf16.mxu1 %vm3209_vm14, %v3869_v2  ;;  %vm5719_vm3 = vcmp.eq.s32.totalorder %v1197_v46, %v4238_v57  ;;  %3834 = vpow2.f32 %v961_v24 }
 0x1be   : > { %v1982_v58 = vpack.c.bf16 %v998_v54, %v992_v36  ;;  %v3819_v43 = vpop.eup %3818  ;;  %v1981_v35 = vpack.c.bf16 %v997_v29, %v991_v5  ;;  %v3016_v16 = vadd.f32 -1.0, %v3815_v0  ;;  %vm5728_vm15 = vcmp.eq.s32.totalorder %v1198_v49, %v4238_v57 }
 0x1bf   : > { %v3821_v20 = vpop.eup %3820  ;;  %vm5733_vm5 = vcmp.eq.s32.totalorder %v1195_v8, %v4244_v63  ;;  %vm5738_vm6 = vcmp.eq.s32.totalorder %v1196_v21, %v4244_v63  ;;  %v1193_v3 = vshra.s32 %v1094_v28, 2  ;;  %v1194_v40 = vshra.s32 %v1095_v47, 2  ;;  %vm3215_vm14 = vmpackc.low %vm5728_vm15, %vm5719_vm3 }
 0x1c0   : > { %2076 = vmatprep.mubr.bf16.mxu0 %v1982_v58  ;;  %v3823_v31 = vpop.eup %3822  ;;  %3836 = vpow2.f32 %v949_v7  ;;  %3212 = vmatpush2.bf16.msk.msra.mxu1 %vm3211_vm11, %v3869_v2  ;;  %v3022_v25 = vadd.f32 -1.0, %v3821_v20  ;;  %vm874_vm9 = vcmp.gt.f32.partialorder %v5443_v12, 0.0  ;;  %vm880_vm4 = vcmp.gt.f32.partialorder %v5518_v19, 0.0  ;;  %vm3217_vm1 = vmpackc.low %vm5738_vm6, %vm5733_vm5 }
 0x1c1   : > { %2077 = vmatmul.mubr.bf16.vlgmr.msra.gmra.mxu0 %v1981_v35  ;;  %3214 = vmatprep.subr.msk.bf16.mxu1 %vm3213_vm10, %v3869_v2  ;;  %v3031_v34 = vadd.f32 -1.0, %v3823_v31  ;;  %vm5761_vm13 = vcmp.eq.s32.totalorder %v1195_v8, %v4238_v57  ;;  %v3825_v46 = vpop.eup %3824  ;;  %v994_v4 = vsel %vm874_vm9, %v5443_v12, %v3016_v16  ;;  %v3026_v49 = vadd.f32 -1.0, %v3819_v43 }
 0x1c2   : > { %v1000_v10 = vsel %vm880_vm4, %v5518_v19, %v3022_v25  ;;  %vm5772_vm0 = vcmp.eq.s32.totalorder %v1196_v21, %v4238_v57  ;;  %v3025_v50 = vadd.f32 -1.0, %v3817_v27  ;;  %vm5777_vm12 = vcmp.eq.s32.totalorder %v1193_v3, %v4244_v63 }
 0x1c3   : > { %v3827_v42 = vpop.eup %3826  ;;  %v1984_v30 = vpack.c.bf16 %v1000_v10, %v994_v4  ;;  %vm5782_vm2 = vcmp.eq.s32.totalorder %v1194_v40, %v4244_v63  ;;  %vm889_vm8 = vcmp.gt.f32.partialorder %v5529_v55, 0.0  ;;  %vm5794_vm7 = vcmp.eq.s32.totalorder %v1193_v3, %v4238_v57  ;;  %vm3219_vm3 = vmpackc.low %vm5772_vm0, %vm5761_vm13 }
 0x1c4   : > { %v3829_v19 = vpop.eup %3828  ;;  %3216 = vmatpush2.bf16.msk.msra.mxu1 %vm3215_vm14, %v3869_v2  ;;  %v3032_v52 = vadd.f32 -1.0, %v3827_v42  ;;  %vm884_vm11 = vcmp.gt.f32.partialorder %v5515_v13, 0.0  ;;  %vm890_vm10 = vcmp.gt.f32.partialorder %v5593_v14, 0.0  ;;  %v1009_v60 = vsel %vm889_vm8, %v5529_v55, %v3031_v34  ;;  %vm3221_vm5 = vmpackc.low %vm5782_vm2, %vm5777_vm12 }
 0x1c5   : > { %v3831_v63 = vpop.eup %3830  ;;  %2129 = vmatprep.mubr.bf16.mxu1 %v1984_v30  ;;  %3218 = vmatprep.subr.msk.bf16.mxu1 %vm3217_vm1, %v3869_v2  ;;  %vm5812_vm15 = vcmp.eq.s32.totalorder %v1194_v40, %v4238_v57  ;;  %vm883_vm9 = vcmp.gt.f32.partialorder %v5456_v39, 0.0  ;;  %v3021_v53 = vadd.f32 -1.0, %v3825_v46  ;;  %v1004_v11 = vsel %vm884_vm11, %v5515_v13, %v3026_v49 }
 0x1c6   : > { %v3833_v44 = vpop.eup %3832  ;;  %v1010_v1 = vsel %vm890_vm10, %v5593_v14, %v3032_v52  ;;  %v1003_v37 = vsel %vm883_vm9, %v5456_v39, %v3025_v50  ;;  %v3015_v15 = vadd.f32 -1.0, %v3829_v19  ;;  %vm879_vm6 = vcmp.gt.f32.partialorder %v5480_v45, 0.0  ;;  %vm3223_vm4 = vmpackc.low %vm5812_vm15, %vm5794_vm7 }
 0x1c7   : > { %v1988_v55 = vpack.c.bf16 %v1010_v1, %v1004_v11  ;;  %v3034_v57 = vadd.f32 -1.0, %v3833_v44  ;;  %v1987_v26 = vpack.c.bf16 %v1009_v60, %v1003_v37  ;;  %v3028_v13 = vadd.f32 -1.0, %v3831_v63 }
 0x1c8   : > { %3220 = vmatpush2.bf16.msk.msra.mxu1 %vm3219_vm3, %v3869_v2  ;;  %v999_v14 = vsel %vm879_vm6, %v5480_v45, %v3021_v53  ;;  %vm892_vm14 = vcmp.gt.f32.partialorder %v5605_v38, 0.0  ;;  %vm873_vm13 = vcmp.gt.f32.partialorder %v5493_v48, 0.0  ;;  %vm886_vm1 = vcmp.gt.f32.partialorder %v5596_v9, 0.0 }
 0x1c9   : > { %2086 = vmatprep.mubr.bf16.mxu0 %v1988_v55  ;;  %3222 = vmatprep.subr.msk.bf16.mxu1 %vm3221_vm5, %v3869_v2  ;;  %v1012_v6 = vsel %vm892_vm14, %v5605_v38, %v3034_v57  ;;  %v993_v8 = vsel %vm873_vm13, %v5493_v48, %v3015_v15  ;;  %v1006_v23 = vsel %vm886_vm1, %v5596_v9, %v3028_v13  ;;  %vm891_vm0 = vcmp.gt.f32.partialorder %v5624_v62, 0.0  ;;  %v3780_v15 = vld [vmem:[%s6272_s3 + $0x4] ss:$16 sps:$4 sm:$0xff]  }
 0x1ca   : > { %2087 = vmatmul.mubr.bf16.gmra.mxu0 %v1987_v26  ;;  %v3835_v39 = vpop.eup %3834  ;;  %v1983_v24 = vpack.c.bf16 %v999_v14, %v993_v8  ;;  %v1990_v28 = vpack.c.bf16 %v1012_v6, %v1006_v23  ;;  %vm885_vm12 = vcmp.gt.f32.partialorder %v5638_v17, 0.0  ;;  %v3783_v26 = vld [vmem:[%s6272_s3 + $0xc] ss:$16 sps:$4 sm:$0xff]   ;;  %vm6615_vm2 = vcmask 785408   ;;  %v2631_v13 = vld [vmem:[%s6273_s4] sm:$0xff]  ;;  %v2633_v14 = vld [vmem:[%s6273_s4 + $0x10] sm:$0xff] }
 0x1cb   : > { %v3033_v45 = vadd.f32 -1.0, %v3835_v39  ;;  %2731 = vmatprep.mubr.bf16.mxu0 %v3780_v15  ;;  %v2632_v39 = vld [vmem:[%s6273_s4 + $0x8] sm:$0xff]  ;;  %v2634_v8 = vld [vmem:[%s6273_s4 + $0x18] sm:$0xff]  ;;  %vm2232_vm8 = vcmask 1022976   ;;  %vm2203_vm7 = vcmask 1031168   ;;  %vm2463_vm11 = vcmask 957440  }
 0x1cc   : > { %3224 = vmatpush2.bf16.msk.msra.mxu1 %vm3223_vm4, %v3869_v2  ;;  %vm2174_vm10 = vcmask 1039360   ;;  %vm2434_vm3 = vcmask 965632   ;;  %vm2405_vm15 = vcmask 973824   ;;  %vm2348_vm9 = vcmask 990208  }
 0x1cd   : > { %v3837_v21 = vpop.eup %3836  ;;  %v1011_v29 = vsel %vm891_vm0, %v5624_v62, %v3033_v45  ;;  %vm2319_vm5 = vcmask 998400   ;;  %vm2550_vm6 = vcmask 932864   ;;  %vm6616_vm4 = vcmask 982016  }
 0x1ce   : > { %v3027_v0 = vadd.f32 -1.0, %v3837_v21  ;;  %vm6617_vm14 = vmmov %vm6616_vm4  ;;  %vm2290_vm1 = vcmask 1006592  }
 0x1cf   : > { %2130 = vmatmul.mubr.bf16.vlgmr.msra.gmra.mxu1 %v1983_v24  ;;  %vm6618_vm13 = vmmov %vm6616_vm4 }
 0x1d0   : > { %2139 = vmatprep.mubr.bf16.mxu1 %v1990_v28  ;;  %v1005_v48 = vsel %vm885_vm12, %v5638_v17, %v3027_v0  ;;  %vm6619_vm0 = vmmov %vm6616_vm4  ;;  %vm2521_vm12 = vcmask 941056  }
 0x1d1   : > { %v1989_v38 = vpack.c.bf16 %v1011_v29, %v1005_v48 }
 0x1d7   : > { %2140 = vmatmul.mubr.bf16.gmra.mxu1 %v1989_v38 }
 0x1d8   : > { %3233 = vmatprep.mubr.msk.bf16.mxu1 %vm6615_vm2, %v3783_v26  ;;  %vm2261_vm2 = vcmask 1014784  }
 0x253   : > { %v2025_v2 = vpop.f32.mrf.mxu1 }
 0x255   : > { %v2027_v47 = vpop.f32.mrf.mxu1 }
 0x257   : > { %v2029_v27 = vpop.f32.mrf.mxu1 }
 0x259   : > { %v2031_v7 = vpop.f32.mrf.mxu1 }
 0x25b   : > { %v2035_v36 = vpop.f32.mrf.mxu1 }
 0x25d   : > { %v2037_v5 = vpop.f32.mrf.mxu1 }
 0x25f   : > { %v2039_v33 = vpop.f32.mrf.mxu1 }
 0x261   : > { %v2041_v35 = vpop.f32.mrf.mxu1 }
 0x281   : > { %v2078_v9 = vpop.f32.mrf.mxu0 }
 0x282   : > { %v2079_v61 = vadd.f32 %v2078_v9, %v2025_v2 }
 0x283   : > { %v2080_v54 = vpop.f32.mrf.mxu0 }
 0x284   : > { %v2081_v20 = vadd.f32 %v2080_v54, %v2027_v47 }
 0x285   : > { %v2082_v58 = vpop.f32.mrf.mxu0 }
 0x286   : > { %v2083_v31 = vadd.f32 %v2082_v58, %v2029_v27 }
 0x287   : > { %v2084_v43 = vpop.f32.mrf.mxu0 }
 0x288   : > { %v2085_v25 = vadd.f32 %v2084_v43, %v2031_v7 }
 0x28a   : > { %v2088_v16 = vpop.f32.mrf.mxu0 }
 0x28b   : > { %v2089_v63 = vadd.f32 %v2088_v16, %v2035_v36 }
 0x28c   : > { %v2090_v3 = vpop.f32.mrf.mxu0 }
 0x28d   : > { %v2091_v52 = vadd.f32 %v2090_v3, %v2037_v5 }
 0x28e   : > { %v2092_v10 = vpop.f32.mrf.mxu0 }
 0x28f   : > { %v2131_v62 = vpop.f32.mrf.mxu1  ;;  %v2093_v19 = vadd.f32 %v2092_v10, %v2039_v33 }
 0x290   : > { %v5843_v17 = vadd.f32 %v2131_v62, %v2079_v61  ;;  %v2094_v30 = vpop.f32.mrf.mxu0 }
 0x291   : > { %v2133_v18 = vpop.f32.mrf.mxu1  ;;  %v2095_v12 = vadd.f32 %v2094_v30, %v2041_v35 }
 0x292   : > { %v5845_v32 = vadd.f32 %v2133_v18, %v2081_v20 }
 0x293   : > { %v2135_v40 = vpop.f32.mrf.mxu1 }
 0x294   : > { %v5849_v34 = vpack.i.bf16 %v5845_v32, %v5843_v17  ;;  %v5851_v46 = vadd.f32 %v2135_v40, %v2083_v31 }
 0x295   : > { %v2137_v41 = vpop.f32.mrf.mxu1 }
 0x296   : > { %v5853_v4 = vadd.f32 %v2137_v41, %v2085_v25  ;;  %3497 = vrot.lane.b32.xlu1 %v5849_v34, %s3870_s27  ;;  %v2571_v55 = vpack.c.bf16 %v5851_v46, %v5843_v17 }
 0x297   : > { %v2141_v49 = vpop.f32.mrf.mxu1 }
 0x298   : > { %v5859_v51 = vpack.i.bf16 %v5853_v4, %v5851_v46  ;;  %v5879_v44 = vadd.f32 %v2141_v49, %v2089_v63  ;;  %v2572_v1 = vpack.c.bf16 %v5853_v4, %v5845_v32 }
 0x299   : > { %v2143_v42 = vpop.f32.mrf.mxu1 }
 0x29a   : > { %3552 = vrot.lane.b32.xlu0 %v5859_v51, %s3870_s27  ;;  %3502 = vrot.lane.b32.xlu1 %v5849_v34, %s3871_s28  ;;  %v5873_v56 = vadd.f32 %v2143_v42, %v2091_v52 }
 0x29b   : > { %v2145_v50 = vpop.f32.mrf.mxu1 }
 0x29c   : > { %v5871_v60 = vadd.f32 %v2145_v50, %v2093_v19  ;;  %v3606_v37 = vpack.i.bf16 %v5873_v56, %v5879_v44 }
 0x29d   : > { %v2147_v22 = vpop.f32.mrf.mxu1 }
 0x29e   : > { %3557 = vrot.lane.b32.xlu0 %v5859_v51, %s3871_s28  ;;  %3507 = vrot.lane.b32.xlu1 %v5849_v34, %s3872_s29  ;;  %v5869_v59 = vadd.f32 %v2147_v22, %v2095_v12  ;;  %v2573_v11 = vpack.c.bf16 %v5871_v60, %v5879_v44 }
 0x2a0   : > { %v2574_v53 = vpack.c.bf16 %v5869_v59, %v5873_v56  ;;  %v3671_v57 = vpack.i.bf16 %v5869_v59, %v5871_v60 }
 0x2a2   : > { %3562 = vrot.lane.b32.xlu0 %v5859_v51, %s3872_s29  ;;  %3512 = vrot.lane.b32.xlu1 %v5849_v34, %s3873_s30 }
 0x2a6   : > { %3567 = vrot.lane.b32.xlu0 %v5859_v51, %s3873_s30  ;;  %3517 = vrot.lane.b32.xlu1 %v5849_v34, %s3874_s8 }
 0x2aa   : > { %3572 = vrot.lane.b32.xlu0 %v5859_v51, %s3874_s8  ;;  %3522 = vrot.lane.b32.xlu1 %v5849_v34, %s3875_s9 }
 0x2ae   : > { %3577 = vrot.lane.b32.xlu0 %v5859_v51, %s3875_s9  ;;  %3527 = vrot.lane.b32.xlu1 %v5849_v34, %s3876_s10 }
 0x2b2   : > { %3582 = vrot.lane.b32.xlu0 %v5859_v51, %s3876_s10  ;;  %3532 = vrot.lane.b32.xlu1 %v5849_v34, %s3867_s12 }
 0x2b6   : > { %3587 = vrot.lane.b32.xlu0 %v5859_v51, %s3867_s12  ;;  %3537 = vrot.lane.b32.xlu1 %v5849_v34, %s3877_s11 }
 0x2ba   : > { %3592 = vrot.lane.b32.xlu0 %v5859_v51, %s3877_s11  ;;  %3542 = vrot.lane.b32.xlu1 %v5849_v34, %s3878_s13 }
 0x2be   : > { %3597 = vrot.lane.b32.xlu0 %v5859_v51, %s3878_s13  ;;  %3547 = vrot.lane.b32.xlu1 %v5849_v34, %s3879_s14 }
 0x2c2   : > { %3602 = vrot.lane.b32.xlu0 %v5859_v51, %s3879_s14  ;;  %3607 = vrot.lane.b32.xlu1 %v3606_v37, %s3870_s27 }
 0x2c6   : > { %3612 = vrot.lane.b32.xlu1 %v5849_v34, %s3880_s15  ;;  %3672 = vrot.lane.b32.xlu0 %v3671_v57, %s3870_s27 }
 0x2ca   : > { %3617 = vrot.lane.b32.xlu1 %v3606_v37, %s3871_s28  ;;  %3677 = vrot.lane.b32.xlu0 %v5859_v51, %s3880_s15 }
 0x2ce   : > { %3622 = vrot.lane.b32.xlu1 %v3606_v37, %s3872_s29  ;;  %3697 = vrot.lane.b32.xlu0 %v3671_v57, %s3871_s28 }
 0x2d2   : > { %3627 = vrot.lane.b32.xlu1 %v3606_v37, %s3873_s30  ;;  %3702 = vrot.lane.b32.xlu0 %v3671_v57, %s3872_s29 }
 0x2d6   : > { %3632 = vrot.lane.b32.xlu1 %v3606_v37, %s3874_s8  ;;  %3707 = vrot.lane.b32.xlu0 %v3671_v57, %s3873_s30 }
 0x2da   : > { %3637 = vrot.lane.b32.xlu1 %v3606_v37, %s3875_s9  ;;  %3712 = vrot.lane.b32.xlu0 %v3671_v57, %s3874_s8 }
 0x2de   : > { %3642 = vrot.lane.b32.xlu1 %v3606_v37, %s3876_s10  ;;  %3717 = vrot.lane.b32.xlu0 %v5859_v51, %s3881_s16 }
 0x2e2   : > { %3647 = vrot.lane.b32.xlu1 %v3606_v37, %s3867_s12  ;;  %3727 = vrot.lane.b32.xlu0 %v3671_v57, %s3875_s9 }
 0x2e6   : > { %3652 = vrot.lane.b32.xlu1 %v3606_v37, %s3877_s11  ;;  %3732 = vrot.lane.b32.xlu0 %v3671_v57, %s3876_s10  ;;  %s3002_s10 = sshll.u32 %s6622_s25, 3 }
 0x2ea   : > { %3657 = vrot.lane.b32.xlu1 %v3606_v37, %s3878_s13  ;;  %3737 = vrot.lane.b32.xlu0 %v3671_v57, %s3867_s12 }
 0x2ee   : > { %3662 = vrot.lane.b32.xlu1 %v3606_v37, %s3879_s14  ;;  %3742 = vrot.lane.b32.xlu0 %v3671_v57, %s3877_s11 }
 0x2f2   : > { %3667 = vrot.lane.b32.xlu1 %v3606_v37, %s3880_s15  ;;  %3747 = vrot.lane.b32.xlu0 %v3671_v57, %s3878_s13 }
 0x2f6   : > { %3682 = vrot.lane.b32.xlu1 %v3606_v37, %s3881_s16  ;;  %3752 = vrot.lane.b32.xlu0 %v3671_v57, %s3879_s14  ;;  %s6255_s14 = scalar_lea.vmem %s6276_s7, %s3002_s10 }
 0x2fa   : > { %3687 = vrot.lane.b32.xlu1 %v3606_v37, %s3882_s17  ;;  %3757 = vrot.lane.b32.xlu0 %v3671_v57, %s3880_s15 }
 0x2fe   : > { %3692 = vrot.lane.b32.xlu1 %v5849_v34, %s3881_s16  ;;  %3762 = vrot.lane.b32.xlu0 %v3671_v57, %s3881_s16 }
 0x302   : > { %3722 = vrot.lane.b32.xlu1 %v5849_v34, %s3882_s17  ;;  %3767 = vrot.lane.b32.xlu0 %v3671_v57, %s3882_s17 }
 0x306   : > { %2637 = vperm.xlu1 %3495, %v2631_v13   ;;  %3772 = vrot.lane.b32.xlu0 %v5859_v51, %s3882_s17 }
 0x308   : > { %v3498_v6 = vpop.permute.xlu1 %3497 }
 0x309   : > { %v3500_v34 = vunpack.i.h.bf16 %v3498_v6  ;;  %v3499_v41 = vunpack.i.l.bf16 %v3498_v6 }
 0x30a   : > { %2647 = vperm.xlu1 %3495, %v2633_v14   ;;  %2642 = vperm.xlu0 %3494, %v2632_v39  }
 0x30b   : > { %v2233_v63 = vsel %vm2232_vm8, %v3499_v41, %v3500_v34 }
 0x30c   : > { %v3553_v21 = vpop.permute.xlu0 %3552  ;;  %v5974_v24 = vpop.permute.xlu1 %3502 }
 0x30d   : > { %v3555_v3 = vunpack.i.h.bf16 %v3553_v21  ;;  %v3554_v40 = vunpack.i.l.bf16 %v3553_v21  ;;  %v3505_v6 = vunpack.i.h.bf16 %v5974_v24 }
 0x30e   : > { %2652 = vperm.xlu0 %3494, %v2634_v8   ;;  %v3504_v8 = vunpack.i.l.bf16 %v5974_v24 }
 0x30f   : > { %v2234_v22 = vsel %vm2232_vm8, %v3554_v40, %v3555_v3  ;;  %v2584_v12 = vpack.c.bf16 %v3555_v3, %v3500_v34 }
 0x310   : > { %v5976_v23 = vpop.permute.xlu0 %3557  ;;  %v5978_v28 = vpop.permute.xlu1 %3507  ;;  %v2583_v37 = vpack.c.bf16 %v2234_v22, %v2233_v63  ;;  %v2204_v22 = vsel %vm2203_vm7, %v3504_v8, %v3505_v6 }
 0x311   : > { %v3560_v57 = vunpack.i.h.bf16 %v5976_v23  ;;  %v3559_v15 = vunpack.i.l.bf16 %v5976_v23 }
 0x313   : > { %v2205_v23 = vsel %vm2203_vm7, %v3559_v15, %v3560_v57  ;;  %v2580_v3 = vpack.c.bf16 %v3560_v57, %v3505_v6 }
 0x314   : > { %v5980_v45 = vpop.permute.xlu0 %3562  ;;  %v5982_v0 = vpop.permute.xlu1 %3512  ;;  %v2579_v63 = vpack.c.bf16 %v2205_v23, %v2204_v22 }
 0x315   : > { %v3565_v34 = vunpack.i.h.bf16 %v5980_v45  ;;  %v3564_v24 = vunpack.i.l.bf16 %v5980_v45  ;;  %v3515_v8 = vunpack.i.h.bf16 %v5982_v0 }
 0x318   : > { %v5984_v29 = vpop.permute.xlu0 %3567  ;;  %v5986_v48 = vpop.permute.xlu1 %3517 }
 0x319   : > { %v3570_v45 = vunpack.i.h.bf16 %v5984_v29 }
 0x31c   : > { %v5988_v38 = vpop.permute.xlu0 %3572  ;;  %v5990_v2 = vpop.permute.xlu1 %3522 }
 0x320   : > { %v5992_v47 = vpop.permute.xlu0 %3577  ;;  %v5994_v27 = vpop.permute.xlu1 %3527 }
 0x321   : > { %v3529_v32 = vunpack.i.l.bf16 %v5994_v27 }
 0x324   : > { %v5996_v7 = vpop.permute.xlu0 %3582  ;;  %v5998_v9 = vpop.permute.xlu1 %3532 }
 0x325   : > { %v3585_v60 = vunpack.i.h.bf16 %v5996_v7  ;;  %v3584_v44 = vunpack.i.l.bf16 %v5996_v7 }
 0x327   : > { %v2350_v17 = vsel %vm2348_vm9, %v3584_v44, %v3585_v60 }
 0x328   : > { %v6000_v36 = vpop.permute.xlu0 %3587  ;;  %v6002_v54 = vpop.permute.xlu1 %3537 }
 0x32c   : > { %v6004_v5 = vpop.permute.xlu0 %3592  ;;  %v6006_v58 = vpop.permute.xlu1 %3542 }
 0x330   : > { %v6008_v33 = vpop.permute.xlu0 %3597  ;;  %v6010_v43 = vpop.permute.xlu1 %3547 }
 0x334   : > { %v6012_v35 = vpop.permute.xlu0 %3602  ;;  %v3608_v16 = vpop.permute.xlu1 %3607 }
 0x335   : > { %v3610_v62 = vunpack.i.h.bf16 %v3608_v16  ;;  %v3609_v61 = vunpack.i.l.bf16 %v3608_v16 }
 0x337   : > { %v2235_v10 = vsel %vm2232_vm8, %v3609_v61, %v3610_v62 }
 0x338   : > { %v6014_v20 = vpop.permute.xlu1 %3612  ;;  %v3673_v18 = vpop.permute.xlu0 %3672 }
 0x339   : > { %v3675_v31 = vunpack.i.h.bf16 %v3673_v18  ;;  %v3674_v25 = vunpack.i.l.bf16 %v3673_v18 }
 0x33b   : > { %v2586_v49 = vpack.c.bf16 %v3675_v31, %v3610_v62  ;;  %v2236_v51 = vsel %vm2232_vm8, %v3674_v25, %v3675_v31  ;;  %vm2492_vm8 = vcmask 949248  }
 0x33c   : > { %v2585_v42 = vpack.c.bf16 %v2236_v51, %v2235_v10  ;;  %v3618_v30 = vpop.permute.xlu1 %3617  ;;  %v6016_v50 = vpop.permute.xlu0 %3677  ;;  %v3509_v51 = vunpack.i.l.bf16 %v5978_v28 }
 0x33d   : > { %2699 = vmatprep.subr.bf16.mxu0 %v2586_v49  ;;  %v3620_v19 = vunpack.i.h.bf16 %v3618_v30  ;;  %v3619_v52 = vunpack.i.l.bf16 %v3618_v30  ;;  %v3510_v49 = vunpack.i.h.bf16 %v5978_v28  ;;  %v2465_v28 = vsel %vm2463_vm11, %v3564_v24, %v3565_v34 }
 0x33e   : > { %2700 = vmatpush1.bf16.msra.mxu0 %v2585_v42  ;;  %v3575_v24 = vunpack.i.h.bf16 %v5988_v38 }
 0x33f   : > { %2701 = vmatprep.subr.bf16.mxu0 %v2584_v12  ;;  %v2206_v21 = vsel %vm2203_vm7, %v3619_v52, %v3620_v19  ;;  %v2464_v6 = vsel %vm2463_vm11, %v3509_v51, %v3510_v49  ;;  %v3520_v51 = vunpack.i.h.bf16 %v5986_v48 }
 0x340   : > { %v3623_v26 = vpop.permute.xlu1 %3622  ;;  %v3698_v13 = vpop.permute.xlu0 %3697  ;;  %v2615_v23 = vpack.c.bf16 %v2465_v28, %v2464_v6  ;;  %v3580_v28 = vunpack.i.h.bf16 %v5992_v47 }
 0x341   : > { %v3700_v14 = vunpack.i.h.bf16 %v3698_v13  ;;  %v3699_v39 = vunpack.i.l.bf16 %v3698_v13  ;;  %v3625_v16 = vunpack.i.h.bf16 %v3623_v26  ;;  %v3624_v62 = vunpack.i.l.bf16 %v3623_v26 }
 0x342   : > { %2702 = vmatpush1.bf16.msra.mxu0 %v2583_v37  ;;  %v3569_v37 = vunpack.i.l.bf16 %v5984_v29  ;;  %v2616_v13 = vpack.c.bf16 %v3565_v34, %v3510_v49 }
 0x343   : > { %v2582_v61 = vpack.c.bf16 %v3700_v14, %v3620_v19  ;;  %v2207_v18 = vsel %vm2203_vm7, %v3699_v39, %v3700_v14  ;;  %v2466_v12 = vsel %vm2463_vm11, %v3624_v62, %v3625_v16  ;;  %vm6620_vm7 = vcmask 785408  }
 0x344   : > { %v2581_v40 = vpack.c.bf16 %v2207_v18, %v2206_v21  ;;  %v3628_v31 = vpop.permute.xlu1 %3627  ;;  %v3703_v25 = vpop.permute.xlu0 %3702  ;;  %v3514_v21 = vunpack.i.l.bf16 %v5982_v0  ;;  %v3574_v0 = vunpack.i.l.bf16 %v5988_v38 }
 0x345   : > { %v3705_v41 = vunpack.i.h.bf16 %v3703_v25  ;;  %v3704_v10 = vunpack.i.l.bf16 %v3703_v25  ;;  %2703 = vmatprep.subr.bf16.mxu0 %v2582_v61  ;;  %v3630_v42 = vunpack.i.h.bf16 %v3628_v31  ;;  %v3629_v30 = vunpack.i.l.bf16 %v3628_v31 }
 0x346   : > { %2704 = vmatpush1.bf16.msra.mxu0 %v2581_v40  ;;  %v2576_v40 = vpack.c.bf16 %v3570_v45, %v3515_v8  ;;  %v2175_v49 = vsel %vm2174_vm10, %v3514_v21, %v3515_v8  ;;  %v3525_v21 = vunpack.i.h.bf16 %v5990_v2 }
 0x347   : > { %v2618_v19 = vpack.c.bf16 %v3705_v41, %v3625_v16  ;;  %v2467_v52 = vsel %vm2463_vm11, %v3704_v10, %v3705_v41  ;;  %2705 = vmatprep.subr.bf16.mxu0 %v2580_v3  ;;  %v2177_v16 = vsel %vm2174_vm10, %v3629_v30, %v3630_v42  ;;  %v2176_v3 = vsel %vm2174_vm10, %v3569_v37, %v3570_v45 }
 0x348   : > { %v2617_v57 = vpack.c.bf16 %v2467_v52, %v2466_v12  ;;  %v3633_v15 = vpop.permute.xlu1 %3632  ;;  %v3708_v26 = vpop.permute.xlu0 %3707  ;;  %v2436_v45 = vsel %vm2434_vm3, %v3574_v0, %v3575_v24  ;;  %v2612_v37 = vpack.c.bf16 %v3575_v24, %v3520_v51  ;;  %v3590_v0 = vunpack.i.h.bf16 %v6000_v36 }
 0x349   : > { %v3710_v14 = vunpack.i.h.bf16 %v3708_v26  ;;  %v3709_v39 = vunpack.i.l.bf16 %v3708_v26  ;;  %2752 = vmatprep.subr.bf16.mxu1 %v2618_v19  ;;  %v3635_v29 = vunpack.i.h.bf16 %v3633_v15  ;;  %v3634_v62 = vunpack.i.l.bf16 %v3633_v15 }
 0x34a   : > { %2706 = vmatpush1.bf16.msra.mxu0 %v2579_v63  ;;  %2753 = vmatpush1.bf16.msra.mxu1 %v2617_v57  ;;  %v2575_v19 = vpack.c.bf16 %v2176_v3, %v2175_v49 }
 0x34b   : > { %v2578_v61 = vpack.c.bf16 %v3710_v14, %v3630_v42  ;;  %v2178_v18 = vsel %vm2174_vm10, %v3709_v39, %v3710_v14  ;;  %2754 = vmatprep.subr.bf16.mxu1 %v2616_v13  ;;  %v3519_v42 = vunpack.i.l.bf16 %v5986_v48  ;;  %v2437_v30 = vsel %vm2434_vm3, %v3634_v62, %v3635_v29 }
 0x34c   : > { %v2577_v31 = vpack.c.bf16 %v2178_v18, %v2177_v16  ;;  %v3638_v25 = vpop.permute.xlu1 %3637  ;;  %v3713_v34 = vpop.permute.xlu0 %3712  ;;  %v3579_v13 = vunpack.i.l.bf16 %v5992_v47  ;;  %v3524_v16 = vunpack.i.l.bf16 %v5990_v2 }
 0x34d   : > { %v3715_v41 = vunpack.i.h.bf16 %v3713_v34  ;;  %v3714_v10 = vunpack.i.l.bf16 %v3713_v34  ;;  %2707 = vmatprep.subr.bf16.mxu0 %v2578_v61  ;;  %v3640_v57 = vunpack.i.h.bf16 %v3638_v25  ;;  %v3639_v15 = vunpack.i.l.bf16 %v3638_v25 }
 0x34e   : > { %2708 = vmatpush1.bf16.msra.mxu0 %v2577_v31  ;;  %2755 = vmatpush1.bf16.msra.mxu1 %v2615_v23  ;;  %v2435_v48 = vsel %vm2434_vm3, %v3519_v42, %v3520_v51  ;;  %v2407_v62 = vsel %vm2405_vm15, %v3579_v13, %v3580_v28  ;;  %v2608_v61 = vpack.c.bf16 %v3580_v28, %v3525_v21  ;;  %v3594_v28 = vunpack.i.l.bf16 %v6004_v5 }
 0x34f   : > { %v2614_v22 = vpack.c.bf16 %v3715_v41, %v3635_v29  ;;  %v2438_v12 = vsel %vm2434_vm3, %v3714_v10, %v3715_v41  ;;  %2709 = vmatprep.subr.bf16.mxu0 %v2576_v40  ;;  %v2611_v26 = vpack.c.bf16 %v2436_v45, %v2435_v48  ;;  %v2408_v29 = vsel %vm2405_vm15, %v3639_v15, %v3640_v57 }
 0x350   : > { %v2613_v38 = vpack.c.bf16 %v2438_v12, %v2437_v30  ;;  %v3643_v52 = vpop.permute.xlu1 %3642  ;;  %v6048_v63 = vpop.permute.xlu0 %3717  ;;  %v3530_v40 = vunpack.i.h.bf16 %v5994_v27  ;;  %v2406_v31 = vsel %vm2405_vm15, %v3524_v16, %v3525_v21  ;;  %v3589_v27 = vunpack.i.l.bf16 %v6000_v36 }
 0x351   : > { %2756 = vmatprep.subr.bf16.mxu1 %v2614_v22  ;;  %v3645_v59 = vunpack.i.h.bf16 %v3643_v52  ;;  %v3644_v56 = vunpack.i.l.bf16 %v3643_v52  ;;  %v2607_v24 = vpack.c.bf16 %v2407_v62, %v2406_v31  ;;  %v3535_v30 = vunpack.i.h.bf16 %v5998_v9 }
 0x352   : > { %2710 = vmatpush1.bf16.msra.mxu0 %v2575_v19  ;;  %2757 = vmatpush1.bf16.msra.mxu1 %v2613_v38  ;;  %v2600_v46 = vpack.c.bf16 %v3585_v60, %v3530_v40  ;;  %v2349_v42 = vsel %vm2348_vm9, %v3529_v32, %v3530_v40  ;;  %v3534_v22 = vunpack.i.l.bf16 %v5998_v9  ;;  %vm2869_vm3 = vcmask 523264  }
 0x353   : > { %2711 = vmatprep.subr.bf16.mxu0 %v2574_v53  ;;  %2758 = vmatprep.subr.bf16.mxu1 %v2612_v37  ;;  %v2351_v25 = vsel %vm2348_vm9, %v3644_v56, %v3645_v59  ;;  %v2599_v45 = vpack.c.bf16 %v2350_v17, %v2349_v42  ;;  %v2378_v37 = vsel %vm6618_vm13, %v3589_v27, %v3590_v0  ;;  %v3604_v27 = vunpack.i.l.bf16 %v6012_v35 }
 0x354   : > { %v3648_v14 = vpop.permute.xlu1 %3647  ;;  %v3728_v39 = vpop.permute.xlu0 %3727  ;;  %v2377_v16 = vsel %vm6619_vm0, %v3534_v22, %v3535_v30  ;;  %v3549_v17 = vunpack.i.l.bf16 %v6010_v43  ;;  %vm2919_vm13 = vcmask 7168   ;;  %vm2941_vm0 = vcmask 8192  }
 0x355   : > { %v3730_v6 = vunpack.i.h.bf16 %v3728_v39  ;;  %v3729_v8 = vunpack.i.l.bf16 %v3728_v39  ;;  %v3650_v4 = vunpack.i.h.bf16 %v3648_v14  ;;  %v3540_v39 = vunpack.i.h.bf16 %v6002_v54 }
 0x356   : > { %2712 = vmatpush1.bf16.msra.mxu0 %v2573_v11  ;;  %2759 = vmatpush1.bf16.msra.mxu1 %v2611_v26  ;;  %v3595_v26 = vunpack.i.h.bf16 %v6004_v5  ;;  %v2603_v56 = vpack.c.bf16 %v2378_v37, %v2377_v16 }
 0x357   : > { %v2610_v53 = vpack.c.bf16 %v3730_v6, %v3640_v57  ;;  %v2409_v47 = vsel %vm2405_vm15, %v3729_v8, %v3730_v6  ;;  %2713 = vmatprep.subr.bf16.mxu0 %v2572_v1  ;;  %v3649_v1 = vunpack.i.l.bf16 %v3648_v14  ;;  %v2604_v57 = vpack.c.bf16 %v3590_v0, %v3535_v30 }
 0x358   : > { %v2609_v2 = vpack.c.bf16 %v2409_v47, %v2408_v29  ;;  %v6068_v18 = vpop.permute.xlu1 %3652  ;;  %v3733_v23 = vpop.permute.xlu0 %3732  ;;  %v3539_v6 = vunpack.i.l.bf16 %v6002_v54  ;;  %v3599_v54 = vunpack.i.l.bf16 %v6008_v33 }
 0x359   : > { %v3735_v11 = vunpack.i.h.bf16 %v3733_v23  ;;  %v3734_v3 = vunpack.i.l.bf16 %v3733_v23  ;;  %2760 = vmatprep.subr.bf16.mxu1 %v2610_v53  ;;  %v2379_v12 = vsel %vm6616_vm4, %v3649_v1, %v3650_v4  ;;  %v3655_v36 = vunpack.i.h.bf16 %v6068_v18 }
 0x35a   : > { %2714 = vmatpush1.bf16.msra.mxu0 %v2571_v55  ;;  %2761 = vmatpush1.bf16.msra.mxu1 %v2609_v2  ;;  %v3654_v19 = vunpack.i.l.bf16 %v6068_v18  ;;  %v3600_v53 = vunpack.i.h.bf16 %v6008_v33  ;;  %v2321_v2 = vsel %vm2319_vm5, %v3594_v28, %v3595_v26  ;;  %v2596_v18 = vpack.c.bf16 %v3595_v26, %v3540_v39 }
 0x35b   : > { %v2602_v7 = vpack.c.bf16 %v3735_v11, %v3645_v59  ;;  %v2352_v34 = vsel %vm2348_vm9, %v3734_v3, %v3735_v11  ;;  %2762 = vmatprep.subr.bf16.mxu1 %v2608_v61  ;;  %v2320_v44 = vsel %vm2319_vm5, %v3539_v6, %v3540_v39  ;;  %v3545_v11 = vunpack.i.h.bf16 %v6006_v58 }
 0x35c   : > { %v2601_v41 = vpack.c.bf16 %v2352_v34, %v2351_v25  ;;  %v6082_v10 = vpop.permute.xlu1 %3657  ;;  %v3738_v49 = vpop.permute.xlu0 %3737  ;;  %v2322_v29 = vsel %vm2319_vm5, %v3654_v19, %v3655_v36  ;;  %v3544_v3 = vunpack.i.l.bf16 %v6006_v58  ;;  %v2595_v31 = vpack.c.bf16 %v2321_v2, %v2320_v44 }
 0x35d   : > { %v3740_v55 = vunpack.i.h.bf16 %v3738_v49  ;;  %v3739_v51 = vunpack.i.l.bf16 %v3738_v49  ;;  %2715 = vmatprep.subr.bf16.mxu0 %v2602_v7  ;;  %v3660_v8 = vunpack.i.h.bf16 %v6082_v10  ;;  %v3659_v21 = vunpack.i.l.bf16 %v6082_v10 }
 0x35e   : > { %2716 = vmatpush2.bf16.msra.mxu0 %v2601_v41  ;;  %2763 = vmatpush1.bf16.msra.mxu1 %v2607_v24  ;;  %v2552_v25 = vsel %vm2550_vm6, %v3599_v54, %v3600_v53  ;;  %v2628_v7 = vpack.c.bf16 %v3600_v53, %v3545_v11  ;;  %v3605_v58 = vunpack.i.h.bf16 %v6012_v35  ;;  %v3550_v49 = vunpack.i.h.bf16 %v6010_v43 }
 0x35f   : > { %v2606_v38 = vpack.c.bf16 %v3740_v55, %v3650_v4  ;;  %v2380_v52 = vsel %vm6617_vm14, %v3739_v51, %v3740_v55  ;;  %2717 = vmatprep.subr.bf16.mxu0 %v2600_v46  ;;  %v2553_v40 = vsel %vm2550_vm6, %v3659_v21, %v3660_v8  ;;  %v2551_v51 = vsel %vm2550_vm6, %v3544_v3, %v3545_v11 }
 0x360   : > { %v2605_v15 = vpack.c.bf16 %v2380_v52, %v2379_v12  ;;  %v6093_v48 = vpop.permute.xlu1 %3662  ;;  %v3743_v9 = vpop.permute.xlu0 %3742  ;;  %v2627_v22 = vpack.c.bf16 %v2552_v25, %v2551_v51  ;;  %v3680_v12 = vunpack.i.h.bf16 %v6016_v50  ;;  %v3679_v43 = vunpack.i.l.bf16 %v6016_v50 }
 0x361   : > { %v3745_v13 = vunpack.i.h.bf16 %v3743_v9  ;;  %v3744_v14 = vunpack.i.l.bf16 %v3743_v9  ;;  %2764 = vmatprep.subr.bf16.mxu1 %v2606_v38  ;;  %v3665_v33 = vunpack.i.h.bf16 %v6093_v48  ;;  %v3664_v32 = vunpack.i.l.bf16 %v6093_v48 }
 0x362   : > { %2718 = vmatpush2.bf16.msra.mxu0 %v2599_v45  ;;  %2765 = vmatpush1.bf16.msra.mxu1 %v2605_v15  ;;  %v2292_v52 = vsel %vm2290_vm1, %v3604_v27, %v3605_v58  ;;  %v2592_v45 = vpack.c.bf16 %v3605_v58, %v3550_v49  ;;  %v2291_v15 = vsel %vm2290_vm1, %v3549_v17, %v3550_v49  ;;  %v3615_v48 = vunpack.i.h.bf16 %v6014_v20  ;;  %v3784_v49 = vld [vmem:[%s6272_s3 + $0x24] ss:$16 sps:$4 sm:$0xff]  }
 0x363   : > { %v2598_v59 = vpack.c.bf16 %v3745_v13, %v3655_v36  ;;  %v2323_v5 = vsel %vm2319_vm5, %v3744_v14, %v3745_v13  ;;  %2766 = vmatprep.subr.bf16.mxu1 %v2604_v57  ;;  %v2293_v42 = vsel %vm2290_vm1, %v3664_v32, %v3665_v33  ;;  %v3614_v9 = vunpack.i.l.bf16 %v6014_v20 }
 0x364   : > { %v2597_v47 = vpack.c.bf16 %v2323_v5, %v2322_v29  ;;  %v6106_v62 = vpop.permute.xlu1 %3667  ;;  %v3748_v61 = vpop.permute.xlu0 %3747  ;;  %v2591_v39 = vpack.c.bf16 %v2292_v52, %v2291_v15  ;;  %v2624_v6 = vpack.c.bf16 %v3680_v12, %v3615_v48  ;;  %v3720_v53 = vunpack.i.h.bf16 %v6048_v63 }
 0x365   : > { %v3750_v23 = vunpack.i.h.bf16 %v3748_v61  ;;  %v3749_v60 = vunpack.i.l.bf16 %v3748_v61  ;;  %2719 = vmatprep.subr.bf16.mxu0 %v2598_v59  ;;  %v3670_v46 = vunpack.i.h.bf16 %v6106_v62  ;;  %v3669_v55 = vunpack.i.l.bf16 %v6106_v62 }
 0x366   : > { %2720 = vmatpush2.bf16.msra.mxu0 %v2597_v47  ;;  %2767 = vmatpush1.bf16.msra.mxu1 %v2603_v56  ;;  %v3719_v54 = vunpack.i.l.bf16 %v6048_v63  ;;  %v2522_v61 = vsel %vm2521_vm12, %v3614_v9, %v3615_v48 }
 0x367   : > { %v2630_v4 = vpack.c.bf16 %v3750_v23, %v3660_v8  ;;  %v2554_v1 = vsel %vm2550_vm6, %v3749_v60, %v3750_v23  ;;  %2721 = vmatprep.subr.bf16.mxu0 %v2596_v18  ;;  %v2524_v26 = vsel %vm2521_vm12, %v3669_v55, %v3670_v46  ;;  %v2523_v8 = vsel %vm2521_vm12, %v3679_v43, %v3680_v12 }
 0x368   : > { %v2629_v34 = vpack.c.bf16 %v2554_v1, %v2553_v40  ;;  %v3683_v24 = vpop.permute.xlu1 %3682  ;;  %v3753_v0 = vpop.permute.xlu0 %3752  ;;  %v2623_v60 = vpack.c.bf16 %v2523_v8, %v2522_v61 }
 0x369   : > { %v3755_v41 = vunpack.i.h.bf16 %v3753_v0  ;;  %v3754_v10 = vunpack.i.l.bf16 %v3753_v0  ;;  %2772 = vmatprep.subr.bf16.mxu1 %v2630_v4  ;;  %v3685_v50 = vunpack.i.h.bf16 %v3683_v24  ;;  %v3684_v28 = vunpack.i.l.bf16 %v3683_v24 }
 0x36a   : > { %2722 = vmatpush2.bf16.msra.mxu0 %v2595_v31  ;;  %2773 = vmatpush2.bf16.msra.mxu1 %v2629_v34  ;;  %v2263_v4 = vsel %vm2261_vm2, %v3719_v54, %v3720_v53 }
 0x36b   : > { %v2594_v30 = vpack.c.bf16 %v3755_v41, %v3665_v33  ;;  %v2294_v35 = vsel %vm2290_vm1, %v3754_v10, %v3755_v41  ;;  %2774 = vmatprep.subr.bf16.mxu1 %v2628_v7  ;;  %v2264_v2 = vsel %vm2261_vm2, %v3684_v28, %v3685_v50  ;;  %v3778_v10 = vld [vmem:[%s6272_s3] ss:$16 sps:$4 sm:$0xff]   ;;  %vm2924_vm1 = vcmask 15360  }
 0x36c   : > { %v2593_v36 = vpack.c.bf16 %v2294_v35, %v2293_v42  ;;  %v3688_v19 = vpop.permute.xlu1 %3687  ;;  %v3758_v38 = vpop.permute.xlu0 %3757  ;;  %v3781_v42 = vld [vmem:[%s6272_s3 + $0x8] ss:$16 sps:$4 sm:$0xff]   ;;  %v3786_v35 = vld [vmem:[%s6272_s3 + $0x20] ss:$16 sps:$4 sm:$0xff]  }
 0x36d   : > { %v3760_v37 = vunpack.i.h.bf16 %v3758_v38  ;;  %v3759_v57 = vunpack.i.l.bf16 %v3758_v38  ;;  %2723 = vmatprep.subr.bf16.mxu0 %v2594_v30  ;;  %v3690_v47 = vunpack.i.h.bf16 %v3688_v19  ;;  %v3689_v62 = vunpack.i.l.bf16 %v3688_v19  ;;  %v3787_v30 = vld [vmem:[%s6272_s3 + $0x2c] ss:$16 sps:$4 sm:$0xff]  }
 0x36e   : > { %2724 = vmatpush2.bf16.msra.mxu0 %v2593_v36  ;;  %2775 = vmatpush2.bf16.msra.mxu1 %v2627_v22  ;;  %v3789_v22 = vld [vmem:[%s6272_s3 + $0x28] ss:$16 sps:$4 sm:$0xff]  }
 0x36f   : > { %v2626_v13 = vpack.c.bf16 %v3760_v37, %v3670_v46  ;;  %v2525_v14 = vsel %vm2521_vm12, %v3759_v57, %v3760_v37  ;;  %2725 = vmatprep.subr.bf16.mxu0 %v2592_v45  ;;  %v2495_v1 = vsel %vm2492_vm8, %v3689_v62, %v3690_v47 }
 0x370   : > { %v2625_v21 = vpack.c.bf16 %v2525_v14, %v2524_v26  ;;  %v3693_v16 = vpop.permute.xlu1 %3692  ;;  %v3763_v29 = vpop.permute.xlu0 %3762 }
 0x371   : > { %v3695_v59 = vunpack.i.h.bf16 %v3693_v16  ;;  %v3694_v5 = vunpack.i.l.bf16 %v3693_v16  ;;  %v3765_v20 = vunpack.i.h.bf16 %v3763_v29  ;;  %v3764_v56 = vunpack.i.l.bf16 %v3763_v29  ;;  %2776 = vmatprep.subr.bf16.mxu1 %v2626_v13 }
 0x372   : > { %2726 = vmatpush2.bf16.msra.mxu0 %v2591_v39  ;;  %2777 = vmatpush2.bf16.msra.mxu1 %v2625_v21 }
 0x373   : > { %v2590_v18 = vpack.c.bf16 %v3765_v20, %v3685_v50  ;;  %v2265_v23 = vsel %vm2261_vm2, %v3764_v56, %v3765_v20  ;;  %2778 = vmatprep.subr.bf16.mxu1 %v2624_v6  ;;  %v2262_v40 = vsel %vm2261_vm2, %v3694_v5, %v3695_v59  ;;  %v2588_v33 = vpack.c.bf16 %v3720_v53, %v3695_v59 }
 0x374   : > { %v2589_v44 = vpack.c.bf16 %v2265_v23, %v2264_v2  ;;  %v3723_v11 = vpop.permute.xlu1 %3722  ;;  %v3768_v3 = vpop.permute.xlu0 %3767  ;;  %v2587_v24 = vpack.c.bf16 %v2263_v4, %v2262_v40 }
 0x375   : > { %v3770_v63 = vunpack.i.h.bf16 %v3768_v3  ;;  %v3769_v32 = vunpack.i.l.bf16 %v3768_v3  ;;  %2727 = vmatprep.subr.bf16.mxu0 %v2590_v18  ;;  %v3725_v31 = vunpack.i.h.bf16 %v3723_v11  ;;  %v3724_v25 = vunpack.i.l.bf16 %v3723_v11 }
 0x376   : > { %2728 = vmatpush2.bf16.msra.mxu0 %v2589_v44  ;;  %2779 = vmatpush2.bf16.msra.mxu1 %v2623_v60 }
 0x377   : > { %v2622_v7 = vpack.c.bf16 %v3770_v63, %v3690_v47  ;;  %v2496_v34 = vsel %vm2492_vm8, %v3769_v32, %v3770_v63  ;;  %2729 = vmatprep.subr.bf16.mxu0 %v2588_v33  ;;  %v2493_v17 = vsel %vm2492_vm8, %v3724_v25, %v3725_v31 }
 0x378   : > { %v2621_v0 = vpack.c.bf16 %v2496_v34, %v2495_v1  ;;  %v3773_v58 = vpop.permute.xlu0 %3772 }
 0x379   : > { %v3775_v27 = vunpack.i.h.bf16 %v3773_v58  ;;  %v3774_v41 = vunpack.i.l.bf16 %v3773_v58  ;;  %2780 = vmatprep.subr.bf16.mxu1 %v2622_v7 }
 0x37a   : > { %2730 = vmatpush2.bf16.msra.mxu0 %v2587_v24  ;;  %2781 = vmatpush2.bf16.msra.mxu1 %v2621_v0 }
 0x37b   : > { %v2620_v46 = vpack.c.bf16 %v3775_v27, %v3725_v31  ;;  %v2494_v55 = vsel %vm2492_vm8, %v3774_v41, %v3775_v27 }
 0x37c   : > { %v2619_v51 = vpack.c.bf16 %v2494_v55, %v2493_v17  ;;  %v2854_v17 = vld [vmem:[%s6274_s5 + $0x8] sm:$0xff] }
 0x37d   : > { %2732 = vmatmul.mubr.bf16.vlgmr.msra.gmra.mxu0 %v3778_v10  ;;  %2782 = vmatprep.subr.bf16.mxu1 %v2620_v46  ;;  %v3244_v46 = vld [vmem:[%s6274_s5 + $0x48] sm:$0xff] }
 0x37e   : > { %2783 = vmatpush2.bf16.msra.mxu1 %v2619_v51  ;;  %2741 = vmatprep.mubr.bf16.mxu0 %v3784_v49  ;;  %v3243_v51 = vld [vmem:[%s6274_s5 + $0x40] sm:$0xff] }
 0x381   : > { %2785 = vmatmul.mubr.bf16.vlgmr.msra.gmra.mxu1 %v3781_v42  ;;  %v2638_v43 = vpop.permute.xlu1 %2637  ;;  %v2853_v42 = vld [vmem:[%s6274_s5] sm:$0xff] }
 0x382   : > { %3234 = vmatprep.mubr.msk.bf16.mxu1 %vm6620_vm7, %v3787_v30 }
 0x385   : > { %2742 = vmatmul.mubr.bf16.gmra.mxu0 %v3786_v35  ;;  %v2643_v48 = vpop.permute.xlu0 %2642  ;;  %v2648_v29 = vpop.permute.xlu1 %2647 }
 0x389   : > { %2795 = vmatmul.mubr.bf16.gmra.mxu1 %v3789_v22  ;;  %v2653_v47 = vpop.permute.xlu0 %2652 }
 0x43d   : > { %v2733_v12 = vpop.f32.mrf.mxu0 }
 0x43e   : > { %v2734_v19 = vadd.f32 %v2733_v12, %v2638_v43 }
 0x43f   : > { %v2735_v36 = vpop.f32.mrf.mxu0 }
 0x440   : > { %v2736_v45 = vadd.f32 %v2735_v36, %v2638_v43 }
 0x441   : > { %v2737_v38 = vpop.f32.mrf.mxu0  ;;  %v2786_v52 = vpop.f32.mrf.mxu1 }
 0x442   : > { %v2787_v37 = vadd.f32 %v2786_v52, %v2734_v19  ;;  %v2738_v50 = vadd.f32 %v2737_v38, %v2643_v48  ;;  %v2856_v38 = vld [vmem:[%s6274_s5 + $0x18] sm:$0xff] }
 0x443   : > { %v2739_v57 = vpop.f32.mrf.mxu0  ;;  %v2788_v15 = vpop.f32.mrf.mxu1  ;;  %v3246_v52 = vld [vmem:[%s6274_s5 + $0x58] sm:$0xff] }
 0x444   : > { %v2813_v9 = vmin.f32 %v2787_v37, 0.0  ;;  %v2789_v26 = vadd.f32 %v2788_v15, %v2736_v45  ;;  %v2740_v39 = vadd.f32 %v2739_v57, %v2643_v48  ;;  %vm2805_vm11 = vcmp.gt.f32.partialorder %v2787_v37, 0.0 }
 0x445   : > { %v2743_v28 = vpop.f32.mrf.mxu0  ;;  %v2790_v13 = vpop.f32.mrf.mxu1 }
 0x446   : > { %v2821_v14 = vmul.f32 1.442695, %v2813_v9  ;;  %v2814_v6 = vmin.f32 %v2789_v26, 0.0  ;;  %v6165_v8 = vadd.f32 %v2790_v13, %v2738_v50  ;;  %v2744_v20 = vadd.f32 %v2743_v28, %v2648_v29  ;;  %v2855_v9 = vld [vmem:[%s6274_s5 + $0x10] sm:$0xff] }
 0x447   : > { %v2745_v21 = vpop.f32.mrf.mxu0  ;;  %v2792_v16 = vpop.f32.mrf.mxu1  ;;  %vm2806_vm10 = vcmp.gt.f32.partialorder %v2789_v26, 0.0 }
 0x448   : > { %3838 = vpow2.f32 %v2821_v14  ;;  %v2823_v59 = vmul.f32 1.442695, %v2814_v6  ;;  %v6167_v5 = vadd.f32 %v2792_v16, %v2740_v39  ;;  %v2815_v56 = vmin.f32 %v6165_v8, 0.0 }
 0x449   : > { %v2747_v53 = vpop.f32.mrf.mxu0  ;;  %v2796_v54 = vpop.f32.mrf.mxu1  ;;  %v2746_v62 = vadd.f32 %v2745_v21, %v2648_v29  ;;  %vm2807_vm15 = vcmp.gt.f32.partialorder %v6165_v8, 0.0  ;;  %v2858_v29 = vld [vmem:[%s6274_s5 + $0x28] sm:$0xff] }
 0x44a   : > { %3840 = vpow2.f32 %v2823_v59  ;;  %v2816_v61 = vmin.f32 %v6167_v5, 0.0  ;;  %v2825_v2 = vmul.f32 1.442695, %v2815_v56  ;;  %v6171_v18 = vadd.f32 %v2796_v54, %v2744_v20  ;;  %v3248_v59 = vld [vmem:[%s6274_s5 + $0x68] sm:$0xff] }
 0x44b   : > { %v2749_v23 = vpop.f32.mrf.mxu0  ;;  %v2798_v60 = vpop.f32.mrf.mxu1  ;;  %v2748_v11 = vadd.f32 %v2747_v53, %v2653_v47  ;;  %vm2808_vm9 = vcmp.gt.f32.partialorder %v6167_v5, 0.0 }
 0x44c   : > { %v2827_v44 = vmul.f32 1.442695, %v2816_v61  ;;  %v6173_v3 = vadd.f32 %v2798_v60, %v2746_v62  ;;  %3842 = vpow2.f32 %v2825_v2  ;;  %v2817_v40 = vmin.f32 %v6171_v18, 0.0  ;;  %v2857_v62 = vld [vmem:[%s6274_s5 + $0x20] sm:$0xff] }
 0x44d   : > { %v2800_v33 = vpop.f32.mrf.mxu1  ;;  %v2750_v63 = vadd.f32 %v2749_v23, %v2653_v47  ;;  %vm2809_vm5 = vcmp.gt.f32.partialorder %v6171_v18, 0.0  ;;  %v3247_v61 = vld [vmem:[%s6274_s5 + $0x60] sm:$0xff] }
 0x44e   : > { %3844 = vpow2.f32 %v2827_v44  ;;  %v2818_v32 = vmin.f32 %v6173_v3, 0.0  ;;  %v6177_v4 = vadd.f32 %v2800_v33, %v2748_v11  ;;  %v2829_v1 = vmul.f32 1.442695, %v2817_v40 }
 0x44f   : > { %v2802_v31 = vpop.f32.mrf.mxu1  ;;  %vm2810_vm6 = vcmp.gt.f32.partialorder %v6173_v3, 0.0 }
 0x450   : > { %v2831_v25 = vmul.f32 1.442695, %v2818_v32  ;;  %v2819_v7 = vmin.f32 %v6177_v4, 0.0  ;;  %v6180_v34 = vadd.f32 %v2802_v31, %v2750_v63  ;;  %3846 = vpow2.f32 %v2829_v1  ;;  %v2860_v63 = vld [vmem:[%s6274_s5 + $0x38] sm:$0xff] }
 0x451   : > { %vm2811_vm4 = vcmp.gt.f32.partialorder %v6177_v4, 0.0  ;;  %v3250_v32 = vld [vmem:[%s6274_s5 + $0x78] sm:$0xff] }
 0x452   : > { %3848 = vpow2.f32 %v2831_v25  ;;  %v2833_v24 = vmul.f32 1.442695, %v2819_v7  ;;  %v2820_v0 = vmin.f32 %v6180_v34, 0.0  ;;  %vm2812_vm14 = vcmp.gt.f32.partialorder %v6180_v34, 0.0 }
 0x454   : > { %3850 = vpow2.f32 %v2833_v24  ;;  %v2835_v58 = vmul.f32 1.442695, %v2820_v0  ;;  %v2859_v24 = vld [vmem:[%s6274_s5 + $0x30] sm:$0xff] }
 0x455   : > { %v3839_v27 = vpop.eup %3838  ;;  %v3249_v0 = vld [vmem:[%s6274_s5 + $0x70] sm:$0xff] }
 0x456   : > { %v3235_v41 = vadd.f32 -1.0, %v3839_v27  ;;  %3852 = vpow2.f32 %v2835_v58 }
 0x457   : > { %v3841_v10 = vpop.eup %3840 }
 0x458   : > { %v3236_v49 = vadd.f32 -1.0, %v3841_v10  ;;  %v2845_v55 = vsel %vm2805_vm11, %v2787_v37, %v3235_v41 }
 0x459   : > { %v3843_v30 = vpop.eup %3842  ;;  %v2895_v45 = vmul.f32 %v3243_v51, %v2845_v55  ;;  %v2861_v37 = vmul.f32 %v2853_v42, %v2845_v55 }
 0x45a   : > { %v2846_v35 = vsel %vm2806_vm10, %v2789_v26, %v3236_v49  ;;  %v3237_v36 = vadd.f32 -1.0, %v3843_v30  ;;  %v3245_v26 = vld [vmem:[%s6274_s5 + $0x50] sm:$0xff] }
 0x45b   : > { %v3845_v22 = vpop.eup %3844  ;;  %v2862_v12 = vmul.f32 %v2854_v17, %v2846_v35  ;;  %v2896_v43 = vmul.f32 %v3244_v46, %v2846_v35 }
 0x45c   : > { %v3238_v19 = vadd.f32 -1.0, %v3845_v22  ;;  %v2847_v57 = vsel %vm2807_vm15, %v6165_v8, %v3237_v36 }
 0x45d   : > { %v2903_v15 = vsel %vm2869_vm3, %v2896_v43, 0.0  ;;  %v2870_v48 = vsel %vm2869_vm3, %v2862_v12, 0.0  ;;  %v3847_v50 = vpop.eup %3846  ;;  %v2897_v20 = vmul.f32 %v3245_v26, %v2847_v57 }
 0x45e   : > { %v2848_v28 = vsel %vm2808_vm9, %v6167_v5, %v3238_v19  ;;  %v2904_v13 = vadd.f32 %v2903_v15, %v2895_v45  ;;  %v2871_v14 = vadd.f32 %v2870_v48, %v2861_v37  ;;  %v3239_v21 = vadd.f32 -1.0, %v3847_v50 }
 0x45f   : > { %v3849_v39 = vpop.eup %3848  ;;  %v2864_v6 = vmul.f32 %v2856_v38, %v2848_v28  ;;  %v2898_v8 = vmul.f32 %v3246_v52, %v2848_v28  ;;  %v2863_v5 = vmul.f32 %v2855_v9, %v2847_v57 }
 0x460   : > { %v3240_v16 = vadd.f32 -1.0, %v3849_v39  ;;  %2905 = vadd.xlane.f32.xlu0 %v2904_v13  ;;  %2872 = vadd.xlane.f32.xlu1 %v2871_v14  ;;  %v2849_v53 = vsel %vm2809_vm5, %v6171_v18, %v3239_v21 }
 0x461   : > { %v3851_v56 = vpop.eup %3850  ;;  %v2874_v54 = vsel %vm2869_vm3, %v2864_v6, 0.0  ;;  %v2907_v47 = vsel %vm2869_vm3, %v2898_v8, 0.0  ;;  %v2899_v1 = vmul.f32 %v3247_v61, %v2849_v53 }
 0x462   : > { %v2850_v2 = vsel %vm2810_vm6, %v6173_v3, %v3240_v16  ;;  %v3241_v23 = vadd.f32 -1.0, %v3851_v56  ;;  %v2875_v60 = vadd.f32 %v2874_v54, %v2863_v5  ;;  %v2908_v44 = vadd.f32 %v2907_v47, %v2897_v20  ;;  %v2938_v16 = vld [vmem:[%s6275_s6] sm:$0x1] }
 0x463   : > { %v3853_v18 = vpop.eup %3852  ;;  %v2866_v11 = vmul.f32 %v2858_v29, %v2850_v2  ;;  %v2900_v40 = vmul.f32 %v3248_v59, %v2850_v2  ;;  %v2865_v3 = vmul.f32 %v2857_v62, %v2849_v53 }
 0x464   : > { %v3242_v33 = vadd.f32 -1.0, %v3853_v18  ;;  %2876 = vadd.xlane.f32.xlu0 %v2875_v60  ;;  %2909 = vadd.xlane.f32.xlu1 %v2908_v44  ;;  %v2851_v31 = vsel %vm2811_vm4, %v6177_v4, %v3241_v23 }
 0x465   : > { %v2878_v25 = vsel %vm2869_vm3, %v2866_v11, 0.0  ;;  %v2911_v7 = vsel %vm2869_vm3, %v2900_v40, 0.0  ;;  %v2867_v49 = vmul.f32 %v2859_v24, %v2851_v31  ;;  %v2901_v17 = vmul.f32 %v3249_v0, %v2851_v31 }
 0x466   : > { %v2852_v58 = vsel %vm2812_vm14, %v6180_v34, %v3242_v33  ;;  %v2879_v27 = vadd.f32 %v2878_v25, %v2865_v3  ;;  %v2912_v41 = vadd.f32 %v2911_v7, %v2899_v1  ;;  %v3883_v34 = vmov 0.0  }
 0x467   : > { %v2868_v4 = vmul.f32 %v2860_v63, %v2852_v58  ;;  %v2902_v10 = vmul.f32 %v3250_v32, %v2852_v58  ;;  %2940 = vst [vmem:[%s6255_s14] sm:$0xff] %v3883_v34 }
 0x468   : > { %2880 = vadd.xlane.f32.xlu0 %v2879_v27  ;;  %2913 = vadd.xlane.f32.xlu1 %v2912_v41 }
 0x469   : > { %v2882_v46 = vsel %vm2869_vm3, %v2868_v4, 0.0  ;;  %v2915_v55 = vsel %vm2869_vm3, %v2902_v10, 0.0 }
 0x46a   : > { %v2883_v51 = vadd.f32 %v2882_v46, %v2867_v49  ;;  %v2916_v42 = vadd.f32 %v2915_v55, %v2901_v17 }
 0x46c   : > { %2884 = vadd.xlane.f32.xlu0 %v2883_v51  ;;  %2917 = vadd.xlane.f32.xlu1 %v2916_v42 }
 0x4e9   : > { %v2906_v30 = vpop.xlane.xlu0 %2905  ;;  %v2873_v35 = vpop.xlane.xlu1 %2872 }
 0x4ea   : > { %v2920_v36 = vsel %vm2919_vm13, %v2873_v35, %v2906_v30 }
 0x4eb   : > { %v2925_v37 = vsel %vm2924_vm1, %v2920_v36, 0.0 }
 0x4ed   : > { %v2877_v22 = vpop.xlane.xlu0 %2876  ;;  %v2910_v12 = vpop.xlane.xlu1 %2909 }
 0x4ee   : > { %v2921_v43 = vsel %vm2919_vm13, %v2877_v22, %v2910_v12 }
 0x4ef   : > { %v2926_v19 = vsel %vm2924_vm1, %v2921_v43, 0.0 }
 0x4f0   : > { %v2927_v15 = vadd.f32 %v2926_v19, %v2925_v37 }
 0x4f1   : > { %v2881_v38 = vpop.xlane.xlu0 %2880  ;;  %v2914_v52 = vpop.xlane.xlu1 %2913 }
 0x4f2   : > { %v2922_v45 = vsel %vm2919_vm13, %v2881_v38, %v2914_v52 }
 0x4f3   : > { %v2928_v57 = vsel %vm2924_vm1, %v2922_v45, 0.0 }
 0x4f4   : > { %v2929_v26 = vadd.f32 %v2928_v57, %v2927_v15 }
 0x4f5   : > { %v2885_v48 = vpop.xlane.xlu0 %2884  ;;  %v2918_v9 = vpop.xlane.xlu1 %2917 }
 0x4f6   : > { %v2923_v50 = vsel %vm2919_vm13, %v2885_v48, %v2918_v9 }
 0x4f7   : > { %v2930_v28 = vsel %vm2924_vm1, %v2923_v50, 0.0 }
 0x4f8   : > { %v2931_v13 = vadd.f32 %v2930_v28, %v2929_v26 }
 0x4fa   : > { %v2932_v14 = vrot.slane %v2931_v13, 4 }
 0x4fc   : > { %v2933_v39 = vadd.f32 %v2932_v14, %v2931_v13 }
 0x4fe   : > { %v2934_v6 = vrot.slane %v2933_v39, 2 }
 0x500   : > { %v2935_v8 = vadd.f32 %v2934_v6, %v2933_v39 }
 0x502   : > { %v2936_v21 = vrot.slane %v2935_v8, 1 }
 0x504   : > { %v2937_v29 = vadd.f32 %v2936_v21, %v2935_v8 }
 0x506   : > { %v2939_v59 = vadd.f32 %v2938_v16, %v2937_v29 }
 0x508   : > { %2942 = vst.msk [vmem:[%s6255_s14] sm:$0x1] %vm2941_vm0, %v2939_v59 }
 0x509 PF: > { %s17_s24 = sadd.s32 1, %s3860_s24  }
 0x50a   : > { %p14_p4 = scmp.ge.s32.totalorder %s17_s24, 4  }
 0x50c   :  { %16 = sbr.rel (!%p14_p4) target bundleno = 1 (0x1), region = 79 }

</bundles_post_ra>
